<compile_context>
chip_gen: v7x
topology: tpu7x:2x2x1
jax: 0.10.0
libtpu: 0.0.40
codegen_flags: <defaults>
</compile_context>

<pallas_src>
import functools

import jax
import jax.numpy as jnp
from jax import lax
from jax.experimental import pallas as pl
from jax.experimental.pallas import tpu as pltpu

BN_EPS = 1e-5  # nn.BatchNorm2d default eps


# ----------------------------- in-kernel helpers -----------------------------

def _fold_channels_lane(s, W, C):
    """(1, W*C) per-(w, c) partial sums -> per-channel totals replicated across w.

    Log-tree of lane rolls with stride C (XLU slot). Requires W to be a power of two.
    """
    r = s
    d = C
    while d < W * C:
        r = r + pltpu.roll(r, shift=d, axis=1)
        d *= 2
    return r


# ----------------------------- fused Pallas kernel -----------------------------

def _convnext_fused_kernel(x_ref, p_ref, wblk_ref, o_ref, zp_ref, *, C):
    B, H, WC = x_ref.shape
    W = WC // C
    BH = B * H
    inv_n = 1.0 / float(B * H * W)

    def ch_stats(a):
        # Single sweep: per-channel sum & sum-of-squares; fold over W via lane rolls.
        s = jnp.sum(jnp.sum(a, axis=1, keepdims=True), axis=0, keepdims=True)
        sq = jnp.sum(jnp.sum(a * a, axis=1, keepdims=True), axis=0, keepdims=True)
        s = _fold_channels_lane(s.reshape(1, WC), W, C)
        sq = _fold_channels_lane(sq.reshape(1, WC), W, C)
        mean = s * inv_n
        var = sq * inv_n - mean * mean      # biased batch variance, f32 accumulation
        return mean, var                    # each (1, W*C), per-channel, tiled over w

    x = x_ref[...]                                          # (B, H, W*C), f32

    # ---- collapsed double-PreNorm BatchNorm: only per-channel scale0/shift0 needed ----
    mean0, var0 = ch_stats(x)
    ga = p_ref[9:10, :]
    gb = p_ref[10:11, :]
    bb = p_ref[11:12, :]
    inv0 = lax.rsqrt(var0 + BN_EPS)
    var_b = (ga * ga) * var0 * (inv0 * inv0)                # batch var of BN_a's output
    scale0 = ga * gb * inv0 * lax.rsqrt(var_b + BN_EPS)
    shift0 = bb - mean0 * scale0                            # z = x*scale0 + shift0 (never built)

    # ---- zero-H-padded VMEM copy of *x* (prenorm folded into taps, so no scaled copy) ----
    zp_ref[:, 0:1, :] = jnp.zeros((B, 1, WC), jnp.float32)
    zp_ref[:, H + 1:H + 2, :] = jnp.zeros((B, 1, WC), jnp.float32)
    zp_ref[:, 1:H + 1, :] = x

    # Depthwise taps (wrapper pre-tiled across W and zeroed at W-wrap positions).
    taps = [p_ref[k:k + 1, :] for k in range(9)]            # raw taps, (1, W*C) each
    staps = [tp * scale0 for tp in taps]                    # prenorm scale folded in

    # Shift contribution of the prenorm: shift0 * (sum of taps over in-bounds neighbors).
    # W-bounds are already encoded in the masked taps; H-bounds handled per row.
    rsum0 = taps[0] + taps[1] + taps[2]                     # kh = 0 row (needs h-1 valid)
    rsum1 = taps[3] + taps[4] + taps[5]                     # kh = 1 row (always valid)
    rsum2 = taps[6] + taps[7] + taps[8]                     # kh = 2 row (needs h+1 valid)
    bias_top = (shift0 * (rsum1 + rsum2)).reshape(1, 1, WC)
    bias_mid = (shift0 * (rsum0 + rsum1 + rsum2)).reshape(1, 1, WC)
    bias_bot = (shift0 * (rsum0 + rsum1)).reshape(1, 1, WC)
    parts = [bias_top]
    if H > 2:
        parts.append(jnp.broadcast_to(bias_mid, (1, H - 2, WC)))
    parts.append(bias_bot)
    bias = jnp.concatenate(parts, axis=1)                   # (1, H, W*C)

    # ---- depthwise 3x3: kh taps = row slices of padded scratch, kw taps = lane rolls ----
    acc = None
    for kh in range(3):
        wh = zp_ref[:, kh:kh + H, :]                        # input rows h + kh - 1
        term = wh * staps[kh * 3 + 1]                                        # w
        acc = term if acc is None else acc + term
        acc = acc + pltpu.roll(wh, shift=C, axis=2) * staps[kh * 3 + 0]      # w - 1
        acc = acc + pltpu.roll(wh, shift=WC - C, axis=2) * staps[kh * 3 + 2] # w + 1
    acc = acc + bias                                        # = DWConv3x3(BN_b(BN_a(x)))

    # ---- BatchNorm(hidden) + Mish ----
    mean1, var1 = ch_stats(acc)
    s1 = p_ref[12:13, :] * lax.rsqrt(var1 + BN_EPS)
    t = acc * s1 + (p_ref[13:14, :] - mean1 * s1)
    # Mish: tanh(softplus(t)) = ((1+e^t)^2 - 1)/((1+e^t)^2 + 1) -> one exp + one reciprocal
    e = jnp.exp(jnp.minimum(t, 20.0))
    q = e * (e + 2.0)                                       # (1+e)^2 - 1
    t = jnp.where(t > 20.0, t, t * q * pl.reciprocal(q + 2.0, approx=True))

    # ---- 1x1 conv: lane-dense bf16 MXU matmul against block-diagonal weight ----
    t2 = jnp.dot(t.reshape(BH, WC).astype(jnp.bfloat16), wblk_ref[...],
                 preferred_element_type=jnp.float32).reshape(B, H, WC)

    # ---- BatchNorm(oup) + residual, lane-dense store ----
    mean2, var2 = ch_stats(t2)                              # Co == C, same fold stride
    s2 = p_ref[14:15, :] * lax.rsqrt(var2 + BN_EPS)
    o_ref[...] = x + t2 * s2 + (p_ref[15:16, :] - mean2 * s2)


# ----------------------------- wrappers -----------------------------

def _convnext_pallas_nhwc(x_nhwc, params):
    """Transpose-free lane-dense path: x is NHWC, output is NHWC."""
    x = x_nhwc.astype(jnp.float32)
    B, H, W, C = x.shape
    Co = params["w_pw"].shape[1]
    assert Co == C, "residual path requires oup == inp"
    assert W >= 2 and (W & (W - 1)) == 0, "W must be a power of two for the lane-roll fold"
    assert (W * C) % 128 == 0, "W*C must be a multiple of 128 for lane-dense layout"
    assert H >= 2, "H >= 2 required by the boundary-row bias construction"
    WC = W * C

    x_lane = x.reshape(B, H, WC)        # free view; lane index = w*C + c (lane-dense)

    def tile_w(p):                      # (1, C) per-channel -> (1, W*C) per-lane
        return jnp.tile(p.astype(jnp.float32).reshape(1, C), (1, W))

    # Depthwise taps tiled across W; zero the columns where a +/-1 W-shift would wrap.
    w_dw_t = jnp.tile(params["w_dw"].astype(jnp.float32), (1, W))   # (9, W*C)
    w_idx = jnp.arange(WC) // C
    kw_idx = jnp.arange(9) % 3
    wrap = ((kw_idx[:, None] == 0) & (w_idx[None, :] == 0)) | \
           ((kw_idx[:, None] == 2) & (w_idx[None, :] == W - 1))
    w_dw_t = jnp.where(wrap, 0.0, w_dw_t)

    # Single packed (16, W*C) parameter slab: rows 0-8 taps, 9 g_a, 10 g_b, 11 b_b,
    # 12 g1, 13 b1, 14 g2, 15 b2.  (b_a cancels in the analytic prenorm collapse.)
    packed = jnp.concatenate(
        [w_dw_t,
         tile_w(params["g_a"]), tile_w(params["g_b"]), tile_w(params["b_b"]),
         tile_w(params["g1"]), tile_w(params["b1"]),
         tile_w(params["g2"]), tile_w(params["b2"])], axis=0)

    # Block-diagonal pointwise weight: lane-dense 1x1 conv as one (BH, WC) x (WC, WC) matmul.
    w_blk = jnp.kron(jnp.eye(W, dtype=jnp.float32),
                     params["w_pw"].astype(jnp.float32)).astype(jnp.bfloat16)

    # Scoped-VMEM budget from the actual live set, clamped to a safe [32 MiB, 64 MiB].
    act_bytes = B * H * WC * 4
    scratch_bytes = B * (H + 2) * WC * 4
    vmem_bytes = int(min(64 * 1024 * 1024,
                         max(32 * 1024 * 1024,
                             12 * act_bytes + 2 * scratch_bytes
                             + 4 * WC * WC * 2 + 2 * 16 * WC * 4 + (4 << 20))))

    vmem = pl.BlockSpec(memory_space=pltpu.MemorySpace.VMEM)
    out_lane = pl.pallas_call(
        functools.partial(_convnext_fused_kernel, C=C),
        out_shape=jax.ShapeDtypeStruct((B, H, WC), jnp.float32),
        in_specs=[vmem, vmem, vmem],
        out_specs=vmem,
        scratch_shapes=[pltpu.VMEM((B, H + 2, WC), jnp.float32)],   # H-padded dwconv input
        compiler_params=pltpu.CompilerParams(vmem_limit_bytes=vmem_bytes),
    )(x_lane, packed, w_blk)

    return out_lane.reshape(B, H, W, Co)


@jax.jit
def convnext_forward_nhwc(x_nhwc, params):
    return _convnext_pallas_nhwc(x_nhwc, params)


@jax.jit
def convnext_forward(x_nchw, params):
    """ConvNext(inp, oup=inp, downsample=False, expansion=1) forward in NCHW.

    The two transposes exist only for PyTorch NCHW interface parity; in a full network
    keep activations NHWC / lane-dense and call convnext_forward_nhwc directly.
    """
    x = jnp.transpose(x_nchw, (0, 2, 3, 1))
    y = _convnext_pallas_nhwc(x, params)
    return jnp.transpose(y, (0, 3, 1, 2))


# ----------------------------- pure-JAX reference (mirrors PyTorch NCHW) -----------------------------

def _softplus_ref(t):
    return jnp.where(t > 20.0, t, jnp.log1p(jnp.exp(jnp.minimum(t, 20.0))))


def _mish_ref(t):
    return t * jnp.tanh(_softplus_ref(t))


def convnext_reference(x, params):
    def bn(t, g, b):
        u = jnp.mean(t, axis=(0, 2, 3), keepdims=True)
        v = jnp.mean((t - u) ** 2, axis=(0, 2, 3), keepdims=True)
        return (t - u) / jnp.sqrt(v + BN_EPS) * g.reshape(1, -1, 1, 1) + b.reshape(1, -1, 1, 1)

    C = x.shape[1]
    Co = params["w_pw"].shape[1]
    y = bn(x, params["g_a"][0], params["b_a"][0])
    y = bn(y, params["g_b"][0], params["b_b"][0])
    w_dw = params["w_dw"].T.reshape(C, 1, 3, 3)        # (C,1,3,3) OIHW depthwise
    y = lax.conv_general_dilated(y, w_dw, (1, 1), ((1, 1), (1, 1)),
                                 feature_group_count=C,
                                 dimension_numbers=("NCHW", "OIHW", "NCHW"))
    y = bn(y, params["g1"][0], params["b1"][0])
    y = _mish_ref(y)
    w_pw = params["w_pw"].T.reshape(Co, C, 1, 1)       # (Co,C,1,1) OIHW
    y = lax.conv_general_dilated(y, w_pw, (1, 1), "VALID",
                                 dimension_numbers=("NCHW", "OIHW", "NCHW"))
    y = bn(y, params["g2"][0], params["b2"][0])
    return x + y


# ----------------------------- demo -----------------------------

if __name__ == "__main__":
    B, C, H, W = 2, 32, 16, 16
    Co = C  # residual path (downsample=False) requires oup == inp

    key = jax.random.PRNGKey(0)
    kx, *kp = jax.random.split(key, 12)
    x = jax.random.normal(kx, (B, C, H, W), jnp.float32)

    params = {
        # PreNorm (outer / inner) BatchNorm2d(inp) affine params
        "g_a": 1.0 + 0.1 * jax.random.normal(kp[0], (1, C), jnp.float32),
        "b_a": 0.1 * jax.random.normal(kp[1], (1, C), jnp.float32),
        "g_b": 1.0 + 0.1 * jax.random.normal(kp[2], (1, C), jnp.float32),
        "b_b": 0.1 * jax.random.normal(kp[3], (1, C), jnp.float32),
        # depthwise 3x3 weight, laid out as (9, C): row kh*3+kw, torch shape (C,1,3,3)
        "w_dw": 0.2 * jax.random.normal(kp[4], (9, C), jnp.float32),
        "g1": 1.0 + 0.1 * jax.random.normal(kp[5], (1, C), jnp.float32),
        "b1": 0.1 * jax.random.normal(kp[6], (1, C), jnp.float32),
        # pointwise 1x1 weight, laid out as (Cin, Cout) = torch (Cout, Cin, 1, 1).T
        "w_pw": 0.1 * jax.random.normal(kp[7], (C, Co), jnp.float32),
        "g2": 1.0 + 0.1 * jax.random.normal(kp[8], (1, Co), jnp.float32),
        "b2": 0.1 * jax.random.normal(kp[9], (1, Co), jnp.float32),
    }

    out = jax.block_until_ready(convnext_forward(x, params))
    ref = jax.block_until_ready(convnext_reference(x, params))

    assert out.shape == (B, Co, H, W), out.shape
    # bf16 MXU operands (f32 accumulation) add ~1e-2 worst-case deviation after BN2;
    # the rest of the pipeline is f32.
    max_err = float(jnp.max(jnp.abs(out - ref)))
    if max_err > 3e-2:
        raise AssertionError(f"mismatch vs reference: max_err={max_err}")
    print("KERNEL_OK")
</pallas_src>

<mosaic_0001>
module attributes {stable_mosaic.version = 11 : i64} {
  func.func @_convnext_fused_kernel(%arg0: memref<2x16x512xf32, #tpu.memory_space<vmem>>, %arg1: memref<16x512xf32, #tpu.memory_space<vmem>>, %arg2: memref<512x512xbf16, #tpu.memory_space<vmem>>, %arg3: memref<2x16x512xf32, #tpu.memory_space<vmem>>, %arg4: memref<2x18x512xf32, #tpu.memory_space<vmem>>) attributes {dimension_semantics = [], scalar_prefetch = 0 : i64, scratch_operands = 1 : i64, tpu.core_type = #tpu.core_type<tc>} {
    %c0 = arith.constant 0 : index
    %c0_0 = arith.constant 0 : index
    %c0_1 = arith.constant 0 : index
    %0 = vector.load %arg0[%c0, %c0_0, %c0_1] : memref<2x16x512xf32, #tpu.memory_space<vmem>>, vector<2x16x512xf32>
    %cst = arith.constant dense<0.000000e+00> : vector<2x512xf32>
    %1 = vector.multi_reduction <add>, %0, %cst [1] : vector<2x16x512xf32> to vector<2x512xf32>
    %2 = vector.shape_cast %1 : vector<2x512xf32> to vector<2x1x512xf32>
    %cst_2 = arith.constant dense<0.000000e+00> : vector<1x512xf32>
    %3 = vector.multi_reduction <add>, %2, %cst_2 [0] : vector<2x1x512xf32> to vector<1x512xf32>
    %4 = vector.shape_cast %3 : vector<1x512xf32> to vector<1x1x512xf32>
    %5 = arith.mulf %0, %0 : vector<2x16x512xf32>
    %cst_3 = arith.constant dense<0.000000e+00> : vector<2x512xf32>
    %6 = vector.multi_reduction <add>, %5, %cst_3 [1] : vector<2x16x512xf32> to vector<2x512xf32>
    %7 = vector.shape_cast %6 : vector<2x512xf32> to vector<2x1x512xf32>
    %cst_4 = arith.constant dense<0.000000e+00> : vector<1x512xf32>
    %8 = vector.multi_reduction <add>, %7, %cst_4 [0] : vector<2x1x512xf32> to vector<1x512xf32>
    %9 = vector.shape_cast %8 : vector<1x512xf32> to vector<1x1x512xf32>
    %10 = vector.shape_cast %4 : vector<1x1x512xf32> to vector<1x512xf32>
    %c32_i32 = arith.constant 32 : i32
    %11 = tpu.dynamic_rotate %10 by %c32_i32 dim 1 : vector<1x512xf32>, i32 -> vector<1x512xf32>
    %12 = arith.addf %10, %11 : vector<1x512xf32>
    %c64_i32 = arith.constant 64 : i32
    %13 = tpu.dynamic_rotate %12 by %c64_i32 dim 1 : vector<1x512xf32>, i32 -> vector<1x512xf32>
    %14 = arith.addf %12, %13 : vector<1x512xf32>
    %c128_i32 = arith.constant 128 : i32
    %15 = tpu.dynamic_rotate %14 by %c128_i32 dim 1 : vector<1x512xf32>, i32 -> vector<1x512xf32>
    %16 = arith.addf %14, %15 : vector<1x512xf32>
    %c256_i32 = arith.constant 256 : i32
    %17 = tpu.dynamic_rotate %16 by %c256_i32 dim 1 : vector<1x512xf32>, i32 -> vector<1x512xf32>
    %18 = arith.addf %16, %17 : vector<1x512xf32>
    %19 = vector.shape_cast %9 : vector<1x1x512xf32> to vector<1x512xf32>
    %c32_i32_5 = arith.constant 32 : i32
    %20 = tpu.dynamic_rotate %19 by %c32_i32_5 dim 1 : vector<1x512xf32>, i32 -> vector<1x512xf32>
    %21 = arith.addf %19, %20 : vector<1x512xf32>
    %c64_i32_6 = arith.constant 64 : i32
    %22 = tpu.dynamic_rotate %21 by %c64_i32_6 dim 1 : vector<1x512xf32>, i32 -> vector<1x512xf32>
    %23 = arith.addf %21, %22 : vector<1x512xf32>
    %c128_i32_7 = arith.constant 128 : i32
    %24 = tpu.dynamic_rotate %23 by %c128_i32_7 dim 1 : vector<1x512xf32>, i32 -> vector<1x512xf32>
    %25 = arith.addf %23, %24 : vector<1x512xf32>
    %c256_i32_8 = arith.constant 256 : i32
    %26 = tpu.dynamic_rotate %25 by %c256_i32_8 dim 1 : vector<1x512xf32>, i32 -> vector<1x512xf32>
    %27 = arith.addf %25, %26 : vector<1x512xf32>
    %cst_9 = arith.constant 0.001953125 : f32
    %28 = vector.broadcast %cst_9 : f32 to vector<1x512xf32>
    %29 = arith.mulf %18, %28 : vector<1x512xf32>
    %cst_10 = arith.constant 0.001953125 : f32
    %30 = vector.broadcast %cst_10 : f32 to vector<1x512xf32>
    %31 = arith.mulf %27, %30 : vector<1x512xf32>
    %32 = arith.mulf %29, %29 : vector<1x512xf32>
    %33 = arith.subf %31, %32 : vector<1x512xf32>
    %c9 = arith.constant 9 : index
    %c0_11 = arith.constant 0 : index
    %34 = vector.load %arg1[%c9, %c0_11] : memref<16x512xf32, #tpu.memory_space<vmem>>, vector<1x512xf32>
    %c10 = arith.constant 10 : index
    %c0_12 = arith.constant 0 : index
    %35 = vector.load %arg1[%c10, %c0_12] : memref<16x512xf32, #tpu.memory_space<vmem>>, vector<1x512xf32>
    %c11 = arith.constant 11 : index
    %c0_13 = arith.constant 0 : index
    %36 = vector.load %arg1[%c11, %c0_13] : memref<16x512xf32, #tpu.memory_space<vmem>>, vector<1x512xf32>
    %cst_14 = arith.constant 9.99999974E-6 : f32
    %37 = vector.broadcast %cst_14 : f32 to vector<1x512xf32>
    %38 = arith.addf %33, %37 : vector<1x512xf32>
    %39 = math.rsqrt %38 : vector<1x512xf32>
    %40 = arith.mulf %34, %34 : vector<1x512xf32>
    %41 = arith.mulf %40, %33 : vector<1x512xf32>
    %42 = arith.mulf %39, %39 : vector<1x512xf32>
    %43 = arith.mulf %41, %42 : vector<1x512xf32>
    %44 = arith.mulf %34, %35 : vector<1x512xf32>
    %45 = arith.mulf %44, %39 : vector<1x512xf32>
    %cst_15 = arith.constant 9.99999974E-6 : f32
    %46 = vector.broadcast %cst_15 : f32 to vector<1x512xf32>
    %47 = arith.addf %43, %46 : vector<1x512xf32>
    %48 = math.rsqrt %47 : vector<1x512xf32>
    %49 = arith.mulf %45, %48 : vector<1x512xf32>
    %50 = arith.mulf %29, %49 : vector<1x512xf32>
    %51 = arith.subf %36, %50 : vector<1x512xf32>
    %cst_16 = arith.constant 0.000000e+00 : f32
    %52 = vector.broadcast %cst_16 : f32 to vector<2x1x512xf32>
    %c0_17 = arith.constant 0 : index
    %c0_18 = arith.constant 0 : index
    %c0_19 = arith.constant 0 : index
    %53 = vector.load %arg4[%c0_17, %c0_18, %c0_19] : memref<2x18x512xf32, #tpu.memory_space<vmem>>, vector<2x1x512xf32>
    tpu.vector_store %arg4[%c0_17, %c0_18, %c0_19], %52 {strides = array<i32>} : memref<2x18x512xf32, #tpu.memory_space<vmem>>, vector<2x1x512xf32>,
    %cst_20 = arith.constant 0.000000e+00 : f32
    %54 = vector.broadcast %cst_20 : f32 to vector<2x1x512xf32>
    %c0_21 = arith.constant 0 : index
    %c17 = arith.constant 17 : index
    %c0_22 = arith.constant 0 : index
    %55 = vector.load %arg4[%c0_21, %c17, %c0_22] : memref<2x18x512xf32, #tpu.memory_space<vmem>>, vector<2x1x512xf32>
    tpu.vector_store %arg4[%c0_21, %c17, %c0_22], %54 {strides = array<i32>} : memref<2x18x512xf32, #tpu.memory_space<vmem>>, vector<2x1x512xf32>,
    %c0_23 = arith.constant 0 : index
    %c1 = arith.constant 1 : index
    %c0_24 = arith.constant 0 : index
    %56 = vector.load %arg4[%c0_23, %c1, %c0_24] : memref<2x18x512xf32, #tpu.memory_space<vmem>>, vector<2x16x512xf32>
    tpu.vector_store %arg4[%c0_23, %c1, %c0_24], %0 {strides = array<i32>} : memref<2x18x512xf32, #tpu.memory_space<vmem>>, vector<2x16x512xf32>,
    %c0_25 = arith.constant 0 : index
    %c0_26 = arith.constant 0 : index
    %57 = vector.load %arg1[%c0_25, %c0_26] : memref<16x512xf32, #tpu.memory_space<vmem>>, vector<1x512xf32>
    %c1_27 = arith.constant 1 : index
    %c0_28 = arith.constant 0 : index
    %58 = vector.load %arg1[%c1_27, %c0_28] : memref<16x512xf32, #tpu.memory_space<vmem>>, vector<1x512xf32>
    %c2 = arith.constant 2 : index
    %c0_29 = arith.constant 0 : index
    %59 = vector.load %arg1[%c2, %c0_29] : memref<16x512xf32, #tpu.memory_space<vmem>>, vector<1x512xf32>
    %c3 = arith.constant 3 : index
    %c0_30 = arith.constant 0 : index
    %60 = vector.load %arg1[%c3, %c0_30] : memref<16x512xf32, #tpu.memory_space<vmem>>, vector<1x512xf32>
    %c4 = arith.constant 4 : index
    %c0_31 = arith.constant 0 : index
    %61 = vector.load %arg1[%c4, %c0_31] : memref<16x512xf32, #tpu.memory_space<vmem>>, vector<1x512xf32>
    %c5 = arith.constant 5 : index
    %c0_32 = arith.constant 0 : index
    %62 = vector.load %arg1[%c5, %c0_32] : memref<16x512xf32, #tpu.memory_space<vmem>>, vector<1x512xf32>
    %c6 = arith.constant 6 : index
    %c0_33 = arith.constant 0 : index
    %63 = vector.load %arg1[%c6, %c0_33] : memref<16x512xf32, #tpu.memory_space<vmem>>, vector<1x512xf32>
    %c7 = arith.constant 7 : index
    %c0_34 = arith.constant 0 : index
    %64 = vector.load %arg1[%c7, %c0_34] : memref<16x512xf32, #tpu.memory_space<vmem>>, vector<1x512xf32>
    %c8 = arith.constant 8 : index
    %c0_35 = arith.constant 0 : index
    %65 = vector.load %arg1[%c8, %c0_35] : memref<16x512xf32, #tpu.memory_space<vmem>>, vector<1x512xf32>
    %66 = arith.mulf %57, %49 : vector<1x512xf32>
    %67 = arith.mulf %58, %49 : vector<1x512xf32>
    %68 = arith.mulf %59, %49 : vector<1x512xf32>
    %69 = arith.mulf %60, %49 : vector<1x512xf32>
    %70 = arith.mulf %61, %49 : vector<1x512xf32>
    %71 = arith.mulf %62, %49 : vector<1x512xf32>
    %72 = arith.mulf %63, %49 : vector<1x512xf32>
    %73 = arith.mulf %64, %49 : vector<1x512xf32>
    %74 = arith.mulf %65, %49 : vector<1x512xf32>
    %75 = arith.addf %57, %58 : vector<1x512xf32>
    %76 = arith.addf %75, %59 : vector<1x512xf32>
    %77 = arith.addf %60, %61 : vector<1x512xf32>
    %78 = arith.addf %77, %62 : vector<1x512xf32>
    %79 = arith.addf %63, %64 : vector<1x512xf32>
    %80 = arith.addf %79, %65 : vector<1x512xf32>
    %81 = arith.addf %78, %80 : vector<1x512xf32>
    %82 = arith.mulf %51, %81 : vector<1x512xf32>
    %83 = vector.shape_cast %82 : vector<1x512xf32> to vector<1x1x512xf32>
    %84 = arith.addf %76, %78 : vector<1x512xf32>
    %85 = arith.addf %84, %80 : vector<1x512xf32>
    %86 = arith.mulf %51, %85 : vector<1x512xf32>
    %87 = vector.shape_cast %86 : vector<1x512xf32> to vector<1x1x512xf32>
    %88 = arith.addf %76, %78 : vector<1x512xf32>
    %89 = arith.mulf %51, %88 : vector<1x512xf32>
    %90 = vector.shape_cast %89 : vector<1x512xf32> to vector<1x1x512xf32>
    %91 = vector.shape_cast %87 : vector<1x1x512xf32> to vector<1x1x512xf32>
    %92 = vector.broadcast %91 : vector<1x1x512xf32> to vector<1x14x512xf32>
    %93 = tpu.concatenate %83, %92, %90 in 1 : vector<1x1x512xf32>, vector<1x14x512xf32>, vector<1x1x512xf32> -> vector<1x16x512xf32>
    %c0_36 = arith.constant 0 : index
    %c0_37 = arith.constant 0 : index
    %c0_38 = arith.constant 0 : index
    %94 = vector.load %arg4[%c0_36, %c0_37, %c0_38] : memref<2x18x512xf32, #tpu.memory_space<vmem>>, vector<2x16x512xf32>
    %95 = vector.shape_cast %67 : vector<1x512xf32> to vector<1x1x512xf32>
    %96 = vector.broadcast %95 : vector<1x1x512xf32> to vector<2x16x512xf32>
    %97 = arith.mulf %94, %96 : vector<2x16x512xf32>
    %c32_i32_39 = arith.constant 32 : i32
    %98 = tpu.dynamic_rotate %94 by %c32_i32_39 dim 2 : vector<2x16x512xf32>, i32 -> vector<2x16x512xf32>
    %99 = vector.shape_cast %66 : vector<1x512xf32> to vector<1x1x512xf32>
    %100 = vector.broadcast %99 : vector<1x1x512xf32> to vector<2x16x512xf32>
    %101 = arith.mulf %98, %100 : vector<2x16x512xf32>
    %102 = arith.addf %97, %101 : vector<2x16x512xf32>
    %c480_i32 = arith.constant 480 : i32
    %103 = tpu.dynamic_rotate %94 by %c480_i32 dim 2 : vector<2x16x512xf32>, i32 -> vector<2x16x512xf32>
    %104 = vector.shape_cast %68 : vector<1x512xf32> to vector<1x1x512xf32>
    %105 = vector.broadcast %104 : vector<1x1x512xf32> to vector<2x16x512xf32>
    %106 = arith.mulf %103, %105 : vector<2x16x512xf32>
    %107 = arith.addf %102, %106 : vector<2x16x512xf32>
    %c0_40 = arith.constant 0 : index
    %c1_41 = arith.constant 1 : index
    %c0_42 = arith.constant 0 : index
    %108 = vector.load %arg4[%c0_40, %c1_41, %c0_42] : memref<2x18x512xf32, #tpu.memory_space<vmem>>, vector<2x16x512xf32>
    %109 = vector.shape_cast %70 : vector<1x512xf32> to vector<1x1x512xf32>
    %110 = vector.broadcast %109 : vector<1x1x512xf32> to vector<2x16x512xf32>
    %111 = arith.mulf %108, %110 : vector<2x16x512xf32>
    %112 = arith.addf %107, %111 : vector<2x16x512xf32>
    %c32_i32_43 = arith.constant 32 : i32
    %113 = tpu.dynamic_rotate %108 by %c32_i32_43 dim 2 : vector<2x16x512xf32>, i32 -> vector<2x16x512xf32>
    %114 = vector.shape_cast %69 : vector<1x512xf32> to vector<1x1x512xf32>
    %115 = vector.broadcast %114 : vector<1x1x512xf32> to vector<2x16x512xf32>
    %116 = arith.mulf %113, %115 : vector<2x16x512xf32>
    %117 = arith.addf %112, %116 : vector<2x16x512xf32>
    %c480_i32_44 = arith.constant 480 : i32
    %118 = tpu.dynamic_rotate %108 by %c480_i32_44 dim 2 : vector<2x16x512xf32>, i32 -> vector<2x16x512xf32>
    %119 = vector.shape_cast %71 : vector<1x512xf32> to vector<1x1x512xf32>
    %120 = vector.broadcast %119 : vector<1x1x512xf32> to vector<2x16x512xf32>
    %121 = arith.mulf %118, %120 : vector<2x16x512xf32>
    %122 = arith.addf %117, %121 : vector<2x16x512xf32>
    %c0_45 = arith.constant 0 : index
    %c2_46 = arith.constant 2 : index
    %c0_47 = arith.constant 0 : index
    %123 = vector.load %arg4[%c0_45, %c2_46, %c0_47] : memref<2x18x512xf32, #tpu.memory_space<vmem>>, vector<2x16x512xf32>
    %124 = vector.shape_cast %73 : vector<1x512xf32> to vector<1x1x512xf32>
    %125 = vector.broadcast %124 : vector<1x1x512xf32> to vector<2x16x512xf32>
    %126 = arith.mulf %123, %125 : vector<2x16x512xf32>
    %127 = arith.addf %122, %126 : vector<2x16x512xf32>
    %c32_i32_48 = arith.constant 32 : i32
    %128 = tpu.dynamic_rotate %123 by %c32_i32_48 dim 2 : vector<2x16x512xf32>, i32 -> vector<2x16x512xf32>
    %129 = vector.shape_cast %72 : vector<1x512xf32> to vector<1x1x512xf32>
    %130 = vector.broadcast %129 : vector<1x1x512xf32> to vector<2x16x512xf32>
    %131 = arith.mulf %128, %130 : vector<2x16x512xf32>
    %132 = arith.addf %127, %131 : vector<2x16x512xf32>
    %c480_i32_49 = arith.constant 480 : i32
    %133 = tpu.dynamic_rotate %123 by %c480_i32_49 dim 2 : vector<2x16x512xf32>, i32 -> vector<2x16x512xf32>
    %134 = vector.shape_cast %74 : vector<1x512xf32> to vector<1x1x512xf32>
    %135 = vector.broadcast %134 : vector<1x1x512xf32> to vector<2x16x512xf32>
    %136 = arith.mulf %133, %135 : vector<2x16x512xf32>
    %137 = arith.addf %132, %136 : vector<2x16x512xf32>
    %138 = vector.broadcast %93 : vector<1x16x512xf32> to vector<2x16x512xf32>
    %139 = arith.addf %137, %138 : vector<2x16x512xf32>
    %cst_50 = arith.constant dense<0.000000e+00> : vector<2x512xf32>
    %140 = vector.multi_reduction <add>, %139, %cst_50 [1] : vector<2x16x512xf32> to vector<2x512xf32>
    %141 = vector.shape_cast %140 : vector<2x512xf32> to vector<2x1x512xf32>
    %cst_51 = arith.constant dense<0.000000e+00> : vector<1x512xf32>
    %142 = vector.multi_reduction <add>, %141, %cst_51 [0] : vector<2x1x512xf32> to vector<1x512xf32>
    %143 = vector.shape_cast %142 : vector<1x512xf32> to vector<1x1x512xf32>
    %144 = arith.mulf %139, %139 : vector<2x16x512xf32>
    %cst_52 = arith.constant dense<0.000000e+00> : vector<2x512xf32>
    %145 = vector.multi_reduction <add>, %144, %cst_52 [1] : vector<2x16x512xf32> to vector<2x512xf32>
    %146 = vector.shape_cast %145 : vector<2x512xf32> to vector<2x1x512xf32>
    %cst_53 = arith.constant dense<0.000000e+00> : vector<1x512xf32>
    %147 = vector.multi_reduction <add>, %146, %cst_53 [0] : vector<2x1x512xf32> to vector<1x512xf32>
    %148 = vector.shape_cast %147 : vector<1x512xf32> to vector<1x1x512xf32>
    %149 = vector.shape_cast %143 : vector<1x1x512xf32> to vector<1x512xf32>
    %c32_i32_54 = arith.constant 32 : i32
    %150 = tpu.dynamic_rotate %149 by %c32_i32_54 dim 1 : vector<1x512xf32>, i32 -> vector<1x512xf32>
    %151 = arith.addf %149, %150 : vector<1x512xf32>
    %c64_i32_55 = arith.constant 64 : i32
    %152 = tpu.dynamic_rotate %151 by %c64_i32_55 dim 1 : vector<1x512xf32>, i32 -> vector<1x512xf32>
    %153 = arith.addf %151, %152 : vector<1x512xf32>
    %c128_i32_56 = arith.constant 128 : i32
    %154 = tpu.dynamic_rotate %153 by %c128_i32_56 dim 1 : vector<1x512xf32>, i32 -> vector<1x512xf32>
    %155 = arith.addf %153, %154 : vector<1x512xf32>
    %c256_i32_57 = arith.constant 256 : i32
    %156 = tpu.dynamic_rotate %155 by %c256_i32_57 dim 1 : vector<1x512xf32>, i32 -> vector<1x512xf32>
    %157 = arith.addf %155, %156 : vector<1x512xf32>
    %158 = vector.shape_cast %148 : vector<1x1x512xf32> to vector<1x512xf32>
    %c32_i32_58 = arith.constant 32 : i32
    %159 = tpu.dynamic_rotate %158 by %c32_i32_58 dim 1 : vector<1x512xf32>, i32 -> vector<1x512xf32>
    %160 = arith.addf %158, %159 : vector<1x512xf32>
    %c64_i32_59 = arith.constant 64 : i32
    %161 = tpu.dynamic_rotate %160 by %c64_i32_59 dim 1 : vector<1x512xf32>, i32 -> vector<1x512xf32>
    %162 = arith.addf %160, %161 : vector<1x512xf32>
    %c128_i32_60 = arith.constant 128 : i32
    %163 = tpu.dynamic_rotate %162 by %c128_i32_60 dim 1 : vector<1x512xf32>, i32 -> vector<1x512xf32>
    %164 = arith.addf %162, %163 : vector<1x512xf32>
    %c256_i32_61 = arith.constant 256 : i32
    %165 = tpu.dynamic_rotate %164 by %c256_i32_61 dim 1 : vector<1x512xf32>, i32 -> vector<1x512xf32>
    %166 = arith.addf %164, %165 : vector<1x512xf32>
    %cst_62 = arith.constant 0.001953125 : f32
    %167 = vector.broadcast %cst_62 : f32 to vector<1x512xf32>
    %168 = arith.mulf %157, %167 : vector<1x512xf32>
    %cst_63 = arith.constant 0.001953125 : f32
    %169 = vector.broadcast %cst_63 : f32 to vector<1x512xf32>
    %170 = arith.mulf %166, %169 : vector<1x512xf32>
    %171 = arith.mulf %168, %168 : vector<1x512xf32>
    %172 = arith.subf %170, %171 : vector<1x512xf32>
    %c12 = arith.constant 12 : index
    %c0_64 = arith.constant 0 : index
    %173 = vector.load %arg1[%c12, %c0_64] : memref<16x512xf32, #tpu.memory_space<vmem>>, vector<1x512xf32>
    %cst_65 = arith.constant 9.99999974E-6 : f32
    %174 = vector.broadcast %cst_65 : f32 to vector<1x512xf32>
    %175 = arith.addf %172, %174 : vector<1x512xf32>
    %176 = math.rsqrt %175 : vector<1x512xf32>
    %177 = arith.mulf %173, %176 : vector<1x512xf32>
    %178 = vector.shape_cast %177 : vector<1x512xf32> to vector<1x1x512xf32>
    %179 = vector.broadcast %178 : vector<1x1x512xf32> to vector<2x16x512xf32>
    %180 = arith.mulf %139, %179 : vector<2x16x512xf32>
    %c13 = arith.constant 13 : index
    %c0_66 = arith.constant 0 : index
    %181 = vector.load %arg1[%c13, %c0_66] : memref<16x512xf32, #tpu.memory_space<vmem>>, vector<1x512xf32>
    %182 = arith.mulf %168, %177 : vector<1x512xf32>
    %183 = arith.subf %181, %182 : vector<1x512xf32>
    %184 = vector.shape_cast %183 : vector<1x512xf32> to vector<1x1x512xf32>
    %185 = vector.broadcast %184 : vector<1x1x512xf32> to vector<2x16x512xf32>
    %186 = arith.addf %180, %185 : vector<2x16x512xf32>
    %cst_67 = arith.constant 2.000000e+01 : f32
    %187 = vector.broadcast %cst_67 : f32 to vector<2x16x512xf32>
    %188 = arith.minimumf %186, %187 : vector<2x16x512xf32>
    %189 = math.exp %188 : vector<2x16x512xf32>
    %cst_68 = arith.constant 2.000000e+00 : f32
    %190 = vector.broadcast %cst_68 : f32 to vector<2x16x512xf32>
    %191 = arith.addf %189, %190 : vector<2x16x512xf32>
    %192 = arith.mulf %189, %191 : vector<2x16x512xf32>
    %cst_69 = arith.constant 2.000000e+01 : f32
    %193 = vector.broadcast %cst_69 : f32 to vector<2x16x512xf32>
    %194 = arith.cmpf ogt, %186, %193 : vector<2x16x512xf32>
    %195 = arith.mulf %186, %192 : vector<2x16x512xf32>
    %cst_70 = arith.constant 2.000000e+00 : f32
    %196 = vector.broadcast %cst_70 : f32 to vector<2x16x512xf32>
    %197 = arith.addf %192, %196 : vector<2x16x512xf32>
    %198 = tpu.reciprocal %197 {approx = true} : vector<2x16x512xf32> -> vector<2x16x512xf32>
    %199 = arith.mulf %195, %198 : vector<2x16x512xf32>
    %200 = arith.select %194, %186, %199 : vector<2x16x512xi1>, vector<2x16x512xf32>
    %201 = vector.shape_cast %200 : vector<2x16x512xf32> to vector<32x512xf32>
    %202 = arith.truncf %201 : vector<32x512xf32> to vector<32x512xbf16>
    %c0_71 = arith.constant 0 : index
    %c0_72 = arith.constant 0 : index
    %203 = vector.load %arg2[%c0_71, %c0_72] : memref<512x512xbf16, #tpu.memory_space<vmem>>, vector<512x512xbf16>
    %cst_73 = arith.constant dense<0.000000e+00> : vector<32x512xf32>
    %204 = tpu.matmul %202, %203, %cst_73 {dimension_numbers = #tpu.dot_dimension_numbers<[1], [0], [0], [1], [0, 0, 1, 1], [], []>} : vector<32x512xbf16>, vector<512x512xbf16>, vector<32x512xf32> -> vector<32x512xf32>
    %205 = vector.shape_cast %204 : vector<32x512xf32> to vector<2x16x512xf32>
    %cst_74 = arith.constant dense<0.000000e+00> : vector<2x512xf32>
    %206 = vector.multi_reduction <add>, %205, %cst_74 [1] : vector<2x16x512xf32> to vector<2x512xf32>
    %207 = vector.shape_cast %206 : vector<2x512xf32> to vector<2x1x512xf32>
    %cst_75 = arith.constant dense<0.000000e+00> : vector<1x512xf32>
    %208 = vector.multi_reduction <add>, %207, %cst_75 [0] : vector<2x1x512xf32> to vector<1x512xf32>
    %209 = vector.shape_cast %208 : vector<1x512xf32> to vector<1x1x512xf32>
    %210 = arith.mulf %205, %205 : vector<2x16x512xf32>
    %cst_76 = arith.constant dense<0.000000e+00> : vector<2x512xf32>
    %211 = vector.multi_reduction <add>, %210, %cst_76 [1] : vector<2x16x512xf32> to vector<2x512xf32>
    %212 = vector.shape_cast %211 : vector<2x512xf32> to vector<2x1x512xf32>
    %cst_77 = arith.constant dense<0.000000e+00> : vector<1x512xf32>
    %213 = vector.multi_reduction <add>, %212, %cst_77 [0] : vector<2x1x512xf32> to vector<1x512xf32>
    %214 = vector.shape_cast %213 : vector<1x512xf32> to vector<1x1x512xf32>
    %215 = vector.shape_cast %209 : vector<1x1x512xf32> to vector<1x512xf32>
    %c32_i32_78 = arith.constant 32 : i32
    %216 = tpu.dynamic_rotate %215 by %c32_i32_78 dim 1 : vector<1x512xf32>, i32 -> vector<1x512xf32>
    %217 = arith.addf %215, %216 : vector<1x512xf32>
    %c64_i32_79 = arith.constant 64 : i32
    %218 = tpu.dynamic_rotate %217 by %c64_i32_79 dim 1 : vector<1x512xf32>, i32 -> vector<1x512xf32>
    %219 = arith.addf %217, %218 : vector<1x512xf32>
    %c128_i32_80 = arith.constant 128 : i32
    %220 = tpu.dynamic_rotate %219 by %c128_i32_80 dim 1 : vector<1x512xf32>, i32 -> vector<1x512xf32>
    %221 = arith.addf %219, %220 : vector<1x512xf32>
    %c256_i32_81 = arith.constant 256 : i32
    %222 = tpu.dynamic_rotate %221 by %c256_i32_81 dim 1 : vector<1x512xf32>, i32 -> vector<1x512xf32>
    %223 = arith.addf %221, %222 : vector<1x512xf32>
    %224 = vector.shape_cast %214 : vector<1x1x512xf32> to vector<1x512xf32>
    %c32_i32_82 = arith.constant 32 : i32
    %225 = tpu.dynamic_rotate %224 by %c32_i32_82 dim 1 : vector<1x512xf32>, i32 -> vector<1x512xf32>
    %226 = arith.addf %224, %225 : vector<1x512xf32>
    %c64_i32_83 = arith.constant 64 : i32
    %227 = tpu.dynamic_rotate %226 by %c64_i32_83 dim 1 : vector<1x512xf32>, i32 -> vector<1x512xf32>
    %228 = arith.addf %226, %227 : vector<1x512xf32>
    %c128_i32_84 = arith.constant 128 : i32
    %229 = tpu.dynamic_rotate %228 by %c128_i32_84 dim 1 : vector<1x512xf32>, i32 -> vector<1x512xf32>
    %230 = arith.addf %228, %229 : vector<1x512xf32>
    %c256_i32_85 = arith.constant 256 : i32
    %231 = tpu.dynamic_rotate %230 by %c256_i32_85 dim 1 : vector<1x512xf32>, i32 -> vector<1x512xf32>
    %232 = arith.addf %230, %231 : vector<1x512xf32>
    %cst_86 = arith.constant 0.001953125 : f32
    %233 = vector.broadcast %cst_86 : f32 to vector<1x512xf32>
    %234 = arith.mulf %223, %233 : vector<1x512xf32>
    %cst_87 = arith.constant 0.001953125 : f32
    %235 = vector.broadcast %cst_87 : f32 to vector<1x512xf32>
    %236 = arith.mulf %232, %235 : vector<1x512xf32>
    %237 = arith.mulf %234, %234 : vector<1x512xf32>
    %238 = arith.subf %236, %237 : vector<1x512xf32>
    %c14 = arith.constant 14 : index
    %c0_88 = arith.constant 0 : index
    %239 = vector.load %arg1[%c14, %c0_88] : memref<16x512xf32, #tpu.memory_space<vmem>>, vector<1x512xf32>
    %cst_89 = arith.constant 9.99999974E-6 : f32
    %240 = vector.broadcast %cst_89 : f32 to vector<1x512xf32>
    %241 = arith.addf %238, %240 : vector<1x512xf32>
    %242 = math.rsqrt %241 : vector<1x512xf32>
    %243 = arith.mulf %239, %242 : vector<1x512xf32>
    %244 = vector.shape_cast %243 : vector<1x512xf32> to vector<1x1x512xf32>
    %245 = vector.broadcast %244 : vector<1x1x512xf32> to vector<2x16x512xf32>
    %246 = arith.mulf %205, %245 : vector<2x16x512xf32>
    %247 = arith.addf %0, %246 : vector<2x16x512xf32>
    %c15 = arith.constant 15 : index
    %c0_90 = arith.constant 0 : index
    %248 = vector.load %arg1[%c15, %c0_90] : memref<16x512xf32, #tpu.memory_space<vmem>>, vector<1x512xf32>
    %249 = arith.mulf %234, %243 : vector<1x512xf32>
    %250 = arith.subf %248, %249 : vector<1x512xf32>
    %251 = vector.shape_cast %250 : vector<1x512xf32> to vector<1x1x512xf32>
    %252 = vector.broadcast %251 : vector<1x1x512xf32> to vector<2x16x512xf32>
    %253 = arith.addf %247, %252 : vector<2x16x512xf32>
    %c0_91 = arith.constant 0 : index
    %c0_92 = arith.constant 0 : index
    %c0_93 = arith.constant 0 : index
    %254 = vector.load %arg3[%c0_91, %c0_92, %c0_93] : memref<2x16x512xf32, #tpu.memory_space<vmem>>, vector<2x16x512xf32>
    tpu.vector_store %arg3[%c0_91, %c0_92, %c0_93], %253 {strides = array<i32>} : memref<2x16x512xf32, #tpu.memory_space<vmem>>, vector<2x16x512xf32>,
    return
  }
}

</mosaic_0001>

<bundles_post_ra>
// kernel: tile.44
= control target key start
LH: loop header
LB: loop body
LE: loop exit
PB: predicated region body
PF: predicated region fallthrough
CT: control target
= control target key end

     0   :  { %s34_s6 = smov 3  ;;  %s37_s7 = smov 12  ;;  %vm39_vm0 = vcmask 1043458   ;;  %vm44_vm1 = vcmask 1045508   ;;  %vm49_vm2 = vcmask 1047558   ;;  %vm110_vm3 = vcmask 1042433   ;;  %s847_s0 = inlined_call_operand.vmem [shape: f32[9,16,32], index: 0, kind: input, shape index: {}]   ;;  %s848_s1 = inlined_call_operand.vmem [shape: f32[9,512], index: 1, kind: output, shape index: {}]  }
   0x1   :  { %v390_v0 = vld [vmem:[%s847_s0 + $0x3] ss:$16 sm:%s34_s6]   ;;  %s42_s12 = smov 48  ;;  %s47_s13 = smov 192  ;;  %v406_v10 = vld [vmem:[%s847_s0 + $0x8b] sm:$0x1]  }
   0x2   :  { %v391_v1 = vld [vmem:[%s847_s0 + $0x3] ss:$16 sm:%s37_s7]   ;;  %s81_s18 = smov 3  ;;  %s84_s21 = smov 12  ;;  %vm115_vm4 = vcmask 1044483   ;;  %vm120_vm5 = vcmask 1046533  }
   0x3   :  { %v40_v2 = vsel %vm39_vm0, %v391_v1, %v390_v0  ;;  %v392_v3 = vld [vmem:[%s847_s0 + $0x3] ss:$16 sm:%s42_s12]   ;;  %v400_v6 = vld [vmem:[%s847_s0 + $0x87] ss:$-16 sm:%s81_s18]   ;;  %s89_s22 = smov 48  ;;  %s94_s27 = smov 192 }
   0x4   :  { %v393_v4 = vld [vmem:[%s847_s0 + $0x3] ss:$16 sm:%s47_s13]   ;;  %v45_v5 = vsel %vm44_vm1, %v392_v3, %v40_v2  ;;  %v401_v8 = vld [vmem:[%s847_s0 - $0x15] ss:$16 sm:%s84_s21]   ;;  %s56_s28 = smov 3  ;;  %s474_s2 = smov 96  }
   0x5   :  { %v50_v7 = vsel %vm49_vm2, %v393_v4, %v45_v5  ;;  %v402_v9 = vld [vmem:[%s847_s0 - $0x15] ss:$16 sm:%s89_s22]   ;;  %v87_v11 = vsel %vm39_vm0, %v401_v8, %v400_v6  ;;  %s59_s5 = smov 12  ;;  %s64_s6 = smov 48  ;;  %v410_v22 = vld [vmem:[%s847_s0 + $0x48] sm:$0x80]  }
   0x6   :  { %51 = vrot.lane.b32.xlu0 %v50_v7, %s474_s2  ;;  %v403_v12 = vld [vmem:[%s847_s0 - $0x15] ss:$16 sm:%s94_s27]   ;;  %v92_v13 = vsel %vm44_vm1, %v402_v9, %v87_v11  ;;  %s69_s11 = smov 192  ;;  %s108_s12 = smov 6  ;;  %vm124_vm6 = vcmask 1047559   ;;  %vm3_vm7 = vcmask 261120  }
   0x7   :  { %v394_v14 = vld [vmem:[%s847_s0 + $0x83] ss:$-124 sm:%s56_s28]   ;;  %v97_v16 = vsel %vm49_vm2, %v403_v12, %v92_v13  ;;  %s113_s17 = smov 24  ;;  %s118_s18 = smov 96  ;;  %v433_v48 = vld [vmem:[%s847_s0 + $0x8a] sm:$0x1]  }
   0x8   :  { %v395_v15 = vld [vmem:[%s847_s0 - $0x9] ss:$16 sm:%s59_s5]   ;;  %98 = vrot.lane.b32.xlu1 %v97_v16, %s474_s2  ;;  %s134_s23 = smov 3  ;;  %s137_s28 = smov 12  ;;  %v437_v53 = vld [vmem:[%s847_s0 + $0x47] sm:$0x80]  }
   0x9   :  { %v62_v17 = vsel %vm39_vm0, %v395_v15, %v394_v14  ;;  %v396_v18 = vld [vmem:[%s847_s0 - $0x9] ss:$16 sm:%s64_s6]   ;;  %v407_v21 = vld [vmem:[%s847_s0 + $0x5b] ss:$16 sm:%s108_s12]   ;;  %s149_s29 = smov 3  ;;  %s152_s4 = smov 12 }
   0xa   :  { %v397_v19 = vld [vmem:[%s847_s0 - $0x9] ss:$16 sm:%s69_s11]   ;;  %v67_v20 = vsel %vm44_vm1, %v396_v18, %v62_v17  ;;  %v111_v24 = vsel %vm110_vm3, %v407_v21, %v406_v10  ;;  %v408_v25 = vld [vmem:[%s847_s0 - $0x21] ss:$16 sm:%s113_s17]   ;;  %s157_s5 = smov 48  ;;  %s162_s10 = smov 192 }
   0xb   :  { %v72_v23 = vsel %vm49_vm2, %v397_v19, %v67_v20  ;;  %v409_v26 = vld [vmem:[%s847_s0 - $0x21] ss:$16 sm:%s118_s18]   ;;  %v116_v27 = vsel %vm115_vm4, %v408_v25, %v111_v24  ;;  %v417_v31 = vld [vmem:[%s847_s0 + $0x2] ss:$16 sm:%s149_s29]   ;;  %s171_s15 = smov 3  ;;  %s174_s16 = smov 12 }
   0xc   :  { %73 = vrot.lane.b32.xlu0 %v72_v23, %s474_s2  ;;  %v413_v28 = vld [vmem:[%s847_s0 + $0x8f] ss:$-48 sm:%s134_s23]   ;;  %v121_v29 = vsel %vm120_vm5, %v409_v26, %v116_v27  ;;  %s179_s19 = smov 48  ;;  %s184_s20 = smov 192  ;;  %v385_v62 = vld [vmem:[%s847_s0 + $0x60] ss:$4 sm:$0xff]  }
   0xd   :  { %v414_v30 = vld [vmem:[%s847_s0 + $0x4f] ss:$16 sm:%s137_s28]   ;;  %v125_v32 = vsel %vm124_vm6, %v410_v22, %v121_v29  ;;  %v418_v34 = vld [vmem:[%s847_s0 + $0x2] ss:$16 sm:%s152_s4]   ;;  %s196_s22 = smov 3  ;;  %s199_s23 = smov 12 }
   0xe   :  { %v140_v33 = vsel %vm39_vm0, %v414_v30, %v413_v28  ;;  %v419_v35 = vld [vmem:[%s847_s0 + $0x2] ss:$16 sm:%s157_s5]   ;;  %126 = vrot.lane.b32.xlu1 %v125_v32, %s474_s2  ;;  %v155_v36 = vsel %vm39_vm0, %v418_v34, %v417_v31  ;;  %s204_s28 = smov 48  ;;  %s209_s29 = smov 192  ;;  %v2_v8 = vld [vmem:[%s847_s0] ss:$4 sm:$0xff]  }
   0xf   :  { %v420_v37 = vld [vmem:[%s847_s0 + $0x2] ss:$16 sm:%s162_s10]   ;;  %v160_v38 = vsel %vm44_vm1, %v419_v35, %v155_v36  ;;  %v422_v41 = vld [vmem:[%s847_s0 - $0xa] ss:$16 sm:%s174_s16]   ;;  %s223_s6 = smov 6  ;;  %s475_s7 = smov 64  }
  0x10   :  { %141 = vrot.lane.b32.xlu0 %v140_v33, %s474_s2  ;;  %v421_v39 = vld [vmem:[%s847_s0 + $0x82] ss:$-124 sm:%s171_s15]   ;;  %v165_v40 = vsel %vm49_vm2, %v420_v37, %v160_v38  ;;  %s228_s12 = smov 24  ;;  %s233_s13 = smov 96  ;;  %v382_v11 = vld [vmem:[%s847_s0 + $0x40] ss:$4 sm:$0xff]  }
  0x11   :  { %v423_v42 = vld [vmem:[%s847_s0 - $0xa] ss:$16 sm:%s179_s19]   ;;  %v177_v43 = vsel %vm39_vm0, %v422_v41, %v421_v39  ;;  %v428_v47 = vld [vmem:[%s847_s0 - $0x16] ss:$16 sm:%s199_s23]   ;;  %s264_s23 = smov 3  ;;  %s277_s4 = smov 192 }
  0x12   :  { %v424_v44 = vld [vmem:[%s847_s0 - $0xa] ss:$16 sm:%s184_s20]   ;;  %166 = vrot.lane.b32.xlu1 %v165_v40, %s475_s7  ;;  %v182_v46 = vsel %vm44_vm1, %v423_v42, %v177_v43  ;;  %s249_s20 = smov 3  ;;  %387 = vst.msk [vmem:[%s848_s1 - $0x19] ss:$8 sm:$0xf0] %vm3_vm7, %v385_v62  }
  0x13   :  { %v427_v45 = vld [vmem:[%s847_s0 + $0x86] ss:$-16 sm:%s196_s22]   ;;  %v187_v49 = vsel %vm49_vm2, %v424_v44, %v182_v46  ;;  %v429_v51 = vld [vmem:[%s847_s0 - $0x16] ss:$16 sm:%s204_s28]   ;;  %s252_s22 = smov 12  ;;  %s267_s28 = smov 12 }
  0x14   :  { %v202_v50 = vsel %vm39_vm0, %v428_v47, %v427_v45  ;;  %v430_v52 = vld [vmem:[%s847_s0 - $0x16] ss:$16 sm:%s209_s29]   ;;  %188 = vrot.lane.b32.xlu0 %v187_v49, %s475_s7  ;;  %s272_s29 = smov 48  ;;  %386 = vst.msk [vmem:[%s848_s1 + $0x6] ss:$8 sm:$0xf] %vm3_vm7, %v385_v62  }
  0x15   :  { %v207_v54 = vsel %vm44_vm1, %v429_v51, %v202_v50  ;;  %v434_v55 = vld [vmem:[%s847_s0 + $0x5a] ss:$16 sm:%s223_s6]   ;;  %v435_v58 = vld [vmem:[%s847_s0 - $0x22] ss:$16 sm:%s228_s12]   ;;  %s286_s12 = smov 3  ;;  %s289_s2 = smov 12 }
  0x16   :  { %v212_v56 = vsel %vm49_vm2, %v430_v52, %v207_v54  ;;  %v226_v57 = vsel %vm110_vm3, %v434_v55, %v433_v48  ;;  %v436_v59 = vld [vmem:[%s847_s0 - $0x22] ss:$16 sm:%s233_s13]   ;;  %v444_v1 = vld [vmem:[%s847_s0 + $0x1] ss:$16 sm:%s264_s23]   ;;  %s294_s21 = smov 48  ;;  %s299_s24 = smov 192 }
  0x17   :  { %213 = vrot.lane.b32.xlu1 %v212_v56, %s475_s7  ;;  %v231_v60 = vsel %vm115_vm4, %v435_v58, %v226_v57  ;;  %v440_v61 = vld [vmem:[%s847_s0 + $0x8e] ss:$-48 sm:%s249_s20]   ;;  %s311_s25 = smov 3  ;;  %4 = vst.msk [vmem:[%s848_s1] ss:$8 sm:$0xf] %vm3_vm7, %v2_v8  }
  0x18   :  { %v236_v63 = vsel %vm120_vm5, %v436_v59, %v231_v60  ;;  %v441_v0 = vld [vmem:[%s847_s0 + $0x4e] ss:$16 sm:%s252_s22]   ;;  %v445_v4 = vld [vmem:[%s847_s0 + $0x1] ss:$16 sm:%s267_s28]   ;;  %s319_s13 = smov 48  ;;  %s324_s14 = smov 192 }
  0x19   :  { %v240_v2 = vsel %vm124_vm6, %v437_v53, %v236_v63  ;;  %v255_v3 = vsel %vm39_vm0, %v441_v0, %v440_v61  ;;  %v446_v5 = vld [vmem:[%s847_s0 + $0x1] ss:$16 sm:%s272_s29]   ;;  %v270_v6 = vsel %vm39_vm0, %v445_v4, %v444_v1  ;;  %s314_s29 = smov 12  ;;  %378 = vst.msk [vmem:[%s848_s1 - $0x1f] ss:$8 sm:$0xf0] %vm3_vm7, %v2_v8  }
  0x1a   :  { %241 = vrot.lane.b32.xlu0 %v240_v2, %s475_s7  ;;  %v447_v7 = vld [vmem:[%s847_s0 + $0x1] ss:$16 sm:%s277_s4]   ;;  %v275_v9 = vsel %vm44_vm1, %v446_v5, %v270_v6  ;;  %v460_v15 = vld [vmem:[%s847_s0 + $0x89] sm:$0x1]   ;;  %s476_s26 = smov 32   ;;  %s348_s28 = smov 96 }
  0x1b   :  { %256 = vrot.lane.b32.xlu1 %v255_v3, %s475_s7  ;;  %v448_v10 = vld [vmem:[%s847_s0 + $0x81] ss:$-124 sm:%s286_s12]   ;;  %v280_v12 = vsel %vm49_vm2, %v447_v7, %v275_v9  ;;  %383 = vst.msk [vmem:[%s848_s1 + $0x4] ss:$8 sm:$0xf] %vm3_vm7, %v382_v11   ;;  %s364_s10 = smov 3 }
  0x1c   :  { %v449_v13 = vld [vmem:[%s847_s0 - $0xb] ss:$16 sm:%s289_s2]   ;;  %384 = vst.msk [vmem:[%s848_s1 - $0x1b] ss:$8 sm:$0xf0] %vm3_vm7, %v382_v11   ;;  %s367_s15 = smov 12 }
  0x1d   :  { %v450_v14 = vld [vmem:[%s847_s0 - $0xb] ss:$16 sm:%s294_s21]   ;;  %v292_v16 = vsel %vm39_vm0, %v449_v13, %v448_v10  ;;  %v455_v20 = vld [vmem:[%s847_s0 - $0x17] ss:$16 sm:%s314_s29]   ;;  %vm53_vm8 = vcmask 1048320   ;;  %vm168_vm9 = vcmask 785920  }
  0x1e   :  { %v451_v17 = vld [vmem:[%s847_s0 - $0xb] ss:$16 sm:%s299_s24]   ;;  %s338_s24 = smov 6  ;;  %281 = vrot.lane.b32.xlu0 %v280_v12, %s476_s26  ;;  %v297_v19 = vsel %vm44_vm1, %v450_v14, %v292_v16  ;;  %v388_v21 = vld [vmem:[%s847_s0 + $0x80] ss:$4 sm:$0xf]  }
  0x1f   :  { %v454_v18 = vld [vmem:[%s847_s0 + $0x85] ss:$-16 sm:%s311_s25]   ;;  %s343_s25 = smov 24  ;;  %v302_v22 = vsel %vm49_vm2, %v451_v17, %v297_v19  ;;  %v456_v24 = vld [vmem:[%s847_s0 - $0x17] ss:$16 sm:%s319_s13]   ;;  %vm283_vm10 = vcmask 523520  }
  0x20   :  { %v317_v23 = vsel %vm39_vm0, %v455_v20, %v454_v18  ;;  %v457_v25 = vld [vmem:[%s847_s0 - $0x17] ss:$16 sm:%s324_s14]   ;;  %v464_v26 = vld [vmem:[%s847_s0 + $0x46] sm:$0x80]   ;;  %303 = vrot.lane.b32.xlu1 %v302_v22, %s476_s26 }
  0x21   :  { %389 = vst.msk [vmem:[%s848_s1 + $0x20] ss:$8 sm:$0xf] %vm3_vm7, %v388_v21   ;;  %v322_v27 = vsel %vm44_vm1, %v456_v24, %v317_v23  ;;  %v461_v28 = vld [vmem:[%s847_s0 + $0x59] ss:$16 sm:%s338_s24]  }
  0x22   :  { %v379_v29 = vld [vmem:[%s847_s0 + $0x20] ss:$4 sm:$0xff]   ;;  %v327_v30 = vsel %vm49_vm2, %v457_v25, %v322_v27  ;;  %v341_v31 = vsel %vm110_vm3, %v461_v28, %v460_v15  ;;  %v462_v32 = vld [vmem:[%s847_s0 - $0x23] ss:$16 sm:%s343_s25]  }
  0x23   :  { %v463_v33 = vld [vmem:[%s847_s0 - $0x23] ss:$16 sm:%s348_s28]   ;;  %380 = vst.msk [vmem:[%s848_s1 + $0x2] ss:$8 sm:$0xf] %vm3_vm7, %v379_v29   ;;  %328 = vrot.lane.b32.xlu0 %v327_v30, %s476_s26  ;;  %v346_v34 = vsel %vm115_vm4, %v462_v32, %v341_v31 }
  0x24   :  { %381 = vst.msk [vmem:[%s848_s1 - $0x1d] ss:$8 sm:$0xf0] %vm3_vm7, %v379_v29   ;;  %v467_v35 = vld [vmem:[%s847_s0 + $0x8d] ss:$-48 sm:%s364_s10]   ;;  %v351_v36 = vsel %vm120_vm5, %v463_v33, %v346_v34 }
  0x25   :  { %v468_v37 = vld [vmem:[%s847_s0 + $0x4d] ss:$16 sm:%s367_s15]   ;;  %v355_v38 = vsel %vm124_vm6, %v464_v26, %v351_v36 }
  0x26   :  { %v370_v39 = vsel %vm39_vm0, %v468_v37, %v467_v35  ;;  %356 = vrot.lane.b32.xlu1 %v355_v38, %s476_s26 }
  0x27   :  { %371 = vrot.lane.b32.xlu0 %v370_v39, %s476_s26 }
  0x78   :  { %v52_v40 = vpop.permute.xlu0 %51  }
  0x79   :  { %54 = vst.msk [vmem:[%s848_s1] sm:$0xff] %vm53_vm8, %v52_v40  }
  0x7a   :  { %v99_v41 = vpop.permute.xlu1 %98  }
  0x7b   :  { %404 = vst.msk [vmem:[%s848_s1 + $0x28] ss:$-25 sm:$0x3] %vm53_vm8, %v99_v41   ;;  %405 = vst.msk [vmem:[%s848_s1 + $0xe] sm:$0xfc] %vm53_vm8, %v99_v41  }
  0x7e   :  { %v74_v42 = vpop.permute.xlu0 %73  }
  0x7f   :  { %398 = vst.msk [vmem:[%s848_s1 + $0x20] ss:$-24 sm:$0x3] %vm53_vm8, %v74_v42   ;;  %399 = vst.msk [vmem:[%s848_s1 + $0x7] sm:$0xfc] %vm53_vm8, %v74_v42  }
  0x80   :  { %v127_v43 = vpop.permute.xlu1 %126  }
  0x81   :  { %411 = vst.msk [vmem:[%s848_s1 + $0x30] ss:$-26 sm:$0x3] %vm53_vm8, %v127_v43   ;;  %412 = vst.msk [vmem:[%s848_s1 + $0x15] sm:$0xfc] %vm53_vm8, %v127_v43  }
  0x82   :  { %v142_v44 = vpop.permute.xlu0 %141  }
  0x83   :  { %415 = vst.msk [vmem:[%s848_s1 + $0x38] ss:$-27 sm:$0x3] %vm53_vm8, %v142_v44   ;;  %416 = vst.msk [vmem:[%s848_s1 + $0x1c] sm:$0xc] %vm53_vm8, %v142_v44  }
  0x84   :  { %v167_v45 = vpop.permute.xlu1 %166  }
  0x85   :  { %169 = vst.msk [vmem:[%s848_s1] sm:$0xff] %vm168_vm9, %v167_v45  }
  0x86   :  { %v189_v46 = vpop.permute.xlu0 %188  }
  0x87   :  { %425 = vst.msk [vmem:[%s848_s1 + $0x20] ss:$-24 sm:$0x3] %vm168_vm9, %v189_v46   ;;  %426 = vst.msk [vmem:[%s848_s1 + $0x7] sm:$0xfc] %vm168_vm9, %v189_v46  }
  0x89   :  { %v214_v47 = vpop.permute.xlu1 %213  }
  0x8a   :  { %431 = vst.msk [vmem:[%s848_s1 + $0x28] ss:$-25 sm:$0x3] %vm168_vm9, %v214_v47   ;;  %432 = vst.msk [vmem:[%s848_s1 + $0xe] sm:$0xfc] %vm168_vm9, %v214_v47  }
  0x8c   :  { %v242_v48 = vpop.permute.xlu0 %241  }
  0x8d   :  { %438 = vst.msk [vmem:[%s848_s1 + $0x30] ss:$-26 sm:$0x3] %vm168_vm9, %v242_v48   ;;  %439 = vst.msk [vmem:[%s848_s1 + $0x15] sm:$0xfc] %vm168_vm9, %v242_v48   ;;  %v257_v49 = vpop.permute.xlu1 %256  }
  0x8e   :  { %442 = vst.msk [vmem:[%s848_s1 + $0x38] ss:$-27 sm:$0x3] %vm168_vm9, %v257_v49   ;;  %443 = vst.msk [vmem:[%s848_s1 + $0x1c] sm:$0xc] %vm168_vm9, %v257_v49  }
  0x90   :  { %v282_v50 = vpop.permute.xlu0 %281  }
  0x91   :  { %284 = vst.msk [vmem:[%s848_s1] sm:$0xff] %vm283_vm10, %v282_v50  }
  0x92   :  { %v304_v51 = vpop.permute.xlu1 %303  }
  0x93   :  { %452 = vst.msk [vmem:[%s848_s1 + $0x20] ss:$-24 sm:$0x3] %vm283_vm10, %v304_v51   ;;  %453 = vst.msk [vmem:[%s848_s1 + $0x7] sm:$0xfc] %vm283_vm10, %v304_v51  }
  0x95   :  { %v329_v52 = vpop.permute.xlu0 %328  }
  0x96   :  { %458 = vst.msk [vmem:[%s848_s1 + $0x28] ss:$-25 sm:$0x3] %vm283_vm10, %v329_v52   ;;  %459 = vst.msk [vmem:[%s848_s1 + $0xe] sm:$0xfc] %vm283_vm10, %v329_v52  }
  0x98   :  { %v357_v53 = vpop.permute.xlu1 %356  }
  0x99   :  { %465 = vst.msk [vmem:[%s848_s1 + $0x30] ss:$-26 sm:$0x3] %vm283_vm10, %v357_v53   ;;  %466 = vst.msk [vmem:[%s848_s1 + $0x15] sm:$0xfc] %vm283_vm10, %v357_v53   ;;  %v372_v54 = vpop.permute.xlu0 %371  }
  0x9a   :  { %469 = vst.msk [vmem:[%s848_s1 + $0x38] ss:$-27 sm:$0x3] %vm283_vm10, %v372_v54   ;;  %470 = vst.msk [vmem:[%s848_s1 + $0x1c] sm:$0xc] %vm283_vm10, %v372_v54  }

// kernel: convnext_forward.1
= control target key start
LH: loop header
LB: loop body
LE: loop exit
PB: predicated region body
PF: predicated region fallthrough
CT: control target
= control target key end

     0   :  { %v7094_v0 = vlaneseq  ;;  %v4150_v6 = vmov 0.0   ;;  %vm417_vm1 = vcmask 1040384   ;;  %s4151_s5 = smov 32   ;;  %s4152_s18 = smov 96   ;;  %vm595_vm2 = vcmask 1046528   ;;  %s7090_s0 = inlined_call_operand.vmem [shape: f32[2,16,512], index: 0, kind: input, shape index: {}]   ;;  %s7091_s1 = inlined_call_operand.vmem [shape: f32[16,512], index: 1, kind: input, shape index: {}]   ;;  %s7092_s2 = inlined_call_operand.vmem [shape: bf16[512,512], index: 2, kind: input, shape index: {}]   ;;  %s7093_s3 = inlined_call_operand.vmem [shape: f32[2,16,512], index: 3, kind: output, shape index: {}]  }
   0x1   :  { %v4178_v1 = vld [vmem:[%s7090_s0] sm:$0xff]  ;;  %v4203_v10 = vld [vmem:[%s7090_s0 + $0x10] sm:$0xff]  ;;  %v4233_v18 = vld [vmem:[%s7090_s0 + $0x8] sm:$0xff]  ;;  %s4153_s19 = smov 64   ;;  %vm1380_vm4 = vcmask 1045504  }
   0x2   :  { %v4183_v2 = vld [vmem:[%s7090_s0 + $0x20] sm:$0xff]  ;;  %vm388_vm0 = vcmp.lt.s32.totalorder %v7094_v0, 512  ;;  %v418_v3 = vrot.slane %v4178_v1, 7  ;;  %v4208_v11 = vld [vmem:[%s7090_s0 + $0x30] sm:$0xff]  ;;  %v4238_v19 = vld [vmem:[%s7090_s0 + $0x28] sm:$0xff]  ;;  %v420_v22 = vrot.slane %v4203_v10, 7 }
   0x3   :  { %v4190_v4 = vld [vmem:[%s7090_s0 + $0x40] sm:$0xff]  ;;  %390 = vst.msk [vmem:[#allocation2] ss:$8 sm:$0xf] %vm388_vm0, %v4150_v6  ;;  %v422_v7 = vrot.slane %v4183_v2, 7  ;;  %v4213_v12 = vld [vmem:[%s7090_s0 + $0x50] sm:$0xff]  ;;  %v30_v16 = vadd.f32 %v4183_v2, %v4178_v1  ;;  %v44_v20 = vadd.f32 %v4208_v11, %v4203_v10  ;;  %v37_v33 = vadd.f32 %v4238_v19, %v4233_v18 }
   0x4   :  { %v4195_v5 = vld [vmem:[%s7090_s0 + $0x60] sm:$0xff]  ;;  %393 = vst.msk [vmem:[#allocation2 + $0x60] ss:$8 sm:$0xf] %vm388_vm0, %v4150_v6  ;;  %v430_v8 = vrot.slane %v4190_v4, 7  ;;  %v4218_v13 = vld [vmem:[%s7090_s0 + $0x70] sm:$0xff] }
   0x5   :  { %396 = vst.msk [vmem:[#allocation2 + $0x41] ss:$8 sm:$0xf] %vm388_vm0, %v4150_v6  ;;  %399 = vst.msk [vmem:[#allocation2 + $0xa1] ss:$8 sm:$0xf] %vm388_vm0, %v4150_v6  ;;  %v4221_v14 = vsel %vm417_vm1, %v418_v3, %v422_v7  ;;  %v58_v17 = vadd.f32 %v4195_v5, %v4190_v4  ;;  %v72_v21 = vadd.f32 %v4218_v13, %v4213_v12 }
   0x6   :  { %v434_v9 = vrot.slane %v4195_v5, 7  ;;  %466 = vst [vmem:[#allocation2] sm:$0xfe] %v418_v3  ;;  %474 = vst [vmem:[#allocation2 + $0x40] sm:$0x1] %v422_v7  ;;  %655 = vrot.lane.b32.xlu1 %v4221_v14, %s4151_s5  ;;  %v426_v23 = vrot.slane %v4208_v11, 7 }
   0x7   :  { %478 = vst [vmem:[#allocation2 + $0x60] sm:$0xfe] %v430_v8  ;;  %470 = vst [vmem:[#allocation2 + $0x20] sm:$0xff] %v4221_v14  ;;  %v4253_v24 = vld [vmem:[%s7090_s0 + $0x48] sm:$0xff]  ;;  %v31_v26 = vrot.slane %v30_v16, 4  ;;  %v59_v27 = vrot.slane %v58_v17, 4 }
   0x8   :  { %486 = vst [vmem:[#allocation2 + $0xa0] sm:$0x1] %v434_v9  ;;  %v4224_v15 = vsel %vm417_vm1, %v430_v8, %v434_v9  ;;  %v4258_v25 = vld [vmem:[%s7090_s0 + $0x68] sm:$0xff]  ;;  %v432_v28 = vrot.slane %v4213_v12, 7  ;;  %v438_v29 = vrot.slane %v4218_v13, 7  ;;  %v45_v30 = vrot.slane %v44_v20, 4 }
   0x9   :  { %482 = vst [vmem:[#allocation2 + $0x80] sm:$0xff] %v4224_v15  ;;  %v73_v31 = vrot.slane %v72_v21, 4  ;;  %v4263_v32 = vsel %vm417_vm1, %v420_v22, %v426_v23  ;;  %468 = vst [vmem:[#allocation2 + $0x10] sm:$0xfe] %v420_v22  ;;  %v32_v34 = vadd.f32 %v31_v26, %v30_v16  ;;  %v60_v35 = vadd.f32 %v59_v27, %v58_v17  ;;  %v4288_v52 = vld [vmem:[%s7090_s0 + $0x18] sm:$0xff] }
   0xa   :  { %476 = vst [vmem:[#allocation2 + $0x50] sm:$0x1] %v426_v23  ;;  %v4268_v36 = vsel %vm417_vm1, %v432_v28, %v438_v29  ;;  %472 = vst [vmem:[#allocation2 + $0x30] sm:$0xff] %v4263_v32  ;;  %v65_v37 = vadd.f32 %v4258_v25, %v4253_v24  ;;  %659 = vrot.lane.b32.xlu1 %v4224_v15, %s4151_s5  ;;  %v46_v39 = vadd.f32 %v45_v30, %v44_v20  ;;  %v4293_v53 = vld [vmem:[%s7090_s0 + $0x38] sm:$0xff] }
   0xb   :  { %480 = vst [vmem:[#allocation2 + $0x70] sm:$0xfe] %v432_v28  ;;  %488 = vst [vmem:[#allocation2 + $0xb0] sm:$0x1] %v438_v29  ;;  %v74_v40 = vadd.f32 %v73_v31, %v72_v21  ;;  %v38_v41 = vrot.slane %v37_v33, 4  ;;  %v419_v42 = vrot.slane %v4233_v18, 7  ;;  %v51_v8 = vadd.f32 %v4293_v53, %v4288_v52 }
   0xc   :  { %484 = vst [vmem:[#allocation2 + $0x90] sm:$0xff] %v4268_v36  ;;  %v33_v43 = vrot.slane %v32_v34, 2  ;;  %v61_v44 = vrot.slane %v60_v35, 2  ;;  %v66_v45 = vrot.slane %v65_v37, 4  ;;  %v424_v46 = vrot.slane %v4238_v19, 7  ;;  %v4305_v6 = vld [vmem:[%s7090_s0 + $0x58] sm:$0xff] }
   0xd   :  { %v4273_v38 = vld [vmem:[#allocation2] sm:$0xff]  ;;  %v47_v48 = vrot.slane %v46_v39, 2  ;;  %v75_v49 = vrot.slane %v74_v40, 2  ;;  %v39_v50 = vadd.f32 %v38_v41, %v37_v33  ;;  %v431_v51 = vrot.slane %v4253_v24, 7  ;;  %467 = vst [vmem:[#allocation2 + $0x8] sm:$0xfe] %v419_v42 }
   0xe   :  { %653 = vrot.lane.b32.xlu0 %v4273_v38, %s4151_s5  ;;  %v4282_v47 = vld [vmem:[#allocation2 + $0x60] sm:$0xff]  ;;  %v34_v54 = vadd.f32 %v33_v43, %v32_v34  ;;  %v62_v55 = vadd.f32 %v61_v44, %v60_v35  ;;  %v67_v56 = vadd.f32 %v66_v45, %v65_v37  ;;  %v4296_v57 = vsel %vm417_vm1, %v419_v42, %v424_v46  ;;  %v4310_v7 = vld [vmem:[%s7090_s0 + $0x78] sm:$0xff] }
   0xf   :  { %475 = vst [vmem:[#allocation2 + $0x48] sm:$0x1] %v424_v46  ;;  %v48_v58 = vadd.f32 %v47_v48, %v46_v39  ;;  %v76_v59 = vadd.f32 %v75_v49, %v74_v40  ;;  %v40_v60 = vrot.slane %v39_v50, 2  ;;  %v436_v61 = vrot.slane %v4258_v25, 7  ;;  %471 = vst [vmem:[#allocation2 + $0x28] sm:$0xff] %v4296_v57 }
  0x10   :  { %479 = vst [vmem:[#allocation2 + $0x68] sm:$0xfe] %v431_v51  ;;  %v35_v62 = vrot.slane %v34_v54, 1  ;;  %v63_v63 = vrot.slane %v62_v55, 1  ;;  %v68_v3 = vrot.slane %v67_v56, 2  ;;  %v52_v26 = vrot.slane %v51_v8, 4 }
  0x11   :  { %v49_v9 = vrot.slane %v48_v58, 1  ;;  %v77_v16 = vrot.slane %v76_v59, 1  ;;  %v41_v17 = vadd.f32 %v40_v60, %v39_v50  ;;  %v4315_v20 = vsel %vm417_vm1, %v431_v51, %v436_v61  ;;  %487 = vst [vmem:[#allocation2 + $0xa8] sm:$0x1] %v436_v61 }
  0x12   :  { %657 = vrot.lane.b32.xlu0 %v4282_v47, %s4151_s5  ;;  %v36_v21 = vadd.f32 %v35_v62, %v34_v54  ;;  %v64_v22 = vadd.f32 %v63_v63, %v62_v55  ;;  %v69_v23 = vadd.f32 %v68_v3, %v67_v56  ;;  %483 = vst [vmem:[#allocation2 + $0x88] sm:$0xff] %v4315_v20  ;;  %v421_v35 = vrot.slane %v4288_v52, 7 }
  0x13   :  { %v50_v27 = vadd.f32 %v49_v9, %v48_v58  ;;  %v78_v28 = vadd.f32 %v77_v16, %v76_v59  ;;  %v42_v29 = vrot.slane %v41_v17, 1  ;;  %v79_v30 = vadd.f32 %v4310_v7, %v4305_v6 }
  0x14   :  { %v4320_v31 = vadd.f32 %v64_v22, %v36_v21  ;;  %v70_v33 = vrot.slane %v69_v23, 1  ;;  %v53_v34 = vadd.f32 %v52_v26, %v51_v8  ;;  %v428_v41 = vrot.slane %v4293_v53, 7  ;;  %469 = vst [vmem:[#allocation2 + $0x18] sm:$0xfe] %v421_v35 }
  0x15   :  { %v4323_v37 = vadd.f32 %v78_v28, %v50_v27  ;;  %v43_v39 = vadd.f32 %v42_v29, %v41_v17  ;;  %v80_v40 = vrot.slane %v79_v30, 4  ;;  %v433_v44 = vrot.slane %v4305_v6, 7 }
  0x16   :  { %166 = vrot.lane.b32.xlu0 %v4320_v31, %s4151_s5  ;;  %v71_v42 = vadd.f32 %v70_v33, %v69_v23  ;;  %v54_v43 = vrot.slane %v53_v34, 2  ;;  %v440_v45 = vrot.slane %v4310_v7, 7  ;;  %v4333_v48 = vsel %vm417_vm1, %v421_v35, %v428_v41  ;;  %477 = vst [vmem:[#allocation2 + $0x58] sm:$0x1] %v428_v41 }
  0x17   :  { %170 = vrot.lane.b32.xlu1 %v4323_v37, %s4151_s5  ;;  %v81_v46 = vadd.f32 %v80_v40, %v79_v30  ;;  %v90_v49 = vmul.f32 %v4178_v1, %v4178_v1  ;;  %v94_v50 = vmul.f32 %v4183_v2, %v4183_v2  ;;  %473 = vst [vmem:[#allocation2 + $0x38] sm:$0xff] %v4333_v48  ;;  %481 = vst [vmem:[#allocation2 + $0x78] sm:$0xfe] %v433_v44 }
  0x18   :  { %v4339_v51 = vadd.f32 %v71_v42, %v43_v39  ;;  %v55_v54 = vadd.f32 %v54_v43, %v53_v34  ;;  %v4342_v55 = vsel %vm417_vm1, %v433_v44, %v440_v45  ;;  %489 = vst [vmem:[#allocation2 + $0xb8] sm:$0x1] %v440_v45  ;;  %v98_v56 = vmul.f32 %v4190_v4, %v4190_v4 }
  0x19   :  { %v82_v58 = vrot.slane %v81_v46, 2  ;;  %485 = vst [vmem:[#allocation2 + $0x98] sm:$0xff] %v4342_v55  ;;  %v102_v1 = vmul.f32 %v4195_v5, %v4195_v5  ;;  %v106_v2 = vadd.f32 %v94_v50, %v90_v49  ;;  %v91_v59 = vmul.f32 %v4233_v18, %v4233_v18 }
  0x1a   :  { %168 = vrot.lane.b32.xlu0 %v4339_v51, %s4151_s5  ;;  %v56_v60 = vrot.slane %v55_v54, 1  ;;  %v95_v61 = vmul.f32 %v4238_v19, %v4238_v19  ;;  %v99_v4 = vmul.f32 %v4253_v24, %v4253_v24  ;;  %v103_v62 = vmul.f32 %v4258_v25, %v4258_v25 }
  0x1b   :  { %v83_v63 = vadd.f32 %v82_v58, %v81_v46  ;;  %v107_v3 = vrot.slane %v106_v2, 4  ;;  %v134_v5 = vadd.f32 %v102_v1, %v98_v56  ;;  %v92_v8 = vmul.f32 %v4203_v10, %v4203_v10 }
  0x1c   :  { %v57_v18 = vadd.f32 %v56_v60, %v55_v54  ;;  %v113_v9 = vadd.f32 %v95_v61, %v91_v59  ;;  %v141_v16 = vadd.f32 %v103_v62, %v99_v4  ;;  %v96_v17 = vmul.f32 %v4208_v11, %v4208_v11 }
  0x1d   :  { %v84_v21 = vrot.slane %v83_v63, 1  ;;  %v108_v19 = vadd.f32 %v107_v3, %v106_v2  ;;  %v135_v22 = vrot.slane %v134_v5, 4  ;;  %v100_v24 = vmul.f32 %v4213_v12, %v4213_v12 }
  0x1e   :  { %v114_v23 = vrot.slane %v113_v9, 4  ;;  %v142_v25 = vrot.slane %v141_v16, 4  ;;  %v104_v26 = vmul.f32 %v4218_v13, %v4218_v13  ;;  %v120_v27 = vadd.f32 %v96_v17, %v92_v8 }
  0x1f   :  { %v85_v28 = vadd.f32 %v84_v21, %v83_v63  ;;  %v109_v10 = vrot.slane %v108_v19, 2  ;;  %v136_v29 = vadd.f32 %v135_v22, %v134_v5  ;;  %v93_v30 = vmul.f32 %v4288_v52, %v4288_v52 }
  0x20   :  { %v115_v33 = vadd.f32 %v114_v23, %v113_v9  ;;  %v143_v11 = vadd.f32 %v142_v25, %v141_v16  ;;  %v121_v34 = vrot.slane %v120_v27, 4  ;;  %v148_v35 = vadd.f32 %v104_v26, %v100_v24 }
  0x21   :  { %v4370_v39 = vadd.f32 %v85_v28, %v57_v18  ;;  %v110_v40 = vadd.f32 %v109_v10, %v108_v19  ;;  %v137_v12 = vrot.slane %v136_v29, 2  ;;  %v97_v41 = vmul.f32 %v4293_v53, %v4293_v53 }
  0x22   :  { %v116_v42 = vrot.slane %v115_v33, 2  ;;  %v144_v13 = vrot.slane %v143_v11, 2  ;;  %v122_v43 = vadd.f32 %v121_v34, %v120_v27  ;;  %v149_v44 = vrot.slane %v148_v35, 4 }
  0x23   :  { %172 = vrot.lane.b32.xlu1 %v4370_v39, %s4151_s5  ;;  %v111_v45 = vrot.slane %v110_v40, 1  ;;  %v138_v52 = vadd.f32 %v137_v12, %v136_v29  ;;  %v101_v46 = vmul.f32 %v4305_v6, %v4305_v6  ;;  %v105_v49 = vmul.f32 %v4310_v7, %v4310_v7  ;;  %v610_v12 = vld [vmem:[#allocation2 + $0x70] sm:$0xff] }
  0x24   :  { %v117_v50 = vadd.f32 %v116_v42, %v115_v33  ;;  %v145_v54 = vadd.f32 %v144_v13, %v143_v11  ;;  %v123_v56 = vrot.slane %v122_v43, 2  ;;  %v150_v58 = vadd.f32 %v149_v44, %v148_v35  ;;  %v601_v11 = vld [vmem:[#allocation2 + $0x8] sm:$0xff]  ;;  %v611_v42 = vld [vmem:[#allocation2 + $0x78] sm:$0xff]  ;;  %v4435_v13 = vld [vmem:[#allocation2 + $0x60] sm:$0xfe] }
  0x25   :  { %v112_v53 = vadd.f32 %v111_v45, %v110_v40  ;;  %v139_v1 = vrot.slane %v138_v52, 1  ;;  %v127_v2 = vadd.f32 %v97_v41, %v93_v30  ;;  %v155_v59 = vadd.f32 %v105_v49, %v101_v46  ;;  %v609_v35 = vld [vmem:[#allocation2 + $0x68] sm:$0xff]  ;;  %v602_v40 = vld [vmem:[#allocation2 + $0x10] sm:$0xff]  ;;  %v603_v41 = vld [vmem:[#allocation2 + $0x18] sm:$0xff]  ;;  %7146 = vst [vmem:[#allocation3_spill] sm:$0xff] %v4435_v13 }
  0x26   :  { %v118_v60 = vrot.slane %v117_v50, 1  ;;  %v146_v61 = vrot.slane %v145_v54, 1  ;;  %v124_v4 = vadd.f32 %v123_v56, %v122_v43  ;;  %v151_v62 = vrot.slane %v150_v58, 2  ;;  %v860_v44 = vld [vmem:[#allocation2 + $0x40] sm:$0x1] }
  0x27   :  { %v140_v63 = vadd.f32 %v139_v1, %v138_v52  ;;  %v128_v3 = vrot.slane %v127_v2, 4  ;;  %v156_v5 = vrot.slane %v155_v59, 4  ;;  %v1038_v43 = vrot.slane %v4221_v14, 1  ;;  %v857_v49 = vld [vmem:[#allocation2 + $0x8] sm:$0xfe] }
  0x28   :  { %v119_v8 = vadd.f32 %v118_v60, %v117_v50  ;;  %v147_v6 = vadd.f32 %v146_v61, %v145_v54  ;;  %v125_v18 = vrot.slane %v124_v4, 1  ;;  %v152_v9 = vadd.f32 %v151_v62, %v150_v58  ;;  %v4446_v54 = vld [vmem:[#allocation2 + $0xa0] sm:$0x1]  ;;  %v4460_v60 = vld [vmem:[#allocation2 + $0x48] sm:$0x1] }
  0x29   :  { %v4380_v7 = vadd.f32 %v140_v63, %v112_v53  ;;  %v129_v16 = vadd.f32 %v128_v3, %v127_v2  ;;  %v157_v17 = vadd.f32 %v156_v5, %v155_v59  ;;  %v1057_v52 = vrot.slane %v4435_v13, 1  ;;  %7147 = vst [vmem:[#allocation4_spill] sm:$0xff] %v4446_v54  ;;  %v865_v2 = vld [vmem:[#allocation2 + $0x68] sm:$0xfe]  ;;  %7148 = vst [vmem:[#allocation5_spill] sm:$0xff] %v4460_v60 }
  0x2a   :  { %v4382_v21 = vadd.f32 %v147_v6, %v119_v8  ;;  %v126_v19 = vadd.f32 %v125_v18, %v124_v4  ;;  %v153_v22 = vrot.slane %v152_v9, 1  ;;  %v1049_v46 = vrot.slane %v860_v44, 1  ;;  %v858_v3 = vld [vmem:[#allocation2 + $0x10] sm:$0xfe]  ;;  %v869_v8 = vld [vmem:[#allocation2 + $0xa8] sm:$0x1] }
  0x2b   :  { %208 = vrot.lane.b32.xlu0 %v4380_v7, %s4151_s5  ;;  %v130_v24 = vrot.slane %v129_v16, 2  ;;  %v158_v23 = vrot.slane %v157_v17, 2  ;;  %v1058_v50 = vrot.slane %v4224_v15, 1  ;;  %v1040_v58 = vrot.slane %v857_v49, 1 }
  0x2c   :  { %210 = vrot.lane.b32.xlu1 %v4382_v21, %s4151_s5  ;;  %v154_v25 = vadd.f32 %v153_v22, %v152_v9  ;;  %v4456_v53 = vsel %vm595_vm2, %v1038_v43, %v1049_v46  ;;  %v1069_v1 = vrot.slane %v4446_v54, 1  ;;  %v1041_v59 = vrot.slane %v4296_v57, 1  ;;  %v862_v22 = vld [vmem:[#allocation2 + $0x50] sm:$0x1]  ;;  %v871_v46 = vld [vmem:[#allocation2 + $0xb8] sm:$0x1] }
  0x2d   :  { %v131_v26 = vadd.f32 %v130_v24, %v129_v16  ;;  %v159_v27 = vadd.f32 %v158_v23, %v157_v17  ;;  %v4453_v56 = vsel %vm595_vm2, %v1057_v52, %v1058_v50  ;;  %v1060_v4 = vrot.slane %v865_v2, 1  ;;  %v866_v17 = vld [vmem:[#allocation2 + $0x70] sm:$0xfe] }
  0x2e   :  { %v4388_v28 = vadd.f32 %v154_v25, %v126_v19  ;;  %v1042_v61 = vsel %vm595_vm2, %v1040_v58, %v1041_v59  ;;  %v1070_v62 = vsel %vm595_vm2, %v1058_v50, %v1069_v1  ;;  %v1051_v63 = vrot.slane %v4460_v60, 1 }
  0x2f   :  { %v132_v10 = vrot.slane %v131_v26, 1  ;;  %v160_v29 = vrot.slane %v159_v27, 1  ;;  %v1061_v5 = vrot.slane %v4315_v20, 1  ;;  %v1043_v18 = vrot.slane %v858_v3, 1 }
  0x30   :  { %212 = vrot.lane.b32.xlu0 %v4388_v28, %s4151_s5  ;;  %v1052_v9 = vsel %vm595_vm2, %v1041_v59, %v1051_v63  ;;  %v1071_v16 = vrot.slane %v869_v8, 1  ;;  %v1044_v19 = vrot.slane %v4263_v32, 1  ;;  %v1063_v23 = vrot.slane %v866_v17, 1 }
  0x31   :  { %v133_v30 = vadd.f32 %v132_v10, %v131_v26  ;;  %v161_v33 = vadd.f32 %v160_v29, %v159_v27  ;;  %v4473_v6 = vsel %vm595_vm2, %v1060_v4, %v1061_v5  ;;  %v1053_v26 = vrot.slane %v862_v22, 1  ;;  %v859_v27 = vld [vmem:[#allocation2 + $0x18] sm:$0xfe]  ;;  %v870_v29 = vld [vmem:[#allocation2 + $0xb0] sm:$0x1] }
  0x32   :  { %v4481_v24 = vsel %vm595_vm2, %v1043_v18, %v1044_v19  ;;  %v4484_v25 = vsel %vm595_vm2, %v1061_v5, %v1071_v16  ;;  %v1064_v10 = vrot.slane %v4268_v36, 1  ;;  %v1067_v52 = vrot.slane %v4342_v55, 1 }
  0x33   :  { %v4392_v34 = vadd.f32 %v161_v33, %v133_v30  ;;  %v1046_v33 = vrot.slane %v859_v27, 1  ;;  %v1075_v1 = vrot.slane %v871_v46, 1  ;;  %v4539_v3 = vand.u32 127, %v7094_v0  ;;  %v1307_v46 = vld [vmem:[#allocation2 + $0xa0] sm:$0x3] }
  0x34   :  { %661 = vrot.lane.b32.xlu0 %v601_v11, %s4151_s5  ;;  %v4492_v30 = vsel %vm595_vm2, %v1063_v23, %v1064_v10  ;;  %v1479_v60 = vrot.slane %v4333_v48, 2  ;;  %v1499_v54 = vrot.slane %v4342_v55, 2 }
  0x35   :  { %214 = vrot.lane.b32.xlu1 %v4392_v34, %s4151_s5  ;;  %v4532_v4 = vsel %vm595_vm2, %v1067_v52, %v1075_v1  ;;  %7149 = vst [vmem:[#allocation6_spill] sm:$0xff] %v4539_v3  ;;  %vm176_vm3 = vcmp.lt.s32.totalorder %v4539_v3, 32  ;;  %vm786_vm5 = vcmp.lt.s32.totalorder %v4539_v3, 96  ;;  %vm193_vm6 = vcmp.lt.s32.totalorder %v4539_v3, 64 }
  0x38   :  { %665 = vrot.lane.b32.xlu0 %v609_v35, %s4151_s5 }
  0x39   :  { %663 = vrot.lane.b32.xlu1 %v4296_v57, %s4151_s5 }
  0x3c   :  { %669 = vrot.lane.b32.xlu0 %v602_v40, %s4151_s5 }
  0x3d   :  { %667 = vrot.lane.b32.xlu1 %v4315_v20, %s4151_s5 }
  0x40   :  { %673 = vrot.lane.b32.xlu0 %v610_v12, %s4151_s5 }
  0x41   :  { %671 = vrot.lane.b32.xlu1 %v4263_v32, %s4151_s5 }
  0x44   :  { %677 = vrot.lane.b32.xlu0 %v603_v41, %s4151_s5 }
  0x45   :  { %675 = vrot.lane.b32.xlu1 %v4268_v36, %s4151_s5 }
  0x48   :  { %681 = vrot.lane.b32.xlu0 %v611_v42, %s4151_s5 }
  0x49   :  { %679 = vrot.lane.b32.xlu1 %v4333_v48, %s4151_s5 }
  0x4c   :  { %754 = vrot.lane.b32.xlu0 %v4273_v38, %s4152_s18  ;;  %v856_v38 = vld [vmem:[#allocation2] sm:$0xfe] }
  0x4d   :  { %683 = vrot.lane.b32.xlu1 %v4342_v55, %s4151_s5 }
  0x50   :  { %758 = vrot.lane.b32.xlu0 %v4282_v47, %s4152_s18  ;;  %v1037_v47 = vrot.slane %v856_v38, 1 }
  0x51   :  { %756 = vrot.lane.b32.xlu1 %v4221_v14, %s4152_s18 }
  0x52   :  { %v4442_v45 = vsel %vm595_vm2, %v1037_v47, %v1038_v43 }
  0x54   :  { %762 = vrot.lane.b32.xlu0 %v601_v11, %s4152_s18  ;;  %v4495_v11 = vsel %vm595_vm2, %v1044_v19, %v1053_v26 }
  0x55   :  { %760 = vrot.lane.b32.xlu1 %v4224_v15, %s4152_s18 }
  0x58   :  { %766 = vrot.lane.b32.xlu0 %v609_v35, %s4152_s18  ;;  %v1073_v35 = vrot.slane %v870_v29, 1 }
  0x59   :  { %764 = vrot.lane.b32.xlu1 %v4296_v57, %s4152_s18 }
  0x5a   :  { %v4508_v43 = vsel %vm595_vm2, %v1064_v10, %v1073_v35 }
  0x5c   :  { %770 = vrot.lane.b32.xlu0 %v602_v40, %s4152_s18  ;;  %v867_v40 = vld [vmem:[#allocation2 + $0x78] sm:$0xfe] }
  0x5d   :  { %768 = vrot.lane.b32.xlu1 %v4315_v20, %s4152_s18  ;;  %v1066_v38 = vrot.slane %v867_v40, 1 }
  0x5f   :  { %v4518_v50 = vsel %vm595_vm2, %v1066_v38, %v1067_v52 }
  0x60   :  { %774 = vrot.lane.b32.xlu0 %v610_v12, %s4152_s18  ;;  %v1047_v12 = vrot.slane %v4333_v48, 1 }
  0x61   :  { %772 = vrot.lane.b32.xlu1 %v4263_v32, %s4152_s18 }
  0x64   :  { %778 = vrot.lane.b32.xlu0 %v603_v41, %s4152_s18  ;;  %v863_v41 = vld [vmem:[#allocation2 + $0x58] sm:$0x1] }
  0x65   :  { %776 = vrot.lane.b32.xlu1 %v4268_v36, %s4152_s18  ;;  %v1055_v44 = vrot.slane %v863_v41, 1 }
  0x67   :  { %v4521_v58 = vsel %vm595_vm2, %v1047_v12, %v1055_v44 }
  0x68   :  { %782 = vrot.lane.b32.xlu0 %v611_v42, %s4152_s18  ;;  %v4503_v42 = vsel %vm595_vm2, %v1046_v33, %v1047_v12 }
  0x69   :  { %780 = vrot.lane.b32.xlu1 %v4333_v48, %s4152_s18 }
  0x6c   :  { %1093 = vrot.lane.b32.xlu0 %v4442_v45, %s4151_s5 }
  0x6d   :  { %784 = vrot.lane.b32.xlu1 %v4342_v55, %s4152_s18 }
  0x70   :  { %1097 = vrot.lane.b32.xlu0 %v4453_v56, %s4151_s5 }
  0x71   :  { %1095 = vrot.lane.b32.xlu1 %v4456_v53, %s4151_s5 }
  0x74   :  { %1101 = vrot.lane.b32.xlu0 %v1042_v61, %s4151_s5 }
  0x75   :  { %1099 = vrot.lane.b32.xlu1 %v1070_v62, %s4151_s5 }
  0x78   :  { %1105 = vrot.lane.b32.xlu0 %v4473_v6, %s4151_s5  ;;  %v4511_v49 = vpop.permute.xlu1 %655 }
  0x79   :  { %1103 = vrot.lane.b32.xlu1 %v1052_v9, %s4151_s5 }
  0x7c   :  { %1109 = vrot.lane.b32.xlu0 %v4481_v24, %s4151_s5  ;;  %v4529_v59 = vpop.permute.xlu1 %659 }
  0x7d   :  { %1107 = vrot.lane.b32.xlu1 %v4484_v25, %s4151_s5 }
  0x80   :  { %1113 = vrot.lane.b32.xlu0 %v4492_v30, %s4151_s5  ;;  %v4505_v47 = vpop.permute.xlu0 %653 }
  0x81   :  { %1111 = vrot.lane.b32.xlu1 %v4495_v11, %s4151_s5 }
  0x84   :  { %1117 = vrot.lane.b32.xlu0 %v4503_v42, %s4151_s5  ;;  %v4523_v2 = vpop.permute.xlu0 %657 }
  0x85   :  { %1115 = vrot.lane.b32.xlu1 %v4508_v43, %s4151_s5 }
  0x88   :  { %1121 = vrot.lane.b32.xlu0 %v4518_v50, %s4151_s5  ;;  %v167_v63 = vpop.permute.xlu0 %166 }
  0x89   :  { %1119 = vrot.lane.b32.xlu1 %v4521_v58, %s4151_s5  ;;  %v171_v5 = vpop.permute.xlu1 %170 }
  0x8c   :  { %1194 = vrot.lane.b32.xlu0 %v4442_v45, %s4152_s18  ;;  %v169_v8 = vpop.permute.xlu0 %168 }
  0x8d   :  { %1123 = vrot.lane.b32.xlu1 %v4532_v4, %s4151_s5  ;;  %v179_v18 = vsel %vm176_vm3, %v167_v63, %v169_v8 }
  0x90   :  { %1198 = vrot.lane.b32.xlu0 %v4453_v56, %s4152_s18  ;;  %v178_v56 = vsel %vm176_vm3, %v169_v8, %v171_v5  ;;  %v1300_v8 = vld [vmem:[#allocation2 + $0x48] sm:$0x3] }
  0x91   :  { %1196 = vrot.lane.b32.xlu1 %v4456_v53, %s4152_s18  ;;  %v4559_v53 = vadd.f32 %v179_v18, %v4339_v51 }
  0x94   :  { %1202 = vrot.lane.b32.xlu0 %v1042_v61, %s4152_s18  ;;  %v4564_v61 = vadd.f32 %v178_v56, %v4323_v37  ;;  %v1483_v56 = vrot.slane %v1300_v8, 2 }
  0x95   :  { %1200 = vrot.lane.b32.xlu1 %v1070_v62, %s4152_s18  ;;  %v173_v45 = vpop.permute.xlu1 %172 }
  0x96   :  { %v180_v16 = vsel %vm176_vm3, %v173_v45, %v167_v63  ;;  %v177_v62 = vsel %vm176_vm3, %v171_v5, %v173_v45  ;;  %v1303_v5 = vld [vmem:[#allocation2 + $0x60] sm:$0xfc] }
  0x97   :  { %v4553_v17 = vadd.f32 %v180_v16, %v4320_v31  ;;  %v4573_v51 = vadd.f32 %v177_v62, %v4370_v39  ;;  %v1489_v16 = vrot.slane %v1303_v5, 2  ;;  %v1296_v62 = vld [vmem:[#allocation2 + $0x8] sm:$0xfc]  ;;  %v1309_v5 = vld [vmem:[#allocation2 + $0xb0] sm:$0x3] }
  0x99   :  { %1204 = vrot.lane.b32.xlu1 %v1052_v9, %s4152_s18  ;;  %185 = vrot.lane.b32.xlu0 %v4553_v17, %s4153_s19 }
  0x9d   :  { %187 = vrot.lane.b32.xlu1 %v4559_v53, %s4153_s19  ;;  %v209_v31 = vpop.permute.xlu0 %208  ;;  %189 = vrot.lane.b32.xlu0 %v4564_v61, %s4153_s19 }
  0x9e   :  { %v211_v9 = vpop.permute.xlu1 %210 }
  0x9f   :  { %v218_v19 = vsel %vm176_vm3, %v209_v31, %v211_v9 }
  0xa0   :  { %v4580_v22 = vadd.f32 %v218_v19, %v4382_v21 }
  0xa1   :  { %191 = vrot.lane.b32.xlu1 %v4573_v51, %s4153_s19 }
  0xa2   :  { %v213_v37 = vpop.permute.xlu0 %212 }
  0xa3   :  { %v217_v21 = vsel %vm176_vm3, %v211_v9, %v213_v37 }
  0xa4   :  { %v4607_v40 = vadd.f32 %v217_v21, %v4388_v28  ;;  %v1301_v21 = vld [vmem:[#allocation2 + $0x50] sm:$0x3] }
  0xa5   :  { %226 = vrot.lane.b32.xlu1 %v4580_v22, %s4153_s19 }
  0xa6   :  { %v4584_v23 = vpop.permute.xlu0 %661 }
  0xa7   :  { %v215_v26 = vpop.permute.xlu1 %214 }
  0xa8   :  { %v216_v39 = vsel %vm176_vm3, %v213_v37, %v215_v26  ;;  %v219_v27 = vsel %vm176_vm3, %v215_v26, %v209_v31  ;;  %v1308_v31 = vld [vmem:[#allocation2 + $0xa8] sm:$0x3]  ;;  %v1472_v26 = vrot.slane %v1296_v62, 2 }
  0xa9   :  { %v4591_v10 = vadd.f32 %v219_v27, %v4380_v7  ;;  %v4594_v29 = vadd.f32 %v216_v39, %v4392_v34  ;;  %v1503_v39 = vrot.slane %v1308_v31, 2  ;;  %v1304_v27 = vld [vmem:[#allocation2 + $0x68] sm:$0xfc]  ;;  %v1505_v31 = vrot.slane %v1309_v5, 2  ;;  %v1310_v5 = vld [vmem:[#allocation2 + $0xb8] sm:$0x3] }
  0xaa   :  { %v4598_v33 = vpop.permute.xlu0 %665 }
  0xab   :  { %v4600_v35 = vpop.permute.xlu1 %663  ;;  %224 = vrot.lane.b32.xlu0 %v4591_v10, %s4153_s19  ;;  %230 = vrot.lane.b32.xlu1 %v4594_v29, %s4153_s19 }
  0xae   :  { %v4609_v7 = vpop.permute.xlu0 %669 }
  0xaf   :  { %v4611_v34 = vpop.permute.xlu1 %667  ;;  %228 = vrot.lane.b32.xlu0 %v4607_v40, %s4153_s19  ;;  %1208 = vrot.lane.b32.xlu1 %v4484_v25, %s4152_s18  ;;  %v1299_v25 = vld [vmem:[#allocation2 + $0x40] sm:$0x3] }
  0xb2   :  { %v4617_v12 = vpop.permute.xlu0 %673 }
  0xb3   :  { %v4619_v41 = vpop.permute.xlu1 %671  ;;  %1206 = vrot.lane.b32.xlu0 %v4473_v6, %s4152_s18  ;;  %1212 = vrot.lane.b32.xlu1 %v4495_v11, %s4152_s18  ;;  %v1481_v6 = vrot.slane %v1299_v25, 2  ;;  %v1295_v11 = vld [vmem:[#allocation2] sm:$0xfc] }
  0xb6   :  { %v4625_v28 = vpop.permute.xlu0 %677 }
  0xb7   :  { %v4627_v38 = vpop.permute.xlu1 %675  ;;  %1210 = vrot.lane.b32.xlu0 %v4481_v24, %s4152_s18  ;;  %1216 = vrot.lane.b32.xlu1 %v4508_v43, %s4152_s18  ;;  %v1470_v24 = vrot.slane %v4221_v14, 2  ;;  %v1469_v43 = vrot.slane %v1295_v11, 2  ;;  %v1490_v14 = vrot.slane %v4224_v15, 2  ;;  %v1473_v15 = vrot.slane %v4296_v57, 2 }
  0xb8   :  { %v1493_v57 = vrot.slane %v4315_v20, 2  ;;  %v1476_v20 = vrot.slane %v4263_v32, 2  ;;  %v1496_v32 = vrot.slane %v4268_v36, 2 }
  0xb9   :  { %v4681_v37 = vsel %vm1380_vm4, %v1473_v15, %v1483_v56  ;;  %v4693_v11 = vsel %vm1380_vm4, %v1472_v26, %v1473_v15  ;;  %v1305_v15 = vld [vmem:[#allocation2 + $0x70] sm:$0xfc]  ;;  %v1302_v26 = vld [vmem:[#allocation2 + $0x58] sm:$0x3] }
  0xba   :  { %v4633_v44 = vpop.permute.xlu0 %681 }
  0xbb   :  { %v4635_v52 = vpop.permute.xlu1 %679  ;;  %1214 = vrot.lane.b32.xlu0 %v4492_v30, %s4152_s18  ;;  %1220 = vrot.lane.b32.xlu1 %v4521_v58, %s4152_s18  ;;  %v4651_v30 = vsel %vm1380_vm4, %v1470_v24, %v1481_v6  ;;  %v1501_v58 = vrot.slane %v1307_v46, 2  ;;  %v4696_v46 = vsel %vm1380_vm4, %v1493_v57, %v1503_v39 }
  0xbe   :  { %v4641_v1 = vpop.permute.xlu0 %754 }
  0xbf   :  { %v4644_v63 = vpop.permute.xlu1 %683  ;;  %1218 = vrot.lane.b32.xlu0 %v4503_v42, %s4152_s18  ;;  %1224 = vrot.lane.b32.xlu1 %v4532_v4, %s4152_s18  ;;  %v4663_v42 = vsel %vm1380_vm4, %v1469_v43, %v1470_v24  ;;  %v4666_v4 = vsel %vm1380_vm4, %v1490_v14, %v1501_v58  ;;  %v1492_v24 = vrot.slane %v1304_v27, 2  ;;  %v1485_v43 = vrot.slane %v1301_v21, 2  ;;  %v1297_v58 = vld [vmem:[#allocation2 + $0x10] sm:$0xfc] }
  0xc0   :  { %v1475_v62 = vrot.slane %v1297_v58, 2  ;;  %v1298_v58 = vld [vmem:[#allocation2 + $0x18] sm:$0xfc] }
  0xc1   :  { %v1486_v56 = vsel %vm1380_vm4, %v1476_v20, %v1485_v43  ;;  %v1487_v43 = vrot.slane %v1302_v26, 2 }
  0xc2   :  { %v4653_v45 = vpop.permute.xlu0 %758  ;;  %v1477_v21 = vsel %vm1380_vm4, %v1475_v62, %v1476_v20  ;;  %v1478_v62 = vrot.slane %v1298_v58, 2 }
  0xc3   :  { %v4656_v18 = vpop.permute.xlu1 %756  ;;  %1222 = vrot.lane.b32.xlu0 %v4518_v50, %s4152_s18  ;;  %1527 = vrot.lane.b32.xlu1 %v4651_v30, %s4151_s5  ;;  %v4678_v50 = vsel %vm1380_vm4, %v1489_v16, %v1490_v14  ;;  %v1494_v16 = vsel %vm1380_vm4, %v1492_v24, %v1493_v57  ;;  %v1506_v57 = vsel %vm1380_vm4, %v1496_v32, %v1505_v31  ;;  %v1495_v24 = vrot.slane %v1305_v15, 2  ;;  %v1306_v15 = vld [vmem:[#allocation2 + $0x78] sm:$0xfc] }
  0xc4   :  { %v1488_v20 = vsel %vm1380_vm4, %v1479_v60, %v1487_v43  ;;  %v1507_v31 = vrot.slane %v1310_v5, 2  ;;  %v1480_v48 = vsel %vm1380_vm4, %v1478_v62, %v1479_v60 }
  0xc5   :  { %v1497_v36 = vsel %vm1380_vm4, %v1495_v24, %v1496_v32  ;;  %v1498_v32 = vrot.slane %v1306_v15, 2 }
  0xc6   :  { %v4668_v9 = vpop.permute.xlu0 %762 }
  0xc7   :  { %v4671_v19 = vpop.permute.xlu1 %760  ;;  %1525 = vrot.lane.b32.xlu0 %v4663_v42, %s4151_s5  ;;  %1531 = vrot.lane.b32.xlu1 %v4666_v4, %s4151_s5  ;;  %v1500_v55 = vsel %vm1380_vm4, %v1498_v32, %v1499_v54 }
  0xca   :  { %v4683_v25 = vpop.permute.xlu0 %766 }
  0xcb   :  { %v4686_v6 = vpop.permute.xlu1 %764  ;;  %1529 = vrot.lane.b32.xlu0 %v4678_v50, %s4151_s5  ;;  %1535 = vrot.lane.b32.xlu1 %v4681_v37, %s4151_s5 }
  0xce   :  { %v4698_v8 = vpop.permute.xlu0 %770 }
  0xcf   :  { %v4701_v14 = vpop.permute.xlu1 %768  ;;  %1533 = vrot.lane.b32.xlu0 %v4693_v11, %s4151_s5  ;;  %1539 = vrot.lane.b32.xlu1 %v4696_v46, %s4151_s5 }
  0xd2   :  { %v4709_v39 = vpop.permute.xlu0 %774 }
  0xd3   :  { %v4712_v27 = vpop.permute.xlu1 %772  ;;  %1537 = vrot.lane.b32.xlu0 %v1494_v16, %s4151_s5  ;;  %1543 = vrot.lane.b32.xlu1 %v1486_v56, %s4151_s5 }
  0xd6   :  { %v4718_v0 = vpop.permute.xlu0 %778 }
  0xd7   :  { %7150 = vst [vmem:[#allocation7_spill] sm:$0xff] %v4718_v0  ;;  %v4721_v13 = vpop.permute.xlu1 %776  ;;  %1541 = vrot.lane.b32.xlu0 %v1477_v21, %s4151_s5  ;;  %1547 = vrot.lane.b32.xlu1 %v1506_v57, %s4151_s5 }
  0xd8   :  { %7151 = vst [vmem:[#allocation8_spill] sm:$0xff] %v4721_v13  ;;  %v1508_v13 = vsel %vm1380_vm4, %v1499_v54, %v1507_v31 }
  0xda   :  { %v4727_v26 = vpop.permute.xlu0 %782 }
  0xdb   :  { %v4730_v0 = vpop.permute.xlu1 %780  ;;  %1545 = vrot.lane.b32.xlu0 %v1497_v36, %s4151_s5  ;;  %1551 = vrot.lane.b32.xlu1 %v1488_v20, %s4151_s5 }
  0xde   :  { %v4736_v24 = vpop.permute.xlu0 %1093 }
  0xdf   :  { %7152 = vst [vmem:[#allocation9_spill] sm:$0xff] %v4736_v24  ;;  %v4738_v43 = vpop.permute.xlu1 %784  ;;  %1549 = vrot.lane.b32.xlu0 %v1480_v48, %s4151_s5  ;;  %1555 = vrot.lane.b32.xlu1 %v1508_v13, %s4151_s5 }
  0xe2   :  { %v4743_v58 = vpop.permute.xlu0 %1097 }
  0xe3   :  { %7153 = vst [vmem:[#allocation10_spill] sm:$0xff] %v4743_v58  ;;  %v4745_v5 = vpop.permute.xlu1 %1095  ;;  %1553 = vrot.lane.b32.xlu0 %v1500_v55, %s4151_s5  ;;  %1628 = vrot.lane.b32.xlu1 %v4651_v30, %s4152_s18 }
  0xe4   :  { %7154 = vst [vmem:[#allocation11_spill] sm:$0xff] %v4745_v5 }
  0xe6   :  { %v4750_v60 = vpop.permute.xlu0 %1101 }
  0xe7   :  { %v4752_v62 = vpop.permute.xlu1 %1099  ;;  %1626 = vrot.lane.b32.xlu0 %v4663_v42, %s4152_s18  ;;  %1632 = vrot.lane.b32.xlu1 %v4666_v4, %s4152_s18 }
  0xe8   :  { %7155 = vst [vmem:[#allocation12_spill] sm:$0xff] %v4752_v62 }
  0xea   :  { %v4758_v54 = vpop.permute.xlu0 %1105 }
  0xeb   :  { %7156 = vst [vmem:[#allocation13_spill] sm:$0xff] %v4758_v54  ;;  %v4760_v31 = vpop.permute.xlu1 %1103  ;;  %1630 = vrot.lane.b32.xlu0 %v4678_v50, %s4152_s18  ;;  %1636 = vrot.lane.b32.xlu1 %v4681_v37, %s4152_s18 }
  0xec   :  { %7157 = vst [vmem:[#allocation14_spill] sm:$0xff] %v4760_v31 }
  0xee   :  { %v4766_v30 = vpop.permute.xlu0 %1109 }
  0xef   :  { %7158 = vst [vmem:[#allocation15_spill] sm:$0xff] %v4766_v30  ;;  %v4768_v15 = vpop.permute.xlu1 %1107  ;;  %1634 = vrot.lane.b32.xlu0 %v4693_v11, %s4152_s18  ;;  %1640 = vrot.lane.b32.xlu1 %v4696_v46, %s4152_s18 }
  0xf0   :  { %7159 = vst [vmem:[#allocation16_spill] sm:$0xff] %v4768_v15 }
  0xf2   :  { %v1114_v42 = vpop.permute.xlu0 %1113 }
  0xf3   :  { %v4774_v4 = vpop.permute.xlu1 %1111  ;;  %1638 = vrot.lane.b32.xlu0 %v1494_v16, %s4152_s18  ;;  %1644 = vrot.lane.b32.xlu1 %v1486_v56, %s4152_s18  ;;  %v4781_v50 = vsel %vm176_vm3, %v4758_v54, %v1114_v42 }
  0xf4   :  { %7160 = vst [vmem:[#allocation17_spill] sm:$0xff] %v4774_v4  ;;  %7161 = vst [vmem:[#allocation18_spill] sm:$0xff] %v4781_v50 }
  0xf6   :  { %v4783_v37 = vpop.permute.xlu0 %1117 }
  0xf7   :  { %7162 = vst [vmem:[#allocation19_spill] sm:$0xff] %v4783_v37  ;;  %v1116_v32 = vpop.permute.xlu1 %1115  ;;  %1642 = vrot.lane.b32.xlu0 %v1477_v21, %s4152_s18  ;;  %1648 = vrot.lane.b32.xlu1 %v1506_v57, %s4152_s18  ;;  %v4791_v11 = vsel %vm176_vm3, %v4766_v30, %v4783_v37 }
  0xf8   :  { %7163 = vst [vmem:[#allocation20_spill] sm:$0xff] %v4791_v11  ;;  %v4796_v46 = vsel %vm176_vm3, %v4768_v15, %v1116_v32 }
  0xf9   :  { %7164 = vst [vmem:[#allocation21_spill] sm:$0xff] %v4796_v46 }
  0xfa   :  { %v4798_v16 = vpop.permute.xlu0 %1121 }
  0xfb   :  { %7165 = vst [vmem:[#allocation22_spill] sm:$0xff] %v4798_v16  ;;  %v4800_v56 = vpop.permute.xlu1 %1119  ;;  %1646 = vrot.lane.b32.xlu0 %v1497_v36, %s4152_s18  ;;  %1652 = vrot.lane.b32.xlu1 %v1488_v20, %s4152_s18  ;;  %v4807_v21 = vsel %vm176_vm3, %v1114_v42, %v4798_v16 }
  0xfc   :  { %7166 = vst [vmem:[#allocation23_spill] sm:$0xff] %v4800_v56  ;;  %7167 = vst [vmem:[#allocation24_spill] sm:$0xff] %v4807_v21  ;;  %v4813_v57 = vsel %vm176_vm3, %v4774_v4, %v4800_v56 }
  0xfd   :  { %7168 = vst [vmem:[#allocation25_spill] sm:$0xff] %v4813_v57 }
  0xfe   :  { %v4815_v50 = vpop.permute.xlu0 %1194 }
  0xff   :  { %v4817_v46 = vpop.permute.xlu1 %1123  ;;  %1650 = vrot.lane.b32.xlu0 %v1480_v48, %s4152_s18  ;;  %1656 = vrot.lane.b32.xlu1 %v1508_v13, %s4152_s18 }
 0x100   :  { %7169 = vst [vmem:[#allocation26_spill] sm:$0xff] %v4817_v46  ;;  %v4824_v36 = vsel %vm176_vm3, %v1116_v32, %v4817_v46 }
 0x101   :  { %7170 = vst [vmem:[#allocation27_spill] sm:$0xff] %v4824_v36 }
 0x102   :  { %v4826_v20 = vpop.permute.xlu0 %1198 }
 0x103   :  { %v4828_v42 = vpop.permute.xlu1 %1196  ;;  %1654 = vrot.lane.b32.xlu0 %v1500_v55, %s4152_s18 }
 0x106   :  { %v1203_v21 = vpop.permute.xlu0 %1202 }
 0x107   :  { %v4832_v11 = vpop.permute.xlu1 %1200  ;;  %v4837_v13 = vsel %vm786_vm5, %v4815_v50, %v1203_v21 }
 0x108   :  { %7171 = vst [vmem:[#allocation28_spill] sm:$0xff] %v4837_v13 }
 0x10b   :  { %v1205_v48 = vpop.permute.xlu1 %1204  ;;  %v186_v36 = vpop.permute.xlu0 %185 }
 0x10c   :  { %v4842_v32 = vsel %vm786_vm5, %v4828_v42, %v1205_v48 }
 0x10d   :  { %7172 = vst [vmem:[#allocation29_spill] sm:$0xff] %v4842_v32 }
 0x10f   :  { %v188_v57 = vpop.permute.xlu1 %187  ;;  %v190_v55 = vpop.permute.xlu0 %189 }
 0x110   :  { %v195_v13 = vsel %vm193_vm6, %v188_v57, %v190_v55  ;;  %v196_v4 = vsel %vm193_vm6, %v186_v36, %v188_v57 }
 0x111   :  { %v200_v15 = vadd.f32 %v195_v13, %v4564_v61  ;;  %v199_v30 = vadd.f32 %v196_v4, %v4559_v53 }
 0x113   :  { %v192_v46 = vpop.permute.xlu1 %191  ;;  %v204_v24 = vadd.f32 %v200_v15, %v199_v30 }
 0x114   :  { %v197_v56 = vsel %vm193_vm6, %v192_v46, %v186_v36  ;;  %v194_v16 = vsel %vm193_vm6, %v190_v55, %v192_v46 }
 0x115   :  { %v198_v32 = vadd.f32 %v197_v56, %v4553_v17  ;;  %v201_v62 = vadd.f32 %v194_v16, %v4573_v51 }
 0x117   :  { %v227_v37 = vpop.permute.xlu1 %226  ;;  %v202_v58 = vadd.f32 %v201_v62, %v198_v32  ;;  %v203_v54 = vadd.f32 %v199_v30, %v198_v32  ;;  %v205_v5 = vadd.f32 %v201_v62, %v200_v15 }
 0x119   :  { %v206_v56 = vadd.f32 %v204_v24, %v202_v58  ;;  %v207_v51 = vadd.f32 %v205_v5, %v203_v54 }
 0x11b   :  { %v4874_v58 = vmul.f32 0.001953125, %v206_v56 }
 0x11d   :  { %v225_v31 = vpop.permute.xlu0 %224  ;;  %v231_v46 = vpop.permute.xlu1 %230  ;;  %7173 = vst [vmem:[#allocation30_spill] sm:$0xff] %v4874_v58 }
 0x11e   :  { %v234_v55 = vsel %vm193_vm6, %v225_v31, %v227_v37  ;;  %v235_v57 = vsel %vm193_vm6, %v231_v46, %v225_v31 }
 0x11f   :  { %v236_v17 = vadd.f32 %v235_v57, %v4591_v10  ;;  %v237_v61 = vadd.f32 %v234_v55, %v4580_v22  ;;  %v4876_v22 = vmul.f32 0.001953125, %v207_v51 }
 0x121   :  { %v229_v16 = vpop.permute.xlu0 %228  ;;  %v1209_v53 = vpop.permute.xlu1 %1208  ;;  %v241_v31 = vadd.f32 %v237_v61, %v236_v17  ;;  %7174 = vst [vmem:[#allocation31_spill] sm:$0xff] %v4876_v22  ;;  %v251_v55 = vmul.f32 %v4876_v22, %v4876_v22 }
 0x122   :  { %v232_v62 = vsel %vm193_vm6, %v229_v16, %v231_v46  ;;  %v233_v30 = vsel %vm193_vm6, %v227_v37, %v229_v16  ;;  %v4870_v15 = vsel %vm786_vm5, %v4832_v11, %v1209_v53  ;;  %v250_v46 = vmul.f32 %v4874_v58, %v4874_v58 }
 0x123   :  { %v238_v10 = vadd.f32 %v233_v30, %v4607_v40  ;;  %v239_v24 = vadd.f32 %v232_v62, %v4594_v29  ;;  %v4154_v16 = vmov 1966171168  }
 0x124   :  { %v269_v62 = vunpack.c.l.s4 %v4154_v16 }
 0x125   :  { %v240_v5 = vadd.f32 %v239_v24, %v236_v17  ;;  %v242_v54 = vadd.f32 %v238_v10, %v237_v61  ;;  %v243_v4 = vadd.f32 %v239_v24, %v238_v10  ;;  %v1207_v36 = vpop.permute.xlu0 %1206  ;;  %v1213_v13 = vpop.permute.xlu1 %1212 }
 0x126   :  { %v4881_v37 = vsel %vm786_vm5, %v4826_v20, %v1207_v36  ;;  %v4885_v32 = vsel %vm786_vm5, %v1205_v48, %v1213_v13 }
 0x127   :  { %v244_v40 = vadd.f32 %v242_v54, %v240_v5  ;;  %v245_v29 = vadd.f32 %v243_v4, %v241_v31 }
 0x129   :  { %v248_v57 = vmul.f32 0.001953125, %v244_v40  ;;  %v249_v17 = vmul.f32 0.001953125, %v245_v29  ;;  %v1211_v56 = vpop.permute.xlu0 %1210  ;;  %v1217_v51 = vpop.permute.xlu1 %1216  ;;  %v270_v40 = vunpack.c.0.s8 %v269_v62  ;;  %v7178_v29 = vlaneseq }
 0x12a   :  { %v4893_v61 = vsel %vm786_vm5, %v1203_v21, %v1211_v56  ;;  %v4897_v48 = vsel %vm786_vm5, %v1209_v53, %v1217_v51 }
 0x12b   :  { %v252_v30 = vsub.f32 %v248_v57, %v250_v46  ;;  %v253_v31 = vsub.f32 %v249_v17, %v251_v55  ;;  %v272_v46 = vshrl.u32 %v7178_v29, 7 }
 0x12d   :  { %v260_v10 = vadd.f32 1e-05, %v252_v30  ;;  %v261_v24 = vadd.f32 1e-05, %v253_v31  ;;  %v1215_v5 = vpop.permute.xlu0 %1214  ;;  %v1221_v54 = vpop.permute.xlu1 %1220  ;;  %v4931_v16 = vsub.s32 %v270_v40, %v272_v46  ;;  %v267_v62 = vcombine.low %v252_v30, %v253_v31 }
 0x12e   :  { %v4901_v4 = vsel %vm786_vm5, %v1207_v36, %v1215_v5  ;;  %v4905_v21 = vsel %vm786_vm5, %v1213_v13, %v1221_v54  ;;  %v4910_v53 = vsel %vm786_vm5, %v1221_v54, %v4828_v42 }
 0x12f   :  { %7175 = vst [vmem:[#allocation32_spill] sm:$0xff] %v4901_v4  ;;  %7176 = vst [vmem:[#allocation33_spill] sm:$0xff] %v4905_v21  ;;  %4011 = vrsqrt.f32 %v260_v10  ;;  %v4985_v21 = vld [vmem:[%s7091_s1] ss:$8 sm:$0xf] }
 0x130   :  { %7177 = vst [vmem:[#allocation34_spill] sm:$0xff] %v4910_v53  ;;  %4013 = vrsqrt.f32 %v261_v24  ;;  %7183 = vst [vmem:[#allocation39_spill] sm:$0xff] %v4931_v16 }
 0x131   :  { %v1219_v55 = vpop.permute.xlu0 %1218  ;;  %v1225_v57 = vpop.permute.xlu1 %1224 }
 0x132   :  { %v4915_v36 = vsel %vm786_vm5, %v1211_v56, %v1219_v55  ;;  %v4920_v13 = vsel %vm786_vm5, %v1219_v55, %v4815_v50  ;;  %v4924_v42 = vsel %vm786_vm5, %v1217_v51, %v1225_v57  ;;  %v4929_v17 = vsel %vm786_vm5, %v1225_v57, %v4832_v11 }
 0x133   :  { %7179 = vst [vmem:[#allocation35_spill] sm:$0xff] %v4915_v36  ;;  %7180 = vst [vmem:[#allocation36_spill] sm:$0xff] %v4920_v13  ;;  %v274_v51 = vrot.slane %v267_v62, %v4931_v16  ;;  %v4971_v13 = vsub.s32 3, %v272_v46 }
 0x134   :  { %7181 = vst [vmem:[#allocation37_spill] sm:$0xff] %v4924_v42  ;;  %7182 = vst [vmem:[#allocation38_spill] sm:$0xff] %v4929_v17 }
 0x135   :  { %v1223_v10 = vpop.permute.xlu0 %1222  ;;  %v4933_v56 = vpop.permute.xlu1 %1527  ;;  %v275_v29 = vcombine.low %v274_v51, %v274_v51  ;;  %v4961_v51 = vsub.s32 0, %v272_v46  ;;  %7189 = vst [vmem:[#allocation45_spill] sm:$0xff] %v4971_v13 }
 0x136   :  { %v4937_v24 = vsel %vm786_vm5, %v1215_v5, %v1223_v10  ;;  %v4942_v50 = vsel %vm786_vm5, %v1223_v10, %v4826_v20  ;;  %v3655_v5 = vld [vmem:[%s7091_s1 + $0x21] ss:$8 sm:$0xf] }
 0x137   :  { %7184 = vst [vmem:[#allocation40_spill] sm:$0xff] %v4937_v24  ;;  %7185 = vst [vmem:[#allocation41_spill] sm:$0xff] %v4942_v50  ;;  %v264_v10 = vmul.f32 %v3655_v5, %v3655_v5  ;;  %v282_v62 = vrot.slane %v275_v29, %v4931_v16  ;;  %v3656_v50 = vld [vmem:[%s7091_s1 + $0x22] ss:$8 sm:$0xf] }
 0x138   :  { %7187 = vst [vmem:[#allocation43_spill] sm:$0xff] %v4961_v51  ;;  %v4979_v36 = vmul.f32 %v3656_v50, %v3655_v5  ;;  %v5008_v50 = vsel %vm176_vm3, %v4529_v59, %v4611_v34  ;;  %v5019_v5 = vld [vmem:[%s7091_s1 + $0x3] ss:$8 sm:$0xf] }
 0x139   :  { %v4012_v54 = vpop.eup %4011  ;;  %v4945_v11 = vpop.permute.xlu0 %1525 }
 0x13a   :  { %v4947_v40 = vpop.permute.xlu1 %1531  ;;  %v4014_v30 = vpop.eup %4013  ;;  %v285_v31 = vmul.f32 %v4012_v54, %v4012_v54 }
 0x13b   :  { %v286_v55 = vmul.f32 %v4014_v30, %v4014_v30  ;;  %v310_v29 = vcombine.low %v4012_v54, %v4014_v30  ;;  %v4996_v54 = vsel %vm176_vm3, %v4511_v49, %v4600_v35  ;;  %v5014_v30 = vsel %vm176_vm3, %v4584_v23, %v4609_v7 }
 0x13c   :  { %7191 = vst [vmem:[#allocation47_spill] sm:$0xff] %v5014_v30 }
 0x13d   :  { %v289_v57 = vcombine.low %v285_v31, %v286_v55  ;;  %v4952_v22 = vpop.permute.xlu0 %1529  ;;  %v4967_v31 = vsub.s32 1, %v272_v46  ;;  %v4969_v55 = vsub.s32 2, %v272_v46  ;;  %v4990_v46 = vld [vmem:[%s7091_s1 + $0x1] ss:$8 sm:$0xf] }
 0x13e   :  { %7186 = vst [vmem:[#allocation42_spill] sm:$0xff] %v4952_v22  ;;  %v4954_v20 = vpop.permute.xlu1 %1535  ;;  %v516_v4 = vadd.f32 %v4990_v46, %v4985_v21 }
 0x13f   :  { %v296_v58 = vrot.slane %v289_v57, %v4931_v16  ;;  %7188 = vst [vmem:[#allocation44_spill] sm:$0xff] %v4969_v55  ;;  %v4977_v57 = vsel %vm176_vm3, %v4505_v47, %v4584_v23 }
 0x141   :  { %v297_v24 = vcombine.low %v296_v58, %v296_v58  ;;  %v4963_v17 = vpop.permute.xlu0 %1533  ;;  %v284_v58 = vmul.f32 %v282_v62, %v264_v10  ;;  %v5024_v10 = vld [vmem:[%s7091_s1 + $0x4] ss:$8 sm:$0xf]  ;;  %v5030_v62 = vsel %vm176_vm3, %v4598_v33, %v4617_v12 }
 0x142   :  { %v4965_v42 = vpop.permute.xlu1 %1539  ;;  %7192 = vst [vmem:[#allocation48_spill] sm:$0xff] %v5030_v62  ;;  %v518_v23 = vadd.f32 %v5024_v10, %v5019_v5  ;;  %v5062_v62 = vld [vmem:[%s7091_s1 + $0x2] ss:$8 sm:$0xf] }
 0x143   :  { %v304_v53 = vrot.slane %v297_v24, %v4931_v16  ;;  %v5002_v24 = vsel %vm176_vm3, %v4523_v2, %v4598_v33  ;;  %v5050_v33 = vsel %vm176_vm3, %v4609_v7, %v4625_v28  ;;  %v5074_v7 = vsel %vm176_vm3, %v4617_v12, %v4633_v44 }
 0x144   :  { %7190 = vst [vmem:[#allocation46_spill] sm:$0xff] %v5002_v24  ;;  %v5044_v24 = vsel %vm176_vm3, %v4600_v35, %v4619_v41  ;;  %7193 = vst [vmem:[#allocation49_spill] sm:$0xff] %v5050_v33  ;;  %v5068_v35 = vsel %vm176_vm3, %v4611_v34, %v4627_v38  ;;  %v5091_v34 = vsel %vm176_vm3, %v4619_v41, %v4635_v52  ;;  %v5114_v41 = vld [vmem:[%s7091_s1 + $0x6] ss:$8 sm:$0xf] }
 0x145   :  { %v306_v13 = vmul.f32 %v304_v53, %v284_v58  ;;  %v5034_v30 = vpop.permute.xlu0 %1537  ;;  %v5056_v53 = vsel %vm176_vm3, %v4625_v28, %v4505_v47  ;;  %v317_v58 = vrot.slane %v310_v29, %v4931_v16  ;;  %7195 = vst [vmem:[#allocation51_spill] sm:$0xff] %v5068_v35  ;;  %7196 = vst [vmem:[#allocation52_spill] sm:$0xff] %v5074_v7  ;;  %v5085_v29 = vld [vmem:[%s7091_s1 + $0x5] ss:$8 sm:$0xf] }
 0x146   :  { %v5036_v55 = vpop.permute.xlu1 %1543  ;;  %7194 = vst [vmem:[#allocation50_spill] sm:$0xff] %v5056_v53  ;;  %v5080_v47 = vsel %vm176_vm3, %v4633_v44, %v4523_v2  ;;  %v5097_v12 = vsel %vm176_vm3, %v4635_v52, %v4511_v49  ;;  %v5103_v2 = vsel %vm176_vm3, %v4627_v38, %v4644_v63  ;;  %v5109_v44 = vsel %vm176_vm3, %v4644_v63, %v4529_v59  ;;  %v5119_v49 = vld [vmem:[%s7091_s1 + $0x7] ss:$8 sm:$0xf] }
 0x147   :  { %v328_v28 = vadd.f32 1e-05, %v306_v13  ;;  %7197 = vst [vmem:[#allocation53_spill] sm:$0xff] %v5097_v12  ;;  %7198 = vst [vmem:[#allocation54_spill] sm:$0xff] %v5103_v2  ;;  %v519_v38 = vadd.f32 %v5085_v29, %v518_v23  ;;  %v520_v52 = vadd.f32 %v5119_v49, %v5114_v41  ;;  %v517_v59 = vadd.f32 %v5062_v62, %v516_v4  ;;  %v7201_v7 = vld [vmem:[#allocation8_spill] sm:$0xff]  ;;  %v7223_v33 = vld [vmem:[#allocation17_spill] sm:$0xff] }
 0x148   :  { %v5129_v63 = vsel %vm786_vm5, %v4641_v1, %v4668_v9  ;;  %v5141_v23 = vsel %vm786_vm5, %v4653_v45, %v4683_v25  ;;  %v318_v12 = vcombine.low %v317_v58, %v317_v58  ;;  %v5147_v4 = vsel %vm786_vm5, %v4671_v19, %v4701_v14 }
 0x149   :  { %4015 = vrsqrt.f32 %v328_v28  ;;  %v1542_v13 = vpop.permute.xlu0 %1541  ;;  %7199 = vst [vmem:[#allocation55_spill] sm:$0xff] %v5129_v63  ;;  %v5135_v28 = vsel %vm786_vm5, %v4656_v18, %v4686_v6  ;;  %v5153_v63 = vsel %vm786_vm5, %v4668_v9, %v4698_v8  ;;  %v5165_v58 = vsel %vm786_vm5, %v4683_v25, %v4709_v39  ;;  %v7202_v9 = vld [vmem:[#allocation7_spill] sm:$0xff] }
 0x14a   :  { %v1548_v53 = vpop.permute.xlu1 %1547  ;;  %7200 = vst [vmem:[#allocation56_spill] sm:$0xff] %v5135_v28  ;;  %v5159_v28 = vsel %vm786_vm5, %v4686_v6, %v4712_v27  ;;  %v5171_v2 = vsel %vm786_vm5, %v4701_v14, %v7201_v7  ;;  %v5177_v35 = vsel %vm786_vm5, %v4698_v8, %v7202_v9  ;;  %v5183_v6 = vsel %vm786_vm5, %v7202_v9, %v4641_v1  ;;  %v5194_v14 = vld [vmem:[%s7091_s1 + $0x20] ss:$8 sm:$0xf] }
 0x14b   :  { %7203 = vst [vmem:[#allocation8_spill] sm:$0xff] %v5177_v35  ;;  %7204 = vst [vmem:[#allocation7_spill] sm:$0xff] %v5183_v6  ;;  %v5189_v25 = vsel %vm786_vm5, %v4709_v39, %v4727_v26  ;;  %v5200_v8 = vsel %vm786_vm5, %v4712_v27, %v4730_v0  ;;  %v5206_v1 = vsel %vm786_vm5, %v4727_v26, %v4653_v45 }
 0x14c   :  { %7205 = vst [vmem:[#allocation57_spill] sm:$0xff] %v5189_v25  ;;  %7206 = vst [vmem:[#allocation58_spill] sm:$0xff] %v5194_v14  ;;  %v521_v25 = vadd.f32 %v5194_v14, %v520_v52  ;;  %v5211_v6 = vadd.f32 %v519_v38, %v517_v59  ;;  %v5217_v35 = vsel %vm786_vm5, %v4730_v0, %v4656_v18  ;;  %v7214_v52 = vld [vmem:[#allocation9_spill] sm:$0xff]  ;;  %v7215_v18 = vld [vmem:[#allocation14_spill] sm:$0xff] }
 0x14d   :  { %7207 = vst [vmem:[#allocation59_spill] sm:$0xff] %v5200_v8  ;;  %7208 = vst [vmem:[#allocation60_spill] sm:$0xff] %v5206_v1  ;;  %v5208_v9 = vpop.permute.xlu0 %1545  ;;  %v5223_v27 = vsel %vm786_vm5, %v7201_v7, %v4738_v43  ;;  %v5229_v45 = vsel %vm786_vm5, %v4738_v43, %v4671_v19  ;;  %v325_v26 = vrot.slane %v318_v12, %v4931_v16  ;;  %v7216_v59 = vld [vmem:[#allocation11_spill] sm:$0xff]  ;;  %v7217_v14 = vld [vmem:[#allocation13_spill] sm:$0xff] }
 0x14e   :  { %7209 = vst [vmem:[#allocation61_spill] sm:$0xff] %v5208_v9  ;;  %v1552_v39 = vpop.permute.xlu1 %1551  ;;  %7210 = vst [vmem:[#allocation62_spill] sm:$0xff] %v5211_v6  ;;  %v5236_v0 = vsel %vm176_vm3, %v7214_v52, %v4750_v60  ;;  %v5242_v7 = vsel %vm176_vm3, %v7216_v59, %v7215_v18  ;;  %v7218_v1 = vld [vmem:[#allocation10_spill] sm:$0xff]  ;;  %v7219_v43 = vld [vmem:[#allocation15_spill] sm:$0xff] }
 0x14f   :  { %7211 = vst [vmem:[#allocation63_spill] sm:$0xff] %v5217_v35  ;;  %7212 = vst [vmem:[#allocation64_spill] sm:$0xff] %v5223_v27  ;;  %v5248_v19 = vsel %vm176_vm3, %v7218_v1, %v7217_v14  ;;  %v5254_v12 = vsel %vm176_vm3, %v4750_v60, %v7219_v43  ;;  %v7221_v16 = vld [vmem:[#allocation16_spill] sm:$0xff]  ;;  %v5266_v35 = vsel %vm176_vm3, %v7215_v18, %v7223_v33  ;;  %v7224_v14 = vld [vmem:[#allocation19_spill] sm:$0xff] }
 0x150   :  { %7213 = vst [vmem:[#allocation65_spill] sm:$0xff] %v5229_v45  ;;  %7220 = vst [vmem:[#allocation9_spill] sm:$0xff] %v5254_v12  ;;  %v7222_v45 = vld [vmem:[#allocation12_spill] sm:$0xff]  ;;  %v5272_v8 = vsel %vm176_vm3, %v7224_v14, %v7214_v52  ;;  %v7226_v60 = vld [vmem:[#allocation22_spill] sm:$0xff]  ;;  %v5292_v52 = vsel %vm176_vm3, %v4933_v56, %v4954_v20  ;;  %v5295_v14 = vadd.f32 %v5211_v6, %v521_v25 }
 0x151   :  { %v5260_v27 = vsel %vm176_vm3, %v7222_v45, %v7221_v16  ;;  %7225 = vst [vmem:[#allocation14_spill] sm:$0xff] %v5272_v8  ;;  %v1139_v43 = vsel %vm176_vm3, %v7226_v60, %v7218_v1  ;;  %v7227_v16 = vld [vmem:[#allocation23_spill] sm:$0xff]  ;;  %v7229_v33 = vld [vmem:[#allocation26_spill] sm:$0xff]  ;;  %v327_v1 = vmul.f32 %v325_v26, %v4979_v36  ;;  %v1550_v60 = vpop.permute.xlu0 %1549  ;;  %v5316_v36 = vsel %vm176_vm3, %v4952_v22, %v5034_v30 }
 0x152   :  { %v5282_v12 = vsel %vm176_vm3, %v7227_v16, %v7216_v59  ;;  %v1140_v18 = vsel %vm176_vm3, %v7229_v33, %v7222_v45  ;;  %7230 = vst [vmem:[#allocation13_spill] sm:$0xff] %v5295_v14  ;;  %v5302_v59 = vsel %vm176_vm3, %v4945_v11, %v4963_v17  ;;  %v5308_v45 = vsel %vm176_vm3, %v4947_v40, %v4965_v42  ;;  %v1556_v16 = vpop.permute.xlu1 %1555  ;;  %v4090_v8 = vld [vmem:[#allocation2 + $0x60] sm:$0xff] }
 0x153   :  { %7228 = vst [vmem:[#allocation11_spill] sm:$0xff] %v5282_v12  ;;  %v5310_v33 = vadd.f32 %v521_v25, %v519_v38  ;;  %v4016_v6 = vpop.eup %4015  ;;  %v5322_v26 = vsel %vm176_vm3, %v4954_v20, %v5036_v55  ;;  %v5327_v14 = vsel %vm176_vm3, %v4963_v17, %v1542_v13  ;;  %v5332_v38 = vsel %vm176_vm3, %v4965_v42, %v1548_v53 }
 0x154   :  { %7232 = vst [vmem:[#allocation15_spill] sm:$0xff] %v5332_v38  ;;  %v5334_v25 = vmul.f32 %v4016_v6, %v327_v1  ;;  %v5345_v20 = vsel %vm176_vm3, %v5036_v55, %v1552_v39  ;;  %v5350_v17 = vsel %vm176_vm3, %v1552_v39, %v4933_v56  ;;  %v5354_v42 = vsel %vm176_vm3, %v1542_v13, %v1550_v60 }
 0x155   :  { %7231 = vst [vmem:[#allocation10_spill] sm:$0xff] %v5310_v33  ;;  %v5340_v33 = vsel %vm176_vm3, %v5034_v30, %v5208_v9  ;;  %7235 = vst [vmem:[#allocation17_spill] sm:$0xff] %v5345_v20  ;;  %v5359_v6 = vsel %vm176_vm3, %v1550_v60, %v4945_v11  ;;  %v5363_v30 = vsel %vm176_vm3, %v1548_v53, %v1556_v16 }
 0x156   :  { %7233 = vst [vmem:[#allocation16_spill] sm:$0xff] %v5334_v25  ;;  %7234 = vst [vmem:[#allocation12_spill] sm:$0xff] %v5340_v33  ;;  %v5368_v55 = vsel %vm176_vm3, %v1556_v16, %v4947_v40  ;;  %v5372_v56 = vmul.f32 %v4985_v21, %v5334_v25  ;;  %v5376_v13 = vmul.f32 %v4990_v46, %v5334_v25  ;;  %v5434_v16 = vld [vmem:[#allocation2 + $0x80] sm:$0xff] }
 0x157   :  { %7236 = vst [vmem:[#allocation19_spill] sm:$0xff] %v5350_v17  ;;  %7237 = vst [vmem:[#allocation22_spill] sm:$0xff] %v5354_v42  ;;  %v5380_v11 = vmul.f32 %v5062_v62, %v5334_v25  ;;  %v5384_v53 = vmul.f32 %v5019_v5, %v5334_v25  ;;  %v5388_v40 = vmul.f32 %v5024_v10, %v5334_v25 }
 0x158   :  { %7238 = vst [vmem:[#allocation23_spill] sm:$0xff] %v5359_v6  ;;  %7239 = vst [vmem:[#allocation26_spill] sm:$0xff] %v5363_v30  ;;  %v5392_v21 = vmul.f32 %v5085_v29, %v5334_v25  ;;  %v5396_v46 = vmul.f32 %v5114_v41, %v5334_v25  ;;  %v5400_v62 = vmul.f32 %v5119_v49, %v5334_v25 }
 0x159   :  { %7240 = vst [vmem:[#allocation66_spill] sm:$0xff] %v5368_v55  ;;  %v5404_v5 = vrot.slane %v5376_v13, %v4961_v51  ;;  %v5408_v10 = vrot.slane %v5372_v56, %v4961_v51  ;;  %v5412_v29 = vrot.slane %v5380_v11, %v4961_v51  ;;  %v5416_v41 = vrot.slane %v5384_v53, %v4961_v51  ;;  %v7245_v55 = vld [vmem:[#allocation4_spill] sm:$0xff] }
 0x15a   :  { %v5420_v49 = vrot.slane %v5388_v40, %v4961_v51  ;;  %v5424_v39 = vrot.slane %v5392_v21, %v4961_v51  ;;  %v5428_v1 = vrot.slane %v5376_v13, %v4967_v31  ;;  %v5432_v60 = vrot.slane %v5372_v56, %v4967_v31  ;;  %7244 = vst [vmem:[#allocation70_spill] sm:$0xff] %v5434_v16 }
 0x15b   :  { %7241 = vst [vmem:[#allocation67_spill] sm:$0xff] %v5416_v41  ;;  %v649_v25 = vmul.f32 %v5434_v16, %v5404_v5  ;;  %v734_v22 = vmul.f32 %v5408_v10, %v5109_v44  ;;  %v836_v3 = vmul.f32 %v5412_v29, %v5147_v4  ;;  %v1174_v9 = vmul.f32 %v5416_v41, %v1140_v18  ;;  %v7246_v18 = vld [vmem:[#allocation3_spill] sm:$0xff] }
 0x15c   :  { %7242 = vst [vmem:[#allocation68_spill] sm:$0xff] %v5420_v49  ;;  %7243 = vst [vmem:[#allocation69_spill] sm:$0xff] %v5424_v39  ;;  %v909_v30 = vmul.f32 %v5434_v16, %v5420_v49  ;;  %v913_v42 = vmul.f32 %v5420_v49, %v7245_v55  ;;  %v1275_v6 = vmul.f32 %v5424_v39, %v4870_v15 }
 0x15d   :  { %v645_v20 = vmul.f32 %v4090_v8, %v5404_v5  ;;  %v750_v17 = vadd.f32 %v734_v22, %v649_v25  ;;  %v730_v44 = vmul.f32 %v5408_v10, %v5080_v47  ;;  %v832_v4 = vmul.f32 %v5412_v29, %v5141_v23  ;;  %v5459_v22 = vld [vmem:[#allocation2 + $0x28] sm:$0xff] }
 0x15e   :  { %v905_v51 = vmul.f32 %v5420_v49, %v7246_v18  ;;  %v962_v16 = vrot.slane %v909_v30, 1  ;;  %v973_v12 = vrot.slane %v913_v42, 1  ;;  %v1170_v55 = vmul.f32 %v5416_v41, %v1139_v43 }
 0x15f   :  { %v1271_v15 = vmul.f32 %v5424_v39, %v4881_v37  ;;  %v852_v33 = vadd.f32 %v836_v3, %v750_v17  ;;  %v746_v38 = vadd.f32 %v730_v44, %v645_v20  ;;  %v642_v47 = vmul.f32 %v5459_v22, %v5428_v1  ;;  %v7247_v44 = vld [vmem:[#allocation5_spill] sm:$0xff] }
 0x160   :  { %v961_v8 = vrot.slane %v905_v51, 1  ;;  %v974_v23 = vsel %vm595_vm2, %v962_v16, %v973_v12  ;;  %v727_v25 = vmul.f32 %v5432_v60, %v4996_v54  ;;  %v811_v42 = vrot.slane %v5380_v11, %v4967_v31 }
 0x161   :  { %v880_v43 = vrot.slane %v5388_v40, %v4967_v31  ;;  %v1009_v37 = vadd.f32 %v974_v23, %v852_v33  ;;  %v848_v3 = vadd.f32 %v832_v4, %v746_v38  ;;  %v1149_v20 = vrot.slane %v5384_v53, %v4967_v31 }
 0x162   :  { %v963_v51 = vsel %vm595_vm2, %v961_v8, %v962_v16  ;;  %v743_v17 = vadd.f32 %v727_v25, %v642_v47  ;;  %v829_v30 = vmul.f32 %v811_v42, %v5159_v28  ;;  %v1250_v33 = vrot.slane %v5392_v21, %v4967_v31  ;;  %v4092_v8 = vld [vmem:[#allocation2 + $0x8] sm:$0xff] }
 0x163   :  { %v898_v12 = vmul.f32 %v5459_v22, %v880_v43  ;;  %v902_v54 = vmul.f32 %v880_v43, %v7247_v44  ;;  %v1190_v18 = vadd.f32 %v1174_v9, %v1009_v37  ;;  %v1005_v39 = vadd.f32 %v963_v51, %v848_v3  ;;  %v4093_v3 = vld [vmem:[#allocation2 + $0x8] sm:$0xfe] }
 0x164   :  { %v1167_v41 = vmul.f32 %v1149_v20, %v5242_v7  ;;  %v845_v38 = vadd.f32 %v829_v30, %v743_v17  ;;  %v638_v23 = vmul.f32 %v4092_v8, %v5428_v1  ;;  %v1268_v25 = vmul.f32 %v1250_v33, %v4885_v32 }
 0x165   :  { %v945_v4 = vrot.slane %v898_v12, 1  ;;  %v955_v16 = vrot.slane %v902_v54, 1  ;;  %v5480_v47 = vadd.f32 %v1275_v6, %v1190_v18  ;;  %v1186_v28 = vadd.f32 %v1170_v55, %v1005_v39  ;;  %v5491_v55 = vld [vmem:[#allocation2 + $0x88] sm:$0xff] }
 0x166   :  { %v723_v9 = vmul.f32 %v5432_v60, %v4977_v57  ;;  %v825_v7 = vmul.f32 %v811_v42, %v5153_v63  ;;  %v894_v51 = vmul.f32 %v4093_v3, %v880_v43  ;;  %v1163_v17 = vmul.f32 %v1149_v20, %v5236_v0 }
 0x167   :  { %7248 = vst [vmem:[#allocation4_spill] sm:$0xff] %v5480_v47  ;;  %v956_v37 = vsel %vm595_vm2, %v945_v4, %v955_v16  ;;  %v5488_v30 = vadd.f32 %v1271_v15, %v1186_v28  ;;  %v1264_v6 = vmul.f32 %v1250_v33, %v4893_v61  ;;  %v650_v32 = vmul.f32 %v5491_v55, %v5428_v1  ;;  %v4095_v15 = vld [vmem:[#allocation2 + $0xa8] sm:$0x1] }
 0x168   :  { %v1002_v12 = vadd.f32 %v956_v37, %v845_v38  ;;  %v739_v44 = vadd.f32 %v723_v9, %v638_v23  ;;  %v944_v39 = vrot.slane %v894_v51, 1  ;;  %v735_v57 = vmul.f32 %v5432_v60, %v5008_v50 }
 0x169   :  { %7249 = vst [vmem:[#allocation3_spill] sm:$0xff] %v5488_v30  ;;  %v837_v63 = vmul.f32 %v811_v42, %v5171_v2  ;;  %v910_v0 = vmul.f32 %v5491_v55, %v880_v43  ;;  %v914_v38 = vmul.f32 %v4095_v15, %v880_v43  ;;  %v1175_v8 = vmul.f32 %v1149_v20, %v5260_v27  ;;  %v4096_v2 = vld [vmem:[#allocation2 + $0x68] sm:$0xff]  ;;  %v5534_v15 = vld [vmem:[#allocation2 + $0x38] sm:$0xff] }
 0x16a   :  { %v1183_v54 = vadd.f32 %v1167_v41, %v1002_v12  ;;  %v841_v18 = vadd.f32 %v825_v7, %v739_v44  ;;  %v946_v16 = vsel %vm595_vm2, %v944_v39, %v945_v4  ;;  %v751_v61 = vadd.f32 %v735_v57, %v650_v32  ;;  %v7250_v7 = vld [vmem:[#allocation46_spill] sm:$0xff]  ;;  %v4097_v27 = vld [vmem:[#allocation2 + $0x68] sm:$0xfe]  ;;  %7254 = vst [vmem:[#allocation5_spill] sm:$0xff] %v5534_v15 }
 0x16b   :  { %v1276_v23 = vmul.f32 %v1250_v33, %v4897_v48  ;;  %v965_v37 = vrot.slane %v910_v0, 1  ;;  %v975_v50 = vrot.slane %v914_v38, 1  ;;  %v646_v41 = vmul.f32 %v4096_v2, %v5428_v1  ;;  %v7251_v57 = vld [vmem:[#allocation32_spill] sm:$0xff]  ;;  %v7253_v0 = vld [vmem:[#allocation45_spill] sm:$0xff] }
 0x16c   :  { %v5502_v28 = vadd.f32 %v1268_v25, %v1183_v54  ;;  %v998_v9 = vadd.f32 %v946_v16, %v841_v18  ;;  %v853_v3 = vadd.f32 %v837_v63, %v751_v61  ;;  %v731_v51 = vmul.f32 %v5432_v60, %v7250_v7  ;;  %v7252_v63 = vld [vmem:[#allocation44_spill] sm:$0xff]  ;;  %v7256_v7 = vld [vmem:[#allocation63_spill] sm:$0xff] }
 0x16d   :  { %v833_v12 = vmul.f32 %v811_v42, %v5165_v58  ;;  %v976_v44 = vsel %vm595_vm2, %v965_v37, %v975_v50  ;;  %v906_v39 = vmul.f32 %v4097_v27, %v880_v43  ;;  %v1171_v48 = vmul.f32 %v1149_v20, %v5248_v19  ;;  %v5525_v20 = vld [vmem:[#allocation2 + $0x30] sm:$0xff]  ;;  %v7255_v50 = vld [vmem:[#allocation59_spill] sm:$0xff] }
 0x16e   :  { %v1179_v4 = vadd.f32 %v1163_v17, %v998_v9  ;;  %v1010_v25 = vadd.f32 %v976_v44, %v853_v3  ;;  %v747_v32 = vadd.f32 %v731_v51, %v646_v41  ;;  %v1272_v54 = vmul.f32 %v1250_v33, %v7251_v57  ;;  %v4100_v44 = vld [vmem:[#allocation2 + $0x50] sm:$0x1] }
 0x16f   :  { %v5513_v18 = vrot.slane %v5376_v13, %v7252_v63  ;;  %v964_v60 = vrot.slane %v906_v39, 1  ;;  %v5519_v58 = vrot.slane %v5376_v13, %v7253_v0  ;;  %v5523_v42 = vrot.slane %v5372_v56, %v7252_v63 }
 0x170   :  { %v5515_v1 = vadd.f32 %v1264_v6, %v1179_v4  ;;  %v1191_v19 = vadd.f32 %v1175_v8, %v1010_v25  ;;  %v849_v43 = vadd.f32 %v833_v12, %v747_v32  ;;  %v5531_v17 = vrot.slane %v5372_v56, %v7253_v0 }
 0x171   :  { %v643_v33 = vmul.f32 %v5525_v20, %v5513_v18  ;;  %v966_v6 = vsel %vm595_vm2, %v964_v60, %v965_v37  ;;  %v644_v13 = vmul.f32 %v5534_v15, %v5519_v58  ;;  %v728_v38 = vmul.f32 %v5523_v42, %v5044_v24 }
 0x172   :  { %v5542_v16 = vrot.slane %v5380_v11, %v7252_v63  ;;  %v5544_v61 = vadd.f32 %v1276_v23, %v1191_v19  ;;  %v1006_v8 = vadd.f32 %v966_v6, %v849_v43  ;;  %v729_v56 = vmul.f32 %v5531_v17, %v5091_v34  ;;  %v7257_v6 = vld [vmem:[#allocation25_spill] sm:$0xff] }
 0x173   :  { %v5550_v9 = vrot.slane %v5380_v11, %v7253_v0  ;;  %v744_v37 = vadd.f32 %v728_v38, %v643_v33  ;;  %v5556_v24 = vrot.slane %v5388_v40, %v7252_v63  ;;  %v5560_v23 = vrot.slane %v5388_v40, %v7253_v0 }
 0x174   :  { %v830_v3 = vmul.f32 %v5542_v16, %v7255_v50  ;;  %v1187_v2 = vadd.f32 %v1171_v48, %v1006_v8  ;;  %v745_v41 = vadd.f32 %v729_v56, %v644_v13  ;;  %v5566_v11 = vrot.slane %v5384_v53, %v7252_v63  ;;  %v4101_v48 = vld [vmem:[#allocation2 + $0x58] sm:$0x1]  ;;  %v4102_v8 = vld [vmem:[#allocation2 + $0x10] sm:$0xff]  ;;  %v7258_v50 = vld [vmem:[#allocation47_spill] sm:$0xff] }
 0x175   :  { %v831_v34 = vmul.f32 %v5550_v9, %v7256_v7  ;;  %v899_v12 = vmul.f32 %v5525_v20, %v5556_v24  ;;  %v900_v4 = vmul.f32 %v5534_v15, %v5560_v23  ;;  %v903_v40 = vmul.f32 %v4100_v44, %v5556_v24  ;;  %v7259_v7 = vld [vmem:[#allocation33_spill] sm:$0xff] }
 0x176   :  { %v846_v51 = vadd.f32 %v830_v3, %v744_v37  ;;  %v5573_v27 = vadd.f32 %v1272_v54, %v1187_v2  ;;  %v904_v25 = vmul.f32 %v4101_v48, %v5560_v23  ;;  %v5578_v32 = vrot.slane %v5384_v53, %v7253_v0  ;;  %v4103_v37 = vld [vmem:[#allocation2 + $0x18] sm:$0xff]  ;;  %v7261_v44 = vld [vmem:[#allocation49_spill] sm:$0xff] }
 0x177   :  { %v847_v39 = vadd.f32 %v831_v34, %v745_v41  ;;  %v948_v57 = vrot.slane %v899_v12, 1  ;;  %v951_v60 = vrot.slane %v900_v4, 1  ;;  %v957_v19 = vrot.slane %v903_v40, 1  ;;  %v7260_v12 = vld [vmem:[#allocation34_spill] sm:$0xff] }
 0x178   :  { %v1168_v43 = vmul.f32 %v5566_v11, %v5266_v35  ;;  %v959_v33 = vrot.slane %v904_v25, 1  ;;  %v1169_v13 = vmul.f32 %v5578_v32, %v7257_v6  ;;  %v5586_v54 = vrot.slane %v5392_v21, %v7252_v63  ;;  %v7262_v25 = vld [vmem:[#allocation8_spill] sm:$0xff] }
 0x179   :  { %v5590_v38 = vrot.slane %v5392_v21, %v7253_v0  ;;  %v958_v53 = vsel %vm595_vm2, %v948_v57, %v957_v19  ;;  %v639_v56 = vmul.f32 %v4102_v8, %v5513_v18  ;;  %v640_v35 = vmul.f32 %v4103_v37, %v5519_v58  ;;  %v7263_v8 = vld [vmem:[#allocation7_spill] sm:$0xff] }
 0x17a   :  { %v724_v3 = vmul.f32 %v5523_v42, %v7258_v50  ;;  %v960_v2 = vsel %vm595_vm2, %v951_v60, %v959_v33  ;;  %v1003_v41 = vadd.f32 %v958_v53, %v846_v51  ;;  %v1269_v34 = vmul.f32 %v5586_v54, %v7259_v7  ;;  %v4104_v33 = vld [vmem:[#allocation2 + $0x10] sm:$0xfe]  ;;  %v4105_v53 = vld [vmem:[#allocation2 + $0x18] sm:$0xfe] }
 0x17b   :  { %v1270_v21 = vmul.f32 %v5590_v38, %v7260_v12  ;;  %v1004_v4 = vadd.f32 %v960_v2, %v847_v39  ;;  %v725_v40 = vmul.f32 %v5531_v17, %v7261_v44  ;;  %v826_v19 = vmul.f32 %v5542_v16, %v7262_v25  ;;  %v7264_v2 = vld [vmem:[#allocation9_spill] sm:$0xff] }
 0x17c   :  { %v740_v48 = vadd.f32 %v724_v3, %v639_v56  ;;  %v1184_v6 = vadd.f32 %v1168_v43, %v1003_v41  ;;  %v827_v37 = vmul.f32 %v5550_v9, %v7263_v8  ;;  %v895_v51 = vmul.f32 %v4104_v33, %v5556_v24  ;;  %v7265_v43 = vld [vmem:[#allocation20_spill] sm:$0xff]  ;;  %v7267_v33 = vld [vmem:[#allocation35_spill] sm:$0xff] }
 0x17d   :  { %v896_v50 = vmul.f32 %v4105_v53, %v5560_v23  ;;  %v1185_v7 = vadd.f32 %v1169_v13, %v1004_v4  ;;  %v741_v12 = vadd.f32 %v725_v40, %v640_v35  ;;  %v1164_v44 = vmul.f32 %v5566_v11, %v7264_v2  ;;  %v7268_v53 = vld [vmem:[#allocation36_spill] sm:$0xff] }
 0x17e   :  { %v842_v39 = vadd.f32 %v826_v19, %v740_v48  ;;  %v5612_v56 = vadd.f32 %v1269_v34, %v1184_v6  ;;  %v947_v3 = vrot.slane %v895_v51, 1  ;;  %v1165_v41 = vmul.f32 %v5578_v32, %v7265_v43  ;;  %v5624_v34 = vld [vmem:[#allocation2 + $0x90] sm:$0xff]  ;;  %v5628_v48 = vld [vmem:[#allocation2 + $0x98] sm:$0xff] }
 0x17f   :  { %v950_v25 = vrot.slane %v896_v50, 1  ;;  %v5616_v8 = vadd.f32 %v1270_v21, %v1185_v7  ;;  %v843_v30 = vadd.f32 %v827_v37, %v741_v12  ;;  %v1265_v47 = vmul.f32 %v5586_v54, %v7267_v33  ;;  %7269 = vst [vmem:[#allocation32_spill] sm:$0xff] %v5628_v48  ;;  %v7270_v37 = vld [vmem:[#allocation51_spill] sm:$0xff]  ;;  %v7271_v50 = vld [vmem:[#allocation54_spill] sm:$0xff]  ;;  %v7272_v7 = vld [vmem:[#allocation64_spill] sm:$0xff] }
 0x180   :  { %v1266_v13 = vmul.f32 %v5590_v38, %v7268_v53  ;;  %v949_v35 = vsel %vm595_vm2, %v947_v3, %v948_v57  ;;  %v651_v40 = vmul.f32 %v5624_v34, %v5513_v18  ;;  %v652_v21 = vmul.f32 %v5628_v48, %v5519_v58  ;;  %v7273_v12 = vld [vmem:[#allocation65_spill] sm:$0xff] }
 0x181   :  { %7266 = vst [vmem:[#allocation46_spill] sm:$0xff] %v5616_v8  ;;  %v952_v4 = vsel %vm595_vm2, %v950_v25, %v951_v60  ;;  %v999_v19 = vadd.f32 %v949_v35, %v842_v39  ;;  %v736_v51 = vmul.f32 %v5523_v42, %v7270_v37  ;;  %v737_v57 = vmul.f32 %v5531_v17, %v7271_v50  ;;  %v4108_v53 = vld [vmem:[#allocation2 + $0xb0] sm:$0x1] }
 0x182   :  { %v1000_v6 = vadd.f32 %v952_v4, %v843_v30  ;;  %v838_v60 = vmul.f32 %v5542_v16, %v7272_v7  ;;  %v839_v2 = vmul.f32 %v5550_v9, %v7273_v12  ;;  %v911_v3 = vmul.f32 %v5624_v34, %v5556_v24  ;;  %v4109_v4 = vld [vmem:[#allocation2 + $0xb8] sm:$0x1] }
 0x183   :  { %v912_v25 = vmul.f32 %v5628_v48, %v5560_v23  ;;  %v1180_v39 = vadd.f32 %v1164_v44, %v999_v19  ;;  %v752_v43 = vadd.f32 %v736_v51, %v651_v40  ;;  %v753_v33 = vadd.f32 %v737_v57, %v652_v21  ;;  %v7274_v44 = vld [vmem:[#allocation21_spill] sm:$0xff]  ;;  %v7275_v40 = vld [vmem:[#allocation27_spill] sm:$0xff]  ;;  %v7277_v51 = vld [vmem:[#allocation38_spill] sm:$0xff] }
 0x184   :  { %v1181_v30 = vadd.f32 %v1165_v41, %v1000_v6  ;;  %v915_v35 = vmul.f32 %v4108_v53, %v5556_v24  ;;  %v916_v37 = vmul.f32 %v4109_v4, %v5560_v23  ;;  %v968_v50 = vrot.slane %v911_v3, 1  ;;  %v7276_v19 = vld [vmem:[#allocation37_spill] sm:$0xff]  ;;  %v4111_v3 = vld [vmem:[#allocation2 + $0x78] sm:$0xff] }
 0x185   :  { %v971_v7 = vrot.slane %v912_v25, 1  ;;  %v5646_v8 = vadd.f32 %v1265_v47, %v1180_v39  ;;  %v854_v15 = vadd.f32 %v838_v60, %v752_v43  ;;  %v855_v0 = vadd.f32 %v839_v2, %v753_v33  ;;  %v4110_v47 = vld [vmem:[#allocation2 + $0x70] sm:$0xff]  ;;  %v7278_v39 = vld [vmem:[#allocation48_spill] sm:$0xff] }
 0x186   :  { %v5648_v12 = vadd.f32 %v1266_v13, %v1181_v30  ;;  %v977_v49 = vrot.slane %v915_v35, 1  ;;  %v979_v48 = vrot.slane %v916_v37, 1  ;;  %v1176_v41 = vmul.f32 %v5566_v11, %v7274_v44  ;;  %v7279_v43 = vld [vmem:[#allocation52_spill] sm:$0xff]  ;;  %v7280_v4 = vld [vmem:[#allocation57_spill] sm:$0xff] }
 0x187   :  { %v1177_v21 = vmul.f32 %v5578_v32, %v7275_v40  ;;  %v1277_v6 = vmul.f32 %v5586_v54, %v7276_v19  ;;  %v1278_v57 = vmul.f32 %v5590_v38, %v7277_v51  ;;  %v647_v13 = vmul.f32 %v4110_v47, %v5513_v18  ;;  %v7281_v44 = vld [vmem:[#allocation60_spill] sm:$0xff]  ;;  %v4112_v19 = vld [vmem:[#allocation2 + $0x70] sm:$0xfe] }
 0x188   :  { %v648_v60 = vmul.f32 %v4111_v3, %v5519_v58  ;;  %v978_v2 = vsel %vm595_vm2, %v968_v50, %v977_v49  ;;  %v980_v25 = vsel %vm595_vm2, %v971_v7, %v979_v48  ;;  %v732_v30 = vmul.f32 %v5523_v42, %v7278_v39  ;;  %v4113_v48 = vld [vmem:[#allocation2 + $0x78] sm:$0xfe] }
 0x189   :  { %v733_v33 = vmul.f32 %v5531_v17, %v7279_v43  ;;  %v1011_v53 = vadd.f32 %v978_v2, %v854_v15  ;;  %v1012_v35 = vadd.f32 %v980_v25, %v855_v0  ;;  %v834_v37 = vmul.f32 %v5542_v16, %v7280_v4  ;;  %v7282_v3 = vld [vmem:[#allocation18_spill] sm:$0xff]  ;;  %v7283_v0 = vld [vmem:[#allocation24_spill] sm:$0xff] }
 0x18a   :  { %v835_v18 = vmul.f32 %v5550_v9, %v7281_v44  ;;  %v748_v40 = vadd.f32 %v732_v30, %v647_v13  ;;  %v907_v49 = vmul.f32 %v4112_v19, %v5556_v24  ;;  %v908_v51 = vmul.f32 %v4113_v48, %v5560_v23  ;;  %v7284_v24 = vld [vmem:[#allocation40_spill] sm:$0xff]  ;;  %v7285_v23 = vld [vmem:[#allocation41_spill] sm:$0xff] }
 0x18b   :  { %v749_v58 = vadd.f32 %v733_v33, %v648_v60  ;;  %v1192_v42 = vadd.f32 %v1176_v41, %v1011_v53  ;;  %v1193_v47 = vadd.f32 %v1177_v21, %v1012_v35  ;;  %v1172_v17 = vmul.f32 %v5566_v11, %v7282_v3  ;;  %v4115_v53 = vld [vmem:[#allocation2 + $0x8] sm:$0xfc] }
 0x18c   :  { %v1173_v15 = vmul.f32 %v5578_v32, %v7283_v0  ;;  %v850_v16 = vadd.f32 %v834_v37, %v748_v40  ;;  %v967_v25 = vrot.slane %v907_v49, 1  ;;  %v970_v9 = vrot.slane %v908_v51, 1  ;;  %v4116_v49 = vld [vmem:[#allocation2 + $0xa8] sm:$0x3]  ;;  %v4117_v0 = vld [vmem:[#allocation2 + $0x68] sm:$0xfc] }
 0x18d   :  { %v851_v2 = vadd.f32 %v835_v18, %v749_v58  ;;  %v5676_v13 = vadd.f32 %v1277_v6, %v1192_v42  ;;  %v5678_v60 = vadd.f32 %v1278_v57, %v1193_v47  ;;  %v1273_v39 = vmul.f32 %v5586_v54, %v7284_v24 }
 0x18e   :  { %v1274_v41 = vmul.f32 %v5590_v38, %v7285_v23  ;;  %v969_v21 = vsel %vm595_vm2, %v967_v25, %v968_v50  ;;  %v972_v11 = vsel %vm595_vm2, %v970_v9, %v971_v7  ;;  %v1319_v32 = vrot.slane %v5400_v62, %v4967_v31  ;;  %v4114_v50 = vld [vmem:[#allocation2 + $0x48] sm:$0x3]  ;;  %v5711_v9 = vpop.permute.xlu1 %1628 }
 0x18f   :  { %v1581_v30 = vrot.slane %v5396_v46, %v4967_v31  ;;  %v1007_v6 = vadd.f32 %v969_v21, %v850_v16  ;;  %v1008_v43 = vadd.f32 %v972_v11, %v851_v2  ;;  %v1323_v57 = vrot.slane %v5400_v62, %v7252_v63 }
 0x190   :  { %v5694_v54 = vrot.slane %v5396_v46, %v7252_v63  ;;  %v1337_v38 = vmul.f32 %v5459_v22, %v1319_v32  ;;  %v1341_v33 = vmul.f32 %v4114_v50, %v1319_v32  ;;  %v1333_v35 = vmul.f32 %v4115_v53, %v1319_v32  ;;  %v4120_v50 = vld [vmem:[#allocation2 + $0xb0] sm:$0x3] }
 0x191   :  { %v1599_v7 = vmul.f32 %v1581_v30, %v5292_v52  ;;  %v1188_v4 = vadd.f32 %v1172_v17, %v1007_v6  ;;  %v1189_v37 = vadd.f32 %v1173_v15, %v1008_v43  ;;  %v1595_v44 = vmul.f32 %v1581_v30, %v5302_v59  ;;  %v5703_v52 = vpop.permute.xlu0 %1553 }
 0x192   :  { %v1349_v18 = vmul.f32 %v5491_v55, %v1319_v32  ;;  %v1385_v40 = vrot.slane %v1337_v38, 2  ;;  %v1395_v58 = vrot.slane %v1341_v33, 2  ;;  %v1384_v19 = vrot.slane %v1333_v35, 2  ;;  %v7286_v35 = vld [vmem:[#allocation15_spill] sm:$0xff] }
 0x193   :  { %v1353_v48 = vmul.f32 %v4116_v49, %v1319_v32  ;;  %v1289_v51 = vadd.f32 %v1273_v39, %v1188_v4  ;;  %v5700_v42 = vadd.f32 %v1274_v41, %v1189_v37  ;;  %v1607_v47 = vmul.f32 %v1581_v30, %v5308_v45  ;;  %v4118_v39 = vld [vmem:[#allocation2 + $0x50] sm:$0x3]  ;;  %v4121_v37 = vld [vmem:[#allocation2 + $0x70] sm:$0xfc]  ;;  %v7287_v49 = vld [vmem:[#allocation12_spill] sm:$0xff] }
 0x194   :  { %v1405_v22 = vrot.slane %v1349_v18, 2  ;;  %v1396_v3 = vsel %vm1380_vm4, %v1385_v40, %v1395_v58  ;;  %v1386_v17 = vsel %vm1380_vm4, %v1384_v19, %v1385_v40  ;;  %v1345_v55 = vmul.f32 %v4117_v0, %v1319_v32  ;;  %v4119_v32 = vld [vmem:[#allocation2 + $0x10] sm:$0xfc]  ;;  %v5736_v58 = vpop.permute.xlu1 %1632 }
 0x195   :  { %v1415_v59 = vrot.slane %v1353_v48, 2  ;;  %v1442_v15 = vadd.f32 %v1396_v3, %v5502_v28  ;;  %v1438_v16 = vadd.f32 %v1386_v17, %v5515_v1  ;;  %v1603_v2 = vmul.f32 %v1581_v30, %v5316_v36 }
 0x196   :  { %v1338_v25 = vmul.f32 %v5525_v20, %v1323_v57  ;;  %v1404_v24 = vrot.slane %v1345_v55, 2  ;;  %v1342_v23 = vmul.f32 %v4118_v39, %v1323_v57  ;;  %v1600_v41 = vmul.f32 %v5694_v54, %v5322_v26 }
 0x197   :  { %v1416_v45 = vsel %vm1380_vm4, %v1405_v22, %v1415_v59  ;;  %v5716_v21 = vadd.f32 %v1599_v7, %v1442_v15  ;;  %v5718_v11 = vadd.f32 %v1595_v44, %v1438_v16  ;;  %v1334_v30 = vmul.f32 %v4119_v32, %v1323_v57  ;;  %v5728_v7 = vpop.permute.xlu0 %1626  ;;  %v7289_v15 = vld [vmem:[#allocation56_spill] sm:$0xff]  ;;  %v7294_v32 = vld [vmem:[#allocation69_spill] sm:$0xff] }
 0x198   :  { %v1450_v28 = vadd.f32 %v1416_v45, %v5544_v61  ;;  %v1388_v1 = vrot.slane %v1338_v25, 2  ;;  %v1406_v36 = vsel %vm1380_vm4, %v1404_v24, %v1405_v22  ;;  %v1397_v20 = vrot.slane %v1342_v23, 2  ;;  %v4122_v22 = vld [vmem:[#allocation2 + $0x20] sm:$0xff] }
 0x199   :  { %v1596_v6 = vmul.f32 %v5694_v54, %v5327_v14  ;;  %v1446_v38 = vadd.f32 %v1406_v36, %v5573_v27  ;;  %v1350_v26 = vmul.f32 %v5624_v34, %v1323_v57  ;;  %v1354_v33 = vmul.f32 %v4120_v50, %v1323_v57 }
 0x19a   :  { %v5724_v43 = vadd.f32 %v1607_v47, %v1450_v28  ;;  %v1398_v61 = vsel %vm1380_vm4, %v1388_v1, %v1397_v20  ;;  %v1387_v53 = vrot.slane %v1334_v30, 2  ;;  %v1608_v4 = vmul.f32 %v5694_v54, %v7286_v35  ;;  %v7291_v28 = vld [vmem:[#allocation11_spill] sm:$0xff]  ;;  %v7293_v20 = vld [vmem:[#allocation29_spill] sm:$0xff] }
 0x19b   :  { %v1346_v44 = vmul.f32 %v4121_v37, %v1323_v57  ;;  %v5733_v18 = vadd.f32 %v1603_v2, %v1446_v38  ;;  %v1443_v14 = vadd.f32 %v1398_v61, %v5612_v56  ;;  %v1408_v40 = vrot.slane %v1350_v26, 2  ;;  %v7288_v56 = vld [vmem:[#allocation53_spill] sm:$0xff]  ;;  %v5758_v23 = vpop.permute.xlu0 %1630  ;;  %v7295_v26 = vld [vmem:[#allocation43_spill] sm:$0xff] }
 0x19c   :  { %v1417_v27 = vrot.slane %v1354_v33, 2  ;;  %v1389_v34 = vsel %vm1380_vm4, %v1387_v53, %v1388_v1  ;;  %v1604_v48 = vmul.f32 %v5694_v54, %v7287_v49  ;;  %v641_v47 = vmul.f32 %v4122_v22, %v5404_v5  ;;  %v7290_v54 = vld [vmem:[#allocation68_spill] sm:$0xff]  ;;  %v7292_v1 = vld [vmem:[#allocation67_spill] sm:$0xff]  ;;  %v5773_v33 = vpop.permute.xlu1 %1636  ;;  %v7296_v61 = vld [vmem:[#allocation45_spill] sm:$0xff] }
 0x19d   :  { %v1407_v19 = vrot.slane %v1346_v44, 2  ;;  %v5742_v3 = vadd.f32 %v1600_v41, %v1443_v14  ;;  %v1439_v57 = vadd.f32 %v1389_v34, %v5646_v8  ;;  %v726_v59 = vmul.f32 %v5408_v10, %v7288_v56  ;;  %v4123_v8 = vld [vmem:[#allocation2 + $0x40] sm:$0x1] }
 0x19e   :  { %v1418_v17 = vsel %vm1380_vm4, %v1408_v40, %v1417_v27  ;;  %v828_v16 = vmul.f32 %v5412_v29, %v7289_v15  ;;  %v5753_v2 = vmul.f32 %v4122_v22, %v7290_v54  ;;  %v901_v39 = vmul.f32 %v4123_v8, %v7290_v54  ;;  %v4124_v37 = vld [vmem:[#allocation2] sm:$0xff] }
 0x19f   :  { %v1451_v0 = vadd.f32 %v1418_v17, %v5676_v13  ;;  %v1409_v55 = vsel %vm1380_vm4, %v1407_v19, %v1408_v40  ;;  %v5755_v25 = vadd.f32 %v1596_v6, %v1439_v57  ;;  %v742_v24 = vadd.f32 %v726_v59, %v641_v47  ;;  %v4125_v27 = vld [vmem:[#allocation2 + $0x40] sm:$0x3]  ;;  %v4126_v57 = vld [vmem:[#allocation2 + $0x58] sm:$0x3]  ;;  %v5800_v15 = vpop.permute.xlu0 %1634 }
 0x1a0   :  { %v1447_v45 = vadd.f32 %v1409_v55, %v1289_v51  ;;  %v942_v13 = vrot.slane %v5753_v2, 1  ;;  %v1166_v36 = vmul.f32 %v7292_v1, %v7291_v28  ;;  %v1267_v30 = vmul.f32 %v7294_v32, %v7293_v20  ;;  %v7299_v17 = vld [vmem:[#allocation19_spill] sm:$0xff]  ;;  %v7302_v20 = vld [vmem:[#allocation14_spill] sm:$0xff] }
 0x1a1   :  { %v5760_v41 = vadd.f32 %v1608_v4, %v1451_v0  ;;  %v844_v6 = vadd.f32 %v828_v16, %v742_v24  ;;  %v953_v51 = vrot.slane %v901_v39, 1  ;;  %v5771_v50 = vrot.slane %v5400_v62, %v7295_v26  ;;  %v7300_v0 = vld [vmem:[#allocation17_spill] sm:$0xff]  ;;  %v4127_v39 = vld [vmem:[#allocation2] sm:$0xfe] }
 0x1a2   :  { %v5767_v38 = vadd.f32 %v1604_v48, %v1447_v45  ;;  %v5777_v53 = vrot.slane %v5400_v62, %v7296_v61  ;;  %v5781_v35 = vrot.slane %v5396_v46, %v7295_v26  ;;  %v5785_v4 = vrot.slane %v5396_v46, %v7296_v61  ;;  %v7297_v62 = vld [vmem:[#allocation50_spill] sm:$0xff]  ;;  %v7298_v48 = vld [vmem:[#allocation5_spill] sm:$0xff]  ;;  %v7301_v45 = vld [vmem:[#allocation55_spill] sm:$0xff] }
 0x1a3   :  { %v637_v44 = vmul.f32 %v4124_v37, %v5404_v5  ;;  %v954_v14 = vsel %vm595_vm2, %v942_v13, %v953_v51  ;;  %v1336_v40 = vmul.f32 %v4122_v22, %v5771_v50  ;;  %v1340_v34 = vmul.f32 %v4125_v27, %v5771_v50  ;;  %v7303_v51 = vld [vmem:[#allocation28_spill] sm:$0xff]  ;;  %v4128_v27 = vld [vmem:[#allocation2] sm:$0xfc] }
 0x1a4   :  { %v722_v19 = vmul.f32 %v5408_v10, %v7297_v62  ;;  %v1001_v49 = vadd.f32 %v954_v14, %v844_v6  ;;  %v1339_v47 = vmul.f32 %v7298_v48, %v5777_v53  ;;  %v1343_v46 = vmul.f32 %v4126_v57, %v5777_v53  ;;  %v7305_v48 = vld [vmem:[#allocation23_spill] sm:$0xff]  ;;  %v7306_v57 = vld [vmem:[#allocation22_spill] sm:$0xff] }
 0x1a5   :  { %v1598_v5 = vmul.f32 %v5781_v35, %v7299_v17  ;;  %v1382_v56 = vrot.slane %v1336_v40, 2  ;;  %v1393_v59 = vrot.slane %v1340_v34, 2  ;;  %v1601_v22 = vmul.f32 %v5785_v4, %v7300_v0  ;;  %v7304_v34 = vld [vmem:[#allocation46_spill] sm:$0xff] }
 0x1a6   :  { %v738_v55 = vadd.f32 %v722_v19, %v637_v44  ;;  %v1182_v16 = vadd.f32 %v1166_v36, %v1001_v49  ;;  %v1391_v10 = vrot.slane %v1339_v47, 2  ;;  %v1399_v2 = vrot.slane %v1343_v46, 2  ;;  %v5810_v44 = vpop.permute.xlu1 %1640  ;;  %v4129_v49 = vld [vmem:[#allocation2 + $0x18] sm:$0xfc] }
 0x1a7   :  { %v824_v24 = vmul.f32 %v5412_v29, %v7301_v45  ;;  %v1394_v8 = vsel %vm1380_vm4, %v1382_v56, %v1393_v59  ;;  %v893_v28 = vmul.f32 %v4127_v39, %v7290_v54  ;;  %v1162_v6 = vmul.f32 %v7292_v1, %v7302_v20  ;;  %v7307_v46 = vld [vmem:[#allocation70_spill] sm:$0xff]  ;;  %v5827_v45 = vpop.permute.xlu0 %1638 }
 0x1a8   :  { %v1263_v37 = vmul.f32 %v7294_v32, %v7303_v51  ;;  %v1283_v14 = vadd.f32 %v1267_v30, %v1182_v16  ;;  %v1400_v36 = vsel %vm1380_vm4, %v1391_v10, %v1399_v2  ;;  %v1332_v29 = vmul.f32 %v4128_v27, %v5771_v50  ;;  %v7308_v16 = vld [vmem:[#allocation32_spill] sm:$0xff] }
 0x1a9   :  { %v840_v40 = vadd.f32 %v824_v24, %v738_v55  ;;  %v1444_v62 = vadd.f32 %v1400_v36, %v7304_v34  ;;  %v941_v19 = vrot.slane %v893_v28, 1  ;;  %v1335_v54 = vmul.f32 %v4129_v49, %v5777_v53  ;;  %v4130_v28 = vld [vmem:[#allocation2 + $0xa0] sm:$0x3] }
 0x1aa   :  { %v1594_v1 = vmul.f32 %v5781_v35, %v7305_v48  ;;  %v1441_v47 = vadd.f32 %v1394_v8, %v1283_v14  ;;  %v1381_v32 = vrot.slane %v1332_v29, 2  ;;  %v1597_v30 = vmul.f32 %v5785_v4, %v7306_v57  ;;  %v5835_v27 = vpop.permute.xlu1 %1644  ;;  %v4133_v48 = vld [vmem:[#allocation2 + $0x78] sm:$0xfc] }
 0x1ab   :  { %v1348_v17 = vmul.f32 %v7307_v46, %v5771_v50  ;;  %v5822_v59 = vadd.f32 %v1601_v22, %v1444_v62  ;;  %v943_v0 = vsel %vm595_vm2, %v941_v19, %v942_v13  ;;  %v1390_v55 = vrot.slane %v1335_v54, 2  ;;  %v4131_v22 = vld [vmem:[#allocation2 + $0xb8] sm:$0x3]  ;;  %v4132_v54 = vld [vmem:[#allocation2 + $0x60] sm:$0xfc] }
 0x1ac   :  { %v1351_v2 = vmul.f32 %v7308_v16, %v5777_v53  ;;  %v5829_v24 = vadd.f32 %v1598_v5, %v1441_v47  ;;  %v997_v8 = vadd.f32 %v943_v0, %v840_v40  ;;  %v1383_v39 = vsel %vm1380_vm4, %v1381_v32, %v1382_v56  ;;  %v7309_v62 = vld [vmem:[#allocation66_spill] sm:$0xff] }
 0x1ad   :  { %v1352_v20 = vmul.f32 %v4130_v28, %v5771_v50  ;;  %v1392_v51 = vsel %vm1380_vm4, %v1390_v55, %v1391_v10  ;;  %v1355_v14 = vmul.f32 %v4131_v22, %v5777_v53  ;;  %v1402_v13 = vrot.slane %v1348_v17, 2  ;;  %v7310_v19 = vld [vmem:[#allocation26_spill] sm:$0xff]  ;;  %v7313_v55 = vld [vmem:[#allocation4_spill] sm:$0xff] }
 0x1ae   :  { %v1411_v36 = vrot.slane %v1351_v2, 2  ;;  %v1178_v29 = vadd.f32 %v1162_v6, %v997_v8  ;;  %v1440_v34 = vadd.f32 %v1392_v51, %v5648_v12  ;;  %v1606_v40 = vmul.f32 %v5781_v35, %v7309_v62  ;;  %v7311_v12 = vld [vmem:[#allocation61_spill] sm:$0xff] }
 0x1af   :  { %v1413_v5 = vrot.slane %v1352_v20, 2  ;;  %v1419_v56 = vrot.slane %v1355_v14, 2  ;;  %v1609_v49 = vmul.f32 %v5785_v4, %v7310_v19  ;;  %v1344_v10 = vmul.f32 %v4132_v54, %v5771_v50  ;;  %v5853_v50 = vpop.permute.xlu0 %1642  ;;  %v7318_v54 = vld [vmem:[#allocation30_spill] sm:$0xff] }
 0x1b0   :  { %v1347_v47 = vmul.f32 %v4133_v48, %v5777_v53  ;;  %v1279_v32 = vadd.f32 %v1263_v37, %v1178_v29  ;;  %v5844_v57 = vadd.f32 %v1597_v30, %v1440_v34  ;;  %v1559_v17 = vsel %vm176_vm3, %v7311_v12, %v5703_v52  ;;  %v7314_v37 = vld [vmem:[#allocation42_spill] sm:$0xff]  ;;  %v5864_v34 = vpop.permute.xlu1 %1648  ;;  %v7319_v48 = vld [vmem:[#allocation31_spill] sm:$0xff] }
 0x1b1   :  { %v1414_v6 = vsel %vm1380_vm4, %v1402_v13, %v1413_v5  ;;  %v1420_v0 = vsel %vm1380_vm4, %v1411_v36, %v1419_v56  ;;  %v1401_v2 = vrot.slane %v1344_v10, 2  ;;  %v1571_v30 = vsel %vm176_vm3, %v5703_v52, %v7314_v37  ;;  %v7316_v52 = vld [vmem:[#allocation16_spill] sm:$0xff] }
 0x1b2   :  { %v1449_v16 = vadd.f32 %v1414_v6, %v7313_v55  ;;  %v1410_v8 = vrot.slane %v1347_v47, 2  ;;  %v1437_v28 = vadd.f32 %v1383_v39, %v1279_v32  ;;  %v1452_v53 = vadd.f32 %v1420_v0, %v5678_v60  ;;  %v7315_v60 = vld [vmem:[#allocation3_spill] sm:$0xff] }
 0x1b3   :  { %v1605_v20 = vmul.f32 %v5785_v4, %v1559_v17  ;;  %v1403_v22 = vsel %vm1380_vm4, %v1401_v2, %v1402_v13  ;;  %v1602_v29 = vmul.f32 %v5781_v35, %v1571_v30  ;;  %v335_v19 = vrot.slane %v7316_v52, %v7295_v26  ;;  %v5890_v12 = vpop.permute.xlu0 %1646 }
 0x1b4   :  { %v1622_v51 = vadd.f32 %v1606_v40, %v1449_v16  ;;  %v1412_v14 = vsel %vm1380_vm4, %v1410_v8, %v1411_v36  ;;  %v1610_v5 = vadd.f32 %v1594_v1, %v1437_v28  ;;  %v5866_v39 = vadd.f32 %v1609_v49, %v1452_v53  ;;  %v7317_v40 = vld [vmem:[#allocation58_spill] sm:$0xff]  ;;  %v1653_v37 = vpop.permute.xlu1 %1652 }
 0x1b5   :  { %v1445_v62 = vadd.f32 %v1403_v22, %v7315_v60  ;;  %v1448_v56 = vadd.f32 %v1412_v14, %v5700_v42  ;;  %v339_v4 = vrot.slane %v7316_v52, %v4967_v31  ;;  %v343_v13 = vrot.slane %v7316_v52, %v7252_v63 }
 0x1b6   :  { %v347_v35 = vrot.slane %v7316_v52, %v7296_v61  ;;  %v515_v49 = vmul.f32 %v7317_v40, %v7316_v52  ;;  %v1667_v42 = vsel %vm786_vm5, %v5711_v9, %v5773_v33  ;;  %v352_v10 = vmul.f32 %v335_v19, %v7318_v54 }
 0x1b7   :  { %v1618_v36 = vadd.f32 %v1602_v29, %v1445_v62  ;;  %v5878_v1 = vadd.f32 %v1605_v20, %v1448_v56  ;;  %v353_v47 = vmul.f32 %v339_v4, %v7319_v48  ;;  %v354_v32 = vmul.f32 %v343_v13, %v7318_v54  ;;  %v7320_v29 = vld [vmem:[#allocation39_spill] sm:$0xff] }
 0x1b8   :  { %v355_v6 = vmul.f32 %v347_v35, %v7319_v48  ;;  %v1678_v17 = vrot.slane %v515_v49, %v7295_v26  ;;  %v1666_v0 = vsel %vm786_vm5, %v5728_v7, %v5800_v15  ;;  %v1669_v55 = vsel %vm786_vm5, %v5736_v58, %v5810_v44  ;;  %v3657_v48 = vld [vmem:[%s7091_s1 + $0x23] ss:$8 sm:$0xf] }
 0x1b9   :  { %v1668_v16 = vsel %vm786_vm5, %v5758_v23, %v5827_v45  ;;  %v360_v2 = vcombine.low %v352_v10, %v353_v47  ;;  %v1663_v28 = vsel %vm786_vm5, %v5773_v33, %v5835_v27  ;;  %v1682_v53 = vrot.slane %v515_v49, %v4967_v31  ;;  %v1651_v10 = vpop.permute.xlu0 %1650 }
 0x1ba   :  { %v361_v8 = vcombine.low %v354_v32, %v355_v6  ;;  %v1699_v30 = vmul.f32 %v1678_v17, %v1667_v42  ;;  %v1695_v20 = vmul.f32 %v1678_v17, %v1666_v0  ;;  %v1707_v22 = vmul.f32 %v1678_v17, %v1669_v55  ;;  %v1657_v32 = vpop.permute.xlu1 %1656 }
 0x1bb   :  { %v1703_v14 = vmul.f32 %v1678_v17, %v1668_v16  ;;  %v368_v60 = vrot.slane %v360_v2, %v7320_v29  ;;  %v1700_v56 = vmul.f32 %v1682_v53, %v1663_v28  ;;  %v1662_v52 = vsel %vm786_vm5, %v5800_v15, %v5853_v50  ;;  %v7323_v28 = vld [vmem:[#allocation10_spill] sm:$0xff] }
 0x1bc   :  { %v375_v62 = vrot.slane %v361_v8, %v7320_v29  ;;  %v1715_v19 = vadd.f32 %v1699_v30, %v5829_v24  ;;  %v1711_v33 = vadd.f32 %v1695_v20, %v1610_v5  ;;  %v1723_v4 = vadd.f32 %v1707_v22, %v1622_v51 }
 0x1bd   :  { %v1719_v13 = vadd.f32 %v1703_v14, %v1618_v36  ;;  %v1716_v40 = vadd.f32 %v1700_v56, %v5716_v21  ;;  %v1696_v42 = vmul.f32 %v1682_v53, %v1662_v52  ;;  %v1665_v54 = vsel %vm786_vm5, %v5810_v44, %v5864_v34 }
 0x1be   :  { %v376_v35 = vcombine.low %v368_v60, %v375_v62  ;;  %v1708_v15 = vmul.f32 %v1682_v53, %v1665_v54  ;;  %v1664_v24 = vsel %vm786_vm5, %v5827_v45, %v5890_v12  ;;  %v1659_v21 = vsel %vm786_vm5, %v5835_v27, %v1653_v37 }
 0x1bf   :  { %v1671_v51 = vsel %vm786_vm5, %v1653_v37, %v5711_v9  ;;  %v1712_v5 = vadd.f32 %v1696_v42, %v5718_v11  ;;  %v1704_v36 = vmul.f32 %v1682_v53, %v1664_v24  ;;  %v5938_v47 = vrot.slane %v515_v49, %v7252_v63 }
 0x1c0   :  { %v383_v44 = vrot.slane %v376_v35, %v7320_v29  ;;  %v1724_v6 = vadd.f32 %v1708_v15, %v5724_v43  ;;  %v5942_v45 = vrot.slane %v515_v49, %v7296_v61  ;;  %v1658_v27 = vsel %vm786_vm5, %v5853_v50, %v1651_v10 }
 0x1c1   :  { %v1670_v9 = vsel %vm786_vm5, %v1651_v10, %v5728_v7  ;;  %v1720_v11 = vadd.f32 %v1704_v36, %v5733_v18  ;;  %v1701_v0 = vmul.f32 %v5938_v47, %v1659_v21  ;;  %v1697_v55 = vmul.f32 %v5938_v47, %v1658_v27  ;;  %v7321_v7 = vld [vmem:[#allocation13_spill] sm:$0xff]  ;;  %v7322_v18 = vld [vmem:[#allocation62_spill] sm:$0xff] }
 0x1c2   :  { %v385_v17 = vsub.f32 %v3657_v48, %v383_v44  ;;  %v1702_v43 = vmul.f32 %v5942_v45, %v1671_v51  ;;  %v1698_v49 = vmul.f32 %v5942_v45, %v1670_v9  ;;  %v1661_v16 = vsel %vm786_vm5, %v5864_v34, %v1657_v32 }
 0x1c3   :  { %v5961_v50 = vsel %vm786_vm5, %v1657_v32, %v5736_v58  ;;  %v1717_v37 = vadd.f32 %v1701_v0, %v5742_v3  ;;  %v5971_v20 = vadd.f32 %v1697_v55, %v5755_v25  ;;  %v5977_v58 = vmul.f32 %v5938_v47, %v1661_v16 }
 0x1c4   :  { %v526_v2 = vmul.f32 %v7321_v7, %v385_v17  ;;  %v527_v8 = vmul.f32 %v7322_v18, %v385_v17  ;;  %v5966_v53 = vmul.f32 %v7323_v28, %v385_v17  ;;  %v1718_v30 = vadd.f32 %v1702_v43, %v5822_v59 }
 0x1c5   :  { %v5974_v34 = vadd.f32 %v1698_v49, %v5844_v57 }
 0x1c6   :  { %v532_v22 = vrot.slane %v526_v2, %v7295_v26  ;;  %v574_v14 = vrot.slane %v527_v8, %v7295_v26  ;;  %v553_v60 = vrot.slane %v5966_v53, %v7295_v26  ;;  %v536_v3 = vrot.slane %v526_v2, %v4967_v31 }
 0x1c7   :  { %v578_v59 = vrot.slane %v527_v8, %v4967_v31  ;;  %v557_v25 = vrot.slane %v5966_v53, %v4967_v31  ;;  %v540_v57 = vrot.slane %v526_v2, %v7252_v63  ;;  %v544_v62 = vrot.slane %v526_v2, %v7296_v61 }
 0x1c8   :  { %v596_v56 = vsel %vm595_vm2, %v532_v22, %v574_v14  ;;  %v591_v52 = vsel %vm417_vm1, %v553_v60, %v532_v22  ;;  %v582_v35 = vrot.slane %v527_v8, %v7252_v63  ;;  %v586_v42 = vrot.slane %v527_v8, %v7296_v61 }
 0x1c9   :  { %v5993_v54 = vadd.f32 %v1715_v19, %v596_v56  ;;  %v5995_v10 = vadd.f32 %v1711_v33, %v591_v52  ;;  %v5997_v48 = vadd.f32 %v1723_v4, %v596_v56  ;;  %v5999_v15 = vadd.f32 %v1719_v13, %v591_v52 }
 0x1ca   :  { %v597_v24 = vsel %vm595_vm2, %v536_v3, %v578_v59  ;;  %v592_v21 = vsel %vm417_vm1, %v557_v25, %v536_v3  ;;  %v598_v51 = vsel %vm595_vm2, %v540_v57, %v582_v35  ;;  %v599_v44 = vsel %vm595_vm2, %v544_v62, %v586_v42 }
 0x1cb   :  { %v1807_v36 = vmul.f32 %v5993_v54, %v5993_v54  ;;  %v1743_v19 = vadd.f32 %v5993_v54, %v5995_v10  ;;  %v1803_v33 = vmul.f32 %v5995_v10, %v5995_v10  ;;  %v1815_v4 = vmul.f32 %v5997_v48, %v5997_v48 }
 0x1cc   :  { %v1771_v13 = vadd.f32 %v5997_v48, %v5999_v15  ;;  %v1811_v32 = vmul.f32 %v5999_v15, %v5999_v15  ;;  %v6017_v27 = vadd.f32 %v1716_v40, %v597_v24  ;;  %v6019_v9 = vadd.f32 %v1712_v5, %v592_v21 }
 0x1cd   :  { %v1744_v17 = vrot.slane %v1743_v19, 4  ;;  %v6021_v0 = vadd.f32 %v1807_v36, %v1803_v33  ;;  %v6023_v55 = vadd.f32 %v1724_v6, %v597_v24  ;;  %v6025_v43 = vadd.f32 %v1720_v11, %v592_v21 }
 0x1ce   :  { %v1772_v49 = vrot.slane %v1771_v13, 4  ;;  %v6027_v16 = vadd.f32 %v1815_v4, %v1811_v32  ;;  %v1808_v7 = vmul.f32 %v6017_v27, %v6017_v27  ;;  %v1750_v2 = vadd.f32 %v6017_v27, %v6019_v9 }
 0x1cf   :  { %v1745_v40 = vadd.f32 %v1744_v17, %v1743_v19  ;;  %v1804_v18 = vmul.f32 %v6019_v9, %v6019_v9  ;;  %v1816_v6 = vmul.f32 %v6023_v55, %v6023_v55  ;;  %v1778_v22 = vadd.f32 %v6023_v55, %v6025_v43 }
 0x1d0   :  { %v1773_v11 = vadd.f32 %v1772_v49, %v1771_v13  ;;  %v1751_v28 = vrot.slane %v1750_v2, 4  ;;  %v1812_v60 = vmul.f32 %v6025_v43, %v6025_v43  ;;  %v6045_v3 = vadd.f32 %v1717_v37, %v598_v51 }
 0x1d1   :  { %v6041_v14 = vadd.f32 %v1808_v7, %v1804_v18  ;;  %v6047_v59 = vadd.f32 %v1718_v30, %v599_v44  ;;  %v1779_v56 = vrot.slane %v1778_v22, 4  ;;  %v561_v52 = vrot.slane %v5966_v53, %v7252_v63  ;;  %v1655_v30 = vpop.permute.xlu0 %1654 }
 0x1d2   :  { %v1752_v25 = vadd.f32 %v1751_v28, %v1750_v2  ;;  %v565_v35 = vrot.slane %v5966_v53, %v7296_v61  ;;  %v6054_v24 = vadd.f32 %v1816_v6, %v1812_v60  ;;  %v1809_v21 = vmul.f32 %v6045_v3, %v6045_v3 }
 0x1d3   :  { %v1810_v37 = vmul.f32 %v6047_v59, %v6047_v59  ;;  %v1780_v36 = vadd.f32 %v1779_v56, %v1778_v22  ;;  %v593_v19 = vsel %vm417_vm1, %v561_v52, %v540_v57  ;;  %v1710_v4 = vmul.f32 %v5942_v45, %v5961_v50 }
 0x1d4   :  { %v594_v33 = vsel %vm417_vm1, %v565_v35, %v544_v62  ;;  %v6066_v13 = vadd.f32 %v5971_v20, %v593_v19  ;;  %v1725_v17 = vadd.f32 %v5977_v58, %v5760_v41  ;;  %v1660_v57 = vsel %vm786_vm5, %v5890_v12, %v1655_v30 }
 0x1d5   :  { %v6069_v32 = vadd.f32 %v5974_v34, %v594_v33  ;;  %v1726_v49 = vadd.f32 %v1710_v4, %v5866_v39  ;;  %v1672_v50 = vsel %vm786_vm5, %v1655_v30, %v5758_v23  ;;  %v1746_v62 = vrot.slane %v1745_v40, 2 }
 0x1d6   :  { %v1757_v20 = vadd.f32 %v6045_v3, %v6066_v13  ;;  %v1805_v41 = vmul.f32 %v6066_v13, %v6066_v13  ;;  %v6088_v58 = vadd.f32 %v1725_v17, %v598_v51  ;;  %v1705_v7 = vmul.f32 %v5938_v47, %v1660_v57 }
 0x1d7   :  { %v1764_v34 = vadd.f32 %v6047_v59, %v6069_v32  ;;  %v1806_v39 = vmul.f32 %v6069_v32, %v6069_v32  ;;  %v6090_v12 = vadd.f32 %v1726_v49, %v599_v44  ;;  %v1706_v23 = vmul.f32 %v5942_v45, %v1672_v50 }
 0x1d8   :  { %7324 = vst [vmem:[#allocation44_spill] sm:$0xff] %v6088_v58  ;;  %v1758_v2 = vrot.slane %v1757_v20, 4  ;;  %v6094_v6 = vadd.f32 %v1809_v21, %v1805_v41  ;;  %v1817_v22 = vmul.f32 %v6088_v58, %v6088_v58  ;;  %v1721_v51 = vadd.f32 %v1705_v7, %v5767_v38 }
 0x1d9   :  { %7325 = vst [vmem:[#allocation59_spill] sm:$0xff] %v6090_v12  ;;  %v1765_v18 = vrot.slane %v1764_v34, 4  ;;  %v6096_v28 = vadd.f32 %v1810_v37, %v1806_v39  ;;  %v1818_v60 = vmul.f32 %v6090_v12, %v6090_v12  ;;  %v1722_v44 = vadd.f32 %v1706_v23, %v5878_v1 }
 0x1da   :  { %v1759_v56 = vadd.f32 %v1758_v2, %v1757_v20  ;;  %v6106_v35 = vadd.f32 %v1721_v51, %v593_v19  ;;  %v1747_v37 = vadd.f32 %v1746_v62, %v1745_v40  ;;  %v1774_v30 = vrot.slane %v1773_v11, 2 }
 0x1db   :  { %v1766_v47 = vadd.f32 %v1765_v18, %v1764_v34  ;;  %v1841_v52 = vrot.slane %v6096_v28, 4  ;;  %v6108_v21 = vadd.f32 %v1722_v44, %v594_v33  ;;  %v1753_v4 = vrot.slane %v1752_v25, 2 }
 0x1dc   :  { %v1781_v17 = vrot.slane %v1780_v36, 2  ;;  %v1760_v57 = vrot.slane %v1759_v56, 2  ;;  %v1785_v38 = vadd.f32 %v6088_v58, %v6106_v35  ;;  %v1813_v50 = vmul.f32 %v6106_v35, %v6106_v35 }
 0x1dd   :  { %7326 = vst [vmem:[#allocation63_spill] sm:$0xff] %v6108_v21  ;;  %v1767_v49 = vrot.slane %v1766_v47, 2  ;;  %v1792_v1 = vadd.f32 %v6090_v12, %v6108_v21  ;;  %v1814_v19 = vmul.f32 %v6108_v21, %v6108_v21  ;;  %v1748_v33 = vrot.slane %v1747_v37, 1 }
 0x1de   :  { %v1775_v20 = vadd.f32 %v1774_v30, %v1773_v11  ;;  %v1754_v40 = vadd.f32 %v1753_v4, %v1752_v25  ;;  %v1782_v62 = vadd.f32 %v1781_v17, %v1780_v36  ;;  %v1786_v34 = vrot.slane %v1785_v38, 4 }
 0x1df   :  { %v1793_v41 = vrot.slane %v1792_v1, 4  ;;  %v1861_v39 = vadd.f32 %v1817_v22, %v1813_v50  ;;  %v1868_v7 = vadd.f32 %v1818_v60, %v1814_v19  ;;  %v1749_v23 = vadd.f32 %v1748_v33, %v1747_v37 }
 0x1e0   :  { %v1776_v2 = vrot.slane %v1775_v20, 1  ;;  %v1755_v18 = vrot.slane %v1754_v40, 1  ;;  %v1783_v51 = vrot.slane %v1782_v62, 1  ;;  %v1787_v44 = vadd.f32 %v1786_v34, %v1785_v38 }
 0x1e1   :  { %v1794_v45 = vadd.f32 %v1793_v41, %v1792_v1  ;;  %v1862_v8 = vrot.slane %v1861_v39, 4  ;;  %v1869_v5 = vrot.slane %v1868_v7, 4  ;;  %v1768_v21 = vadd.f32 %v1767_v49, %v1766_v47 }
 0x1e2   :  { %v1777_v53 = vadd.f32 %v1776_v2, %v1775_v20  ;;  %v1756_v42 = vadd.f32 %v1755_v18, %v1754_v40  ;;  %v1784_v12 = vadd.f32 %v1783_v51, %v1782_v62  ;;  %v1761_v11 = vadd.f32 %v1760_v57, %v1759_v56 }
 0x1e3   :  { %v1795_v58 = vrot.slane %v1794_v45, 2  ;;  %v1788_v25 = vrot.slane %v1787_v44, 2  ;;  %v7327_v36 = vrot.slane %v6041_v14, 4  ;;  %v1769_v30 = vrot.slane %v1768_v21, 1 }
 0x1e4   :  { %v6121_v60 = vadd.f32 %v1777_v53, %v1749_v23  ;;  %v6123_v37 = vadd.f32 %v1784_v12, %v1756_v42  ;;  %v7328_v4 = vrot.slane %v6054_v24, 4  ;;  %v1762_v1 = vrot.slane %v1761_v11, 1 }
 0x1e5   :  { %v1828_v22 = vadd.f32 %v7327_v36, %v6041_v14  ;;  %v1796_v38 = vadd.f32 %v1795_v58, %v1794_v45  ;;  %v1789_v50 = vadd.f32 %v1788_v25, %v1787_v44  ;;  %v1770_v14 = vadd.f32 %v1769_v30, %v1768_v21 }
 0x1e6   :  { %v1856_v17 = vadd.f32 %v7328_v4, %v6054_v24  ;;  %1879 = vrot.lane.b32.xlu0 %v6121_v60, %s4151_s5  ;;  %1881 = vrot.lane.b32.xlu1 %v6123_v37, %s4151_s5  ;;  %v7329_v42 = vrot.slane %v6021_v0, 4  ;;  %v7330_v56 = vrot.slane %v6027_v16, 4  ;;  %v1763_v45 = vadd.f32 %v1762_v1, %v1761_v11 }
 0x1e7   :  { %v1829_v47 = vrot.slane %v1828_v22, 2  ;;  %v1797_v58 = vrot.slane %v1796_v38, 1  ;;  %v1790_v49 = vrot.slane %v1789_v50, 1  ;;  %v1842_v40 = vadd.f32 %v1841_v52, %v6096_v28 }
 0x1e8   :  { %v1857_v53 = vrot.slane %v1856_v17, 2  ;;  %v1821_v12 = vadd.f32 %v7329_v42, %v6021_v0  ;;  %v1849_v24 = vadd.f32 %v7330_v56, %v6027_v16  ;;  %v1870_v41 = vadd.f32 %v1869_v5, %v1868_v7 }
 0x1e9   :  { %v1830_v57 = vadd.f32 %v1829_v47, %v1828_v22  ;;  %v1798_v62 = vadd.f32 %v1797_v58, %v1796_v38  ;;  %v1791_v21 = vadd.f32 %v1790_v49, %v1789_v50  ;;  %v1843_v18 = vrot.slane %v1842_v40, 2 }
 0x1ea   :  { %v1858_v19 = vadd.f32 %v1857_v53, %v1856_v17  ;;  %v1822_v33 = vrot.slane %v1821_v12, 2  ;;  %v1850_v20 = vrot.slane %v1849_v24, 2  ;;  %v1871_v25 = vrot.slane %v1870_v41, 2 }
 0x1eb   :  { %v1831_v34 = vrot.slane %v1830_v57, 1  ;;  %v1802_v51 = vadd.f32 %v1798_v62, %v1770_v14  ;;  %v1801_v44 = vadd.f32 %v1791_v21, %v1763_v45  ;;  %v1844_v30 = vadd.f32 %v1843_v18, %v1842_v40 }
 0x1ec   :  { %v1859_v23 = vrot.slane %v1858_v19, 1  ;;  %v1823_v2 = vadd.f32 %v1822_v33, %v1821_v12  ;;  %v1851_v0 = vadd.f32 %v1850_v20, %v1849_v24  ;;  %v1872_v28 = vadd.f32 %v1871_v25, %v1870_v41 }
 0x1ed   :  { %v1832_v16 = vadd.f32 %v1831_v34, %v1830_v57  ;;  %1885 = vrot.lane.b32.xlu1 %v1802_v51, %s4151_s5  ;;  %1883 = vrot.lane.b32.xlu0 %v1801_v44, %s4151_s5  ;;  %v7331_v5 = vrot.slane %v6094_v6, 4  ;;  %v1863_v7 = vadd.f32 %v1862_v8, %v1861_v39  ;;  %v1845_v38 = vrot.slane %v1844_v30, 1 }
 0x1ee   :  { %v1860_v11 = vadd.f32 %v1859_v23, %v1858_v19  ;;  %v1824_v36 = vrot.slane %v1823_v2, 1  ;;  %v1852_v22 = vrot.slane %v1851_v0, 1  ;;  %v1873_v50 = vrot.slane %v1872_v28, 1 }
 0x1ef   :  { %v1835_v52 = vadd.f32 %v7331_v5, %v6094_v6  ;;  %v1864_v14 = vrot.slane %v1863_v7, 2  ;;  %v1846_v42 = vadd.f32 %v1845_v38, %v1844_v30  ;;  %v3819_v5 = vld [vmem:[%s7092_s2 + $0x4] ss:$16 sps:$4 sm:$0xff]   ;;  %v3827_v38 = vld [vmem:[%s7092_s2 + $0x2c] ss:$16 sps:$4 sm:$0xff]  }
 0x1f0   :  { %v1825_v4 = vadd.f32 %v1824_v36, %v1823_v2  ;;  %v1853_v17 = vadd.f32 %v1852_v22, %v1851_v0  ;;  %v1876_v1 = vadd.f32 %v1860_v11, %v1832_v16  ;;  %v1874_v12 = vadd.f32 %v1873_v50, %v1872_v28  ;;  %3051 = vmatprep.subr.bf16.mxu0 %v3819_v5  ;;  %v3830_v50 = vld [vmem:[%s7092_s2 + $0x28] ss:$16 sps:$4 sm:$0xff]   ;;  %v3875_v5 = vld [vmem:[%s7092_s2 + $0x12c] ss:$16 sps:$4 sm:$0xff]  }
 0x1f1   :  { %v1836_v47 = vrot.slane %v1835_v52, 2  ;;  %v1865_v24 = vadd.f32 %v1864_v14, %v1863_v7  ;;  %v3823_v7 = vld [vmem:[%s7092_s2] ss:$16 sps:$4 sm:$0xff]   ;;  %v3833_v14 = vld [vmem:[%s7092_s2 + $0x4c] ss:$16 sps:$4 sm:$0xff]  }
 0x1f2   :  { %v1875_v53 = vadd.f32 %v1853_v17, %v1825_v4  ;;  %1919 = vrot.lane.b32.xlu1 %v1876_v1, %s4151_s5  ;;  %v1878_v58 = vadd.f32 %v1874_v12, %v1846_v42  ;;  %v3824_v4 = vld [vmem:[%s7092_s2 + $0x8] ss:$16 sps:$4 sm:$0xff]   ;;  %v3825_v17 = vld [vmem:[%s7092_s2 + $0x24] ss:$16 sps:$4 sm:$0xff]   ;;  %3052 = vmatpush1.bf16.msra.mxu0 %v3823_v7 }
 0x1f3   :  { %v1837_v56 = vadd.f32 %v1836_v47, %v1835_v52  ;;  %v1866_v6 = vrot.slane %v1865_v24, 1  ;;  %v3821_v52 = vld [vmem:[%s7092_s2 + $0xc] ss:$16 sps:$4 sm:$0xff]   ;;  %3053 = vmatprep.subr.bf16.mxu0 %v3825_v17  ;;  %v3831_v47 = vld [vmem:[%s7092_s2 + $0x44] ss:$16 sps:$4 sm:$0xff]  }
 0x1f4   :  { %1917 = vrot.lane.b32.xlu0 %v1875_v53, %s4151_s5  ;;  %3157 = vmatprep.subr.bf16.mxu1 %v3821_v52  ;;  %v3836_v42 = vld [vmem:[%s7092_s2 + $0x48] ss:$16 sps:$4 sm:$0xff]   ;;  %v3837_v12 = vld [vmem:[%s7092_s2 + $0x64] ss:$16 sps:$4 sm:$0xff]   ;;  %v3877_v52 = vld [vmem:[%s7092_s2 + $0x120] ss:$16 sps:$4 sm:$0xff]  }
 0x1f5   :  { %v1838_v45 = vrot.slane %v1837_v56, 1  ;;  %v1867_v39 = vadd.f32 %v1866_v6, %v1865_v24  ;;  %3158 = vmatpush1.bf16.msra.mxu1 %v3824_v4  ;;  %v3841_v24 = vld [vmem:[%s7092_s2 + $0x60] ss:$16 sps:$4 sm:$0xff]   ;;  %v3845_v6 = vld [vmem:[%s7092_s2 + $0x8c] ss:$16 sps:$4 sm:$0xff]  }
 0x1f6   :  { %1923 = vrot.lane.b32.xlu1 %v1878_v58, %s4151_s5  ;;  %3159 = vmatprep.subr.bf16.mxu1 %v3827_v38  ;;  %v3878_v7 = vld [vmem:[%s7092_s2 + $0x128] ss:$16 sps:$4 sm:$0xff]   ;;  %v3879_v4 = vld [vmem:[%s7092_s2 + $0x144] ss:$16 sps:$4 sm:$0xff]   ;;  %v3881_v17 = vld [vmem:[%s7092_s2 + $0x14c] ss:$16 sps:$4 sm:$0xff]  }
 0x1f7   :  { %v1839_v8 = vadd.f32 %v1838_v45, %v1837_v56  ;;  %v3839_v56 = vld [vmem:[%s7092_s2 + $0x6c] ss:$16 sps:$4 sm:$0xff]   ;;  %v3843_v45 = vld [vmem:[%s7092_s2 + $0x84] ss:$16 sps:$4 sm:$0xff]   ;;  %v3883_v38 = vld [vmem:[%s7092_s2 + $0x140] ss:$16 sps:$4 sm:$0xff]  }
 0x1f9   :  { %v1877_v49 = vadd.f32 %v1867_v39, %v1839_v8  ;;  %3160 = vmatpush1.bf16.msra.mxu1 %v3830_v50  ;;  %v3847_v8 = vld [vmem:[%s7092_s2 + $0x80] ss:$16 sps:$4 sm:$0xff]   ;;  %v3848_v39 = vld [vmem:[%s7092_s2 + $0x88] ss:$16 sps:$4 sm:$0xff]   ;;  %v3885_v50 = vld [vmem:[%s7092_s2 + $0x164] ss:$16 sps:$4 sm:$0xff]  }
 0x1fa   :  { %3161 = vmatprep.subr.bf16.mxu1 %v3833_v14  ;;  %v3889_v14 = vld [vmem:[%s7092_s2 + $0x160] ss:$16 sps:$4 sm:$0xff]  }
 0x1fb   :  { %1921 = vrot.lane.b32.xlu0 %v1877_v49, %s4151_s5 }
 0x1fd   :  { %3162 = vmatpush1.bf16.msra.mxu1 %v3836_v42  ;;  %v3891_v42 = vld [vmem:[%s7092_s2 + $0x184] ss:$16 sps:$4 sm:$0xff]  }
 0x1fe   :  { %3163 = vmatprep.subr.bf16.mxu1 %v3839_v56  ;;  %v3895_v56 = vld [vmem:[%s7092_s2 + $0x180] ss:$16 sps:$4 sm:$0xff]  }
 0x258   :  { %v1880_v57 = vpop.permute.xlu0 %1879  ;;  %v1882_v19 = vpop.permute.xlu1 %1881 }
 0x259   :  { %v1889_v33 = vsel %vm176_vm3, %v1880_v57, %v1882_v19 }
 0x25a   :  { %v6151_v20 = vadd.f32 %v1889_v33, %v6123_v37  ;;  %v3854_v33 = vld [vmem:[%s7092_s2 + $0xa8] ss:$16 sps:$4 sm:$0xff]  }
 0x25c   :  { %1897 = vrot.lane.b32.xlu1 %v6151_v20, %s4153_s19 }
 0x25f   :  { %v1886_v40 = vpop.permute.xlu1 %1885  ;;  %v1884_v62 = vpop.permute.xlu0 %1883 }
 0x260   :  { %v1890_v21 = vsel %vm176_vm3, %v1886_v40, %v1880_v57  ;;  %v1887_v34 = vsel %vm176_vm3, %v1884_v62, %v1886_v40  ;;  %v1888_v37 = vsel %vm176_vm3, %v1882_v19, %v1884_v62  ;;  %v3851_v57 = vld [vmem:[%s7092_s2 + $0xac] ss:$16 sps:$4 sm:$0xff]   ;;  %v3853_v19 = vld [vmem:[%s7092_s2 + $0xa0] ss:$16 sps:$4 sm:$0xff]   ;;  %v3855_v40 = vld [vmem:[%s7092_s2 + $0xc4] ss:$16 sps:$4 sm:$0xff]  }
 0x261   :  { %v6160_v41 = vadd.f32 %v1890_v21, %v6121_v60  ;;  %v6162_v23 = vadd.f32 %v1887_v34, %v1802_v51  ;;  %v6170_v18 = vadd.f32 %v1888_v37, %v1801_v44  ;;  %v3857_v62 = vld [vmem:[%s7092_s2 + $0xcc] ss:$16 sps:$4 sm:$0xff]   ;;  %v3859_v21 = vld [vmem:[%s7092_s2 + $0xc0] ss:$16 sps:$4 sm:$0xff]   ;;  %v3860_v34 = vld [vmem:[%s7092_s2 + $0xc8] ss:$16 sps:$4 sm:$0xff]  }
 0x262   :  { %v3861_v37 = vld [vmem:[%s7092_s2 + $0xe4] ss:$16 sps:$4 sm:$0xff]  }
 0x263   :  { %1895 = vrot.lane.b32.xlu0 %v6160_v41, %s4153_s19  ;;  %1901 = vrot.lane.b32.xlu1 %v6162_v23, %s4153_s19 }
 0x264   :  { %v1920_v2 = vpop.permute.xlu1 %1919 }
 0x266   :  { %v1918_v0 = vpop.permute.xlu0 %1917 }
 0x267   :  { %v1927_v16 = vsel %vm176_vm3, %v1918_v0, %v1920_v2  ;;  %1899 = vrot.lane.b32.xlu0 %v6170_v18, %s4153_s19 }
 0x268   :  { %v6174_v60 = vadd.f32 %v1927_v16, %v1876_v1  ;;  %v1924_v51 = vpop.permute.xlu1 %1923  ;;  %v3829_v1 = vld [vmem:[%s7092_s2 + $0x20] ss:$16 sps:$4 sm:$0xff]   ;;  %v3866_v16 = vld [vmem:[%s7092_s2 + $0xe8] ss:$16 sps:$4 sm:$0xff]  }
 0x269   :  { %v1928_v25 = vsel %vm176_vm3, %v1924_v51, %v1918_v0  ;;  %3054 = vmatpush1.bf16.msra.mxu0 %v3829_v1  ;;  %v3865_v0 = vld [vmem:[%s7092_s2 + $0xe0] ss:$16 sps:$4 sm:$0xff]   ;;  %v3884_v1 = vld [vmem:[%s7092_s2 + $0x148] ss:$16 sps:$4 sm:$0xff]  }
 0x26a   :  { %1935 = vrot.lane.b32.xlu1 %v6174_v60, %s4153_s19  ;;  %v6182_v11 = vadd.f32 %v1928_v25, %v1875_v53  ;;  %v3835_v53 = vld [vmem:[%s7092_s2 + $0x40] ss:$16 sps:$4 sm:$0xff]   ;;  %3055 = vmatprep.subr.bf16.mxu0 %v3831_v47  ;;  %v3869_v25 = vld [vmem:[%s7092_s2 + $0x10c] ss:$16 sps:$4 sm:$0xff]  }
 0x26b   :  { %v3887_v47 = vld [vmem:[%s7092_s2 + $0x16c] ss:$16 sps:$4 sm:$0xff]  }
 0x26c   :  { %1933 = vrot.lane.b32.xlu0 %v6182_v11, %s4153_s19 }
 0x26d   :  { %v1922_v36 = vpop.permute.xlu0 %1921  ;;  %3056 = vmatpush1.bf16.msra.mxu0 %v3835_v53  ;;  %v3890_v53 = vld [vmem:[%s7092_s2 + $0x168] ss:$16 sps:$4 sm:$0xff]  }
 0x26e   :  { %v1925_v44 = vsel %vm176_vm3, %v1922_v36, %v1924_v51  ;;  %v1926_v22 = vsel %vm176_vm3, %v1920_v2, %v1922_v36  ;;  %3057 = vmatprep.subr.bf16.mxu0 %v3837_v12  ;;  %v3863_v2 = vld [vmem:[%s7092_s2 + $0xec] ss:$16 sps:$4 sm:$0xff]   ;;  %v3867_v51 = vld [vmem:[%s7092_s2 + $0x104] ss:$16 sps:$4 sm:$0xff]   ;;  %v3871_v36 = vld [vmem:[%s7092_s2 + $0x100] ss:$16 sps:$4 sm:$0xff]  }
 0x26f   :  { %v6190_v30 = vadd.f32 %v1926_v22, %v1877_v49  ;;  %v6192_v28 = vadd.f32 %v1925_v44, %v1878_v58  ;;  %v3842_v58 = vld [vmem:[%s7092_s2 + $0x68] ss:$16 sps:$4 sm:$0xff]   ;;  %v3849_v49 = vld [vmem:[%s7092_s2 + $0xa4] ss:$16 sps:$4 sm:$0xff]   ;;  %v3893_v12 = vld [vmem:[%s7092_s2 + $0x18c] ss:$16 sps:$4 sm:$0xff]  }
 0x270   :  { %3164 = vmatpush1.bf16.msra.mxu1 %v3842_v58  ;;  %v3872_v44 = vld [vmem:[%s7092_s2 + $0x108] ss:$16 sps:$4 sm:$0xff]   ;;  %v3873_v22 = vld [vmem:[%s7092_s2 + $0x124] ss:$16 sps:$4 sm:$0xff]  }
 0x271   :  { %1939 = vrot.lane.b32.xlu1 %v6192_v28, %s4153_s19  ;;  %1937 = vrot.lane.b32.xlu0 %v6190_v30, %s4153_s19  ;;  %v3897_v58 = vld [vmem:[%s7092_s2 + $0x1a4] ss:$16 sps:$4 sm:$0xff]  }
 0x272   :  { %3058 = vmatpush1.bf16.msra.mxu0 %v3841_v24  ;;  %3165 = vmatprep.subr.bf16.mxu1 %v3845_v6  ;;  %v3896_v24 = vld [vmem:[%s7092_s2 + $0x188] ss:$16 sps:$4 sm:$0xff]   ;;  %v3901_v6 = vld [vmem:[%s7092_s2 + $0x1a0] ss:$16 sps:$4 sm:$0xff]  }
 0x273   :  { %3059 = vmatprep.subr.bf16.mxu0 %v3843_v45  ;;  %v3899_v45 = vld [vmem:[%s7092_s2 + $0x1ac] ss:$16 sps:$4 sm:$0xff]  }
 0x274   :  { %3166 = vmatpush1.bf16.msra.mxu1 %v3848_v39  ;;  %v3903_v39 = vld [vmem:[%s7092_s2 + $0x1c4] ss:$16 sps:$4 sm:$0xff]  }
 0x275   :  { %3167 = vmatprep.subr.bf16.mxu1 %v3851_v57  ;;  %v3907_v57 = vld [vmem:[%s7092_s2 + $0x1c0] ss:$16 sps:$4 sm:$0xff]  }
 0x276   :  { %3060 = vmatpush1.bf16.msra.mxu0 %v3847_v8  ;;  %v3902_v8 = vld [vmem:[%s7092_s2 + $0x1a8] ss:$16 sps:$4 sm:$0xff]  }
 0x277   :  { %3061 = vmatprep.subr.bf16.mxu0 %v3849_v49  ;;  %v3905_v49 = vld [vmem:[%s7092_s2 + $0x1cc] ss:$16 sps:$4 sm:$0xff]  }
 0x278   :  { %3168 = vmatpush1.bf16.msra.mxu1 %v3854_v33  ;;  %v3909_v33 = vld [vmem:[%s7092_s2 + $0x1e4] ss:$16 sps:$4 sm:$0xff]  }
 0x279   :  { %3169 = vmatprep.subr.bf16.mxu1 %v3857_v62  ;;  %v3913_v62 = vld [vmem:[%s7092_s2 + $0x1e0] ss:$16 sps:$4 sm:$0xff]  }
 0x27a   :  { %3062 = vmatpush1.bf16.msra.mxu0 %v3853_v19  ;;  %v3908_v19 = vld [vmem:[%s7092_s2 + $0x1c8] ss:$16 sps:$4 sm:$0xff]  }
 0x27b   :  { %3063 = vmatprep.subr.bf16.mxu0 %v3855_v40  ;;  %v3911_v40 = vld [vmem:[%s7092_s2 + $0x1ec] ss:$16 sps:$4 sm:$0xff]  }
 0x27c   :  { %3170 = vmatpush1.bf16.msra.mxu1 %v3860_v34  ;;  %v3917_v34 = vld [vmem:[%s7092_s2 + $0x204] ss:$16 sps:$4 sm:$0xff]  }
 0x27d   :  { %3171 = vmatprep.subr.bf16.mxu1 %v3863_v2 }
 0x27e   :  { %3064 = vmatpush1.bf16.msra.mxu0 %v3859_v21  ;;  %v3914_v21 = vld [vmem:[%s7092_s2 + $0x1e8] ss:$16 sps:$4 sm:$0xff]  }
 0x27f   :  { %3065 = vmatprep.subr.bf16.mxu0 %v3861_v37  ;;  %v3920_v37 = vld [vmem:[%s7092_s2 + $0x20c] ss:$16 sps:$4 sm:$0xff]  }
 0x280   :  { %3172 = vmatpush1.bf16.msra.mxu1 %v3866_v16 }
 0x281   :  { %3173 = vmatprep.subr.bf16.mxu1 %v3869_v25 }
 0x282   :  { %3066 = vmatpush1.bf16.msra.mxu0 %v3865_v0 }
 0x283   :  { %3067 = vmatprep.subr.bf16.mxu0 %v3867_v51 }
 0x284   :  { %3174 = vmatpush1.bf16.msra.mxu1 %v3872_v44 }
 0x285   :  { %3175 = vmatprep.subr.bf16.mxu1 %v3875_v5 }
 0x286   :  { %3068 = vmatpush1.bf16.msra.mxu0 %v3871_v36 }
 0x287   :  { %3069 = vmatprep.subr.bf16.mxu0 %v3873_v22 }
 0x288   :  { %3176 = vmatpush1.bf16.msra.mxu1 %v3878_v7 }
 0x289   :  { %3177 = vmatprep.subr.bf16.mxu1 %v3881_v17 }
 0x28a   :  { %3070 = vmatpush1.bf16.msra.mxu0 %v3877_v52 }
 0x28b   :  { %3071 = vmatprep.subr.bf16.mxu0 %v3879_v4 }
 0x28c   :  { %3178 = vmatpush1.bf16.msra.mxu1 %v3884_v1 }
 0x28d   :  { %3179 = vmatprep.subr.bf16.mxu1 %v3887_v47 }
 0x28e   :  { %3072 = vmatpush1.bf16.msra.mxu0 %v3883_v38 }
 0x28f   :  { %3073 = vmatprep.subr.bf16.mxu0 %v3885_v50 }
 0x290   :  { %3180 = vmatpush1.bf16.msra.mxu1 %v3890_v53 }
 0x291   :  { %3181 = vmatprep.subr.bf16.mxu1 %v3893_v12 }
 0x292   :  { %3074 = vmatpush1.bf16.msra.mxu0 %v3889_v14 }
 0x293   :  { %3075 = vmatprep.subr.bf16.mxu0 %v3891_v42 }
 0x294   :  { %3182 = vmatpush1.bf16.msra.mxu1 %v3896_v24 }
 0x295   :  { %3183 = vmatprep.subr.bf16.mxu1 %v3899_v45 }
 0x296   :  { %3076 = vmatpush1.bf16.msra.mxu0 %v3895_v56 }
 0x297   :  { %3077 = vmatprep.subr.bf16.mxu0 %v3897_v58 }
 0x298   :  { %3184 = vmatpush1.bf16.msra.mxu1 %v3902_v8 }
 0x299   :  { %3185 = vmatprep.subr.bf16.mxu1 %v3905_v49 }
 0x29a   :  { %3078 = vmatpush1.bf16.msra.mxu0 %v3901_v6 }
 0x29b   :  { %3079 = vmatprep.subr.bf16.mxu0 %v3903_v39 }
 0x29c   :  { %3186 = vmatpush1.bf16.msra.mxu1 %v3908_v19 }
 0x29d   :  { %3187 = vmatprep.subr.bf16.mxu1 %v3911_v40 }
 0x29e   :  { %3080 = vmatpush1.bf16.msra.mxu0 %v3907_v57 }
 0x29f   :  { %3081 = vmatprep.subr.bf16.mxu0 %v3909_v33 }
 0x2a0   :  { %3188 = vmatpush1.bf16.msra.mxu1 %v3914_v21 }
 0x2a1   :  { %3210 = vmatprep.subr.bf16.mxu1 %v3920_v37 }
 0x2a2   :  { %3082 = vmatpush1.bf16.msra.mxu0 %v3913_v62 }
 0x2a3   :  { %3104 = vmatprep.subr.bf16.mxu0 %v3917_v34 }
 0x2ce   :  { %v1898_v2 = vpop.permute.xlu1 %1897 }
 0x2d5   :  { %v1902_v0 = vpop.permute.xlu1 %1901  ;;  %v1896_v16 = vpop.permute.xlu0 %1895 }
 0x2d6   :  { %v1905_v51 = vsel %vm193_vm6, %v1896_v16, %v1898_v2  ;;  %v1906_v25 = vsel %vm193_vm6, %v1902_v0, %v1896_v16 }
 0x2d7   :  { %v1907_v5 = vadd.f32 %v1906_v25, %v6160_v41  ;;  %v1908_v52 = vadd.f32 %v1905_v51, %v6151_v20 }
 0x2d9   :  { %v1900_v36 = vpop.permute.xlu0 %1899  ;;  %v1912_v14 = vadd.f32 %v1908_v52, %v1907_v5 }
 0x2da   :  { %v1903_v44 = vsel %vm193_vm6, %v1900_v36, %v1902_v0  ;;  %v1904_v22 = vsel %vm193_vm6, %v1898_v2, %v1900_v36 }
 0x2db   :  { %v1909_v4 = vadd.f32 %v1904_v22, %v6170_v18  ;;  %v1910_v17 = vadd.f32 %v1903_v44, %v6162_v23  ;;  %v3666_v44 = vld [vmem:[%s7091_s1 + $0x24] ss:$8 sm:$0xf] }
 0x2dc   :  { %v1936_v7 = vpop.permute.xlu1 %1935 }
 0x2dd   :  { %v1911_v38 = vadd.f32 %v1910_v17, %v1907_v5  ;;  %v1913_v1 = vadd.f32 %v1909_v4, %v1908_v52  ;;  %v1914_v50 = vadd.f32 %v1910_v17, %v1909_v4 }
 0x2de   :  { %v1934_v47 = vpop.permute.xlu0 %1933 }
 0x2df   :  { %v1943_v53 = vsel %vm193_vm6, %v1934_v47, %v1936_v7  ;;  %v1915_v42 = vadd.f32 %v1913_v1, %v1911_v38  ;;  %v1916_v12 = vadd.f32 %v1914_v50, %v1912_v14 }
 0x2e0   :  { %v1946_v41 = vadd.f32 %v1943_v53, %v6174_v60 }
 0x2e1   :  { %v1955_v8 = vmul.f32 0.001953125, %v1915_v42  ;;  %v1956_v49 = vmul.f32 0.001953125, %v1916_v12 }
 0x2e3   :  { %v1940_v56 = vpop.permute.xlu1 %1939  ;;  %v1938_v24 = vpop.permute.xlu0 %1937  ;;  %v1959_v62 = vmul.f32 %v1955_v8, %v1955_v8  ;;  %v1960_v21 = vmul.f32 %v1956_v49, %v1956_v49 }
 0x2e4   :  { %v1944_v20 = vsel %vm193_vm6, %v1940_v56, %v1934_v47  ;;  %v1941_v23 = vsel %vm193_vm6, %v1938_v24, %v1940_v56  ;;  %v1942_v18 = vsel %vm193_vm6, %v1936_v7, %v1938_v24  ;;  %v3667_v24 = vld [vmem:[%s7091_s1 + $0x25] ss:$8 sm:$0xf] }
 0x2e5   :  { %v1945_v58 = vadd.f32 %v1944_v20, %v6182_v11  ;;  %v1947_v45 = vadd.f32 %v1942_v18, %v6190_v30  ;;  %v1948_v6 = vadd.f32 %v1941_v23, %v6192_v28 }
 0x2e7   :  { %v1951_v39 = vadd.f32 %v1947_v45, %v1946_v41  ;;  %v1950_v57 = vadd.f32 %v1946_v41, %v1945_v58  ;;  %v1949_v19 = vadd.f32 %v1948_v6, %v1945_v58  ;;  %v1952_v33 = vadd.f32 %v1948_v6, %v1947_v45 }
 0x2e9   :  { %v1953_v40 = vadd.f32 %v1951_v39, %v1949_v19  ;;  %v1954_v60 = vadd.f32 %v1952_v33, %v1950_v57 }
 0x2eb   :  { %v1957_v34 = vmul.f32 0.001953125, %v1953_v40  ;;  %v1958_v37 = vmul.f32 0.001953125, %v1954_v60 }
 0x2ed   :  { %v1961_v2 = vsub.f32 %v1957_v34, %v1959_v62  ;;  %v1962_v0 = vsub.f32 %v1958_v37, %v1960_v21 }
 0x2ef   :  { %v1965_v16 = vadd.f32 1e-05, %v1961_v2  ;;  %v1966_v11 = vadd.f32 1e-05, %v1962_v0 }
 0x2f1   :  { %4017 = vrsqrt.f32 %v1965_v16 }
 0x2f2   :  { %4019 = vrsqrt.f32 %v1966_v11 }
 0x2fb   :  { %v4018_v30 = vpop.eup %4017 }
 0x2fc   :  { %v4020_v28 = vpop.eup %4019 }
 0x2fd   :  { %v1971_v51 = vcombine.low %v4018_v30, %v4020_v28 }
 0x2ff   :  { %v1978_v25 = vrot.slane %v1971_v51, %v7320_v29 }
 0x301   :  { %v1979_v36 = vcombine.low %v1978_v25, %v1978_v25 }
 0x303   :  { %v1986_v22 = vrot.slane %v1979_v36, %v7320_v29 }
 0x305   :  { %v1988_v5 = vmul.f32 %v3666_v44, %v1986_v22 }
 0x307   :  { %v1993_v52 = vrot.slane %v1988_v5, %v7295_v26  ;;  %v6427_v7 = vrot.slane %v1988_v5, %v7252_v63  ;;  %v6430_v4 = vrot.slane %v1988_v5, %v7296_v61  ;;  %v1997_v17 = vrot.slane %v1988_v5, %v4967_v31 }
 0x309   :  { %v2028_v38 = vmul.f32 %v1993_v52, %v1955_v8  ;;  %v2029_v1 = vmul.f32 %v1997_v17, %v1956_v49  ;;  %v2030_v50 = vmul.f32 %v6427_v7, %v1955_v8  ;;  %v2031_v47 = vmul.f32 %v6430_v4, %v1956_v49 }
 0x30a   :  { %v2011_v23 = vmul.f32 %v1997_v17, %v6019_v9  ;;  %v2015_v18 = vmul.f32 %v1997_v17, %v6017_v27  ;;  %v2010_v45 = vmul.f32 %v1993_v52, %v5995_v10  ;;  %v2014_v6 = vmul.f32 %v1993_v52, %v5993_v54 }
 0x30b   :  { %v2036_v14 = vcombine.low %v2028_v38, %v2029_v1  ;;  %v2037_v53 = vcombine.low %v2030_v50, %v2031_v47  ;;  %v2019_v39 = vmul.f32 %v1997_v17, %v6025_v43  ;;  %v2023_v49 = vmul.f32 %v1997_v17, %v6023_v55 }
 0x30c   :  { %v2018_v57 = vmul.f32 %v1993_v52, %v5999_v15  ;;  %v2022_v54 = vmul.f32 %v1993_v52, %v5997_v48  ;;  %v2013_v15 = vmul.f32 %v6430_v4, %v6069_v32  ;;  %v2017_v32 = vmul.f32 %v6430_v4, %v6047_v59 }
 0x30d   :  { %v2044_v42 = vrot.slane %v2036_v14, %v7320_v29  ;;  %v2051_v12 = vrot.slane %v2037_v53, %v7320_v29  ;;  %v2012_v36 = vmul.f32 %v6427_v7, %v6066_v13  ;;  %v2016_v5 = vmul.f32 %v6427_v7, %v6045_v3 }
 0x30f   :  { %v2052_v56 = vcombine.low %v2044_v42, %v2051_v12  ;;  %v2020_v12 = vmul.f32 %v6427_v7, %v6106_v35 }
 0x311   :  { %v2059_v20 = vrot.slane %v2052_v56, %v7320_v29 }
 0x313   :  { %v2061_v41 = vsub.f32 %v3667_v24, %v2059_v20  ;;  %v7332_v20 = vld [vmem:[#allocation44_spill] sm:$0xff] }
 0x315   :  { %v2070_v58 = vrot.slane %v2061_v41, %v4967_v31  ;;  %v2066_v8 = vrot.slane %v2061_v41, %v7295_v26  ;;  %v6474_v37 = vrot.slane %v2061_v41, %v7296_v61  ;;  %v2074_v28 = vrot.slane %v2061_v41, %v7252_v63 }
 0x316   :  { %v2024_v41 = vmul.f32 %v6427_v7, %v7332_v20 }
 0x317   :  { %v6450_v19 = vadd.f32 %v2070_v58, %v2011_v23  ;;  %v6452_v33 = vadd.f32 %v2070_v58, %v2015_v18  ;;  %v6454_v9 = vadd.f32 %v2066_v8, %v2010_v45  ;;  %v6456_v27 = vadd.f32 %v2066_v8, %v2014_v6 }
 0x318   :  { %v6458_v40 = vadd.f32 %v2070_v58, %v2019_v39  ;;  %v6460_v10 = vadd.f32 %v2070_v58, %v2023_v49  ;;  %v6465_v60 = vadd.f32 %v2066_v8, %v2018_v57  ;;  %v6471_v34 = vadd.f32 %v2066_v8, %v2022_v54 }
 0x319   :  { %v2100_v43 = vmin.f32 %v6450_v19, 20.0  ;;  %v2104_v55 = vmin.f32 %v6452_v33, 20.0  ;;  %v2099_v62 = vmin.f32 %v6454_v9, 20.0  ;;  %v2103_v21 = vmin.f32 %v6456_v27, 20.0 }
 0x31a   :  { %v2108_v0 = vmin.f32 %v6458_v40, 20.0  ;;  %v2112_v16 = vmin.f32 %v6460_v10, 20.0  ;;  %v2107_v25 = vmin.f32 %v6465_v60, 20.0  ;;  %v2111_v22 = vmin.f32 %v6471_v34, 20.0 }
 0x31b   :  { %v2117_v2 = vmul.f32 1.442695, %v2100_v43  ;;  %v2125_v48 = vmul.f32 1.442695, %v2104_v55  ;;  %v2115_v11 = vmul.f32 1.442695, %v2099_v62  ;;  %v6488_v59 = vadd.f32 %v6474_v37, %v2013_v15 }
 0x31c   :  { %v2123_v30 = vmul.f32 1.442695, %v2103_v21  ;;  %v2133_v51 = vmul.f32 1.442695, %v2108_v0  ;;  %v2141_v44 = vmul.f32 1.442695, %v2112_v16  ;;  %v6491_v17 = vadd.f32 %v6474_v37, %v2017_v32 }
 0x31d   :  { %4021 = vpow2.f32 %v2117_v2  ;;  %v2131_v52 = vmul.f32 1.442695, %v2107_v25  ;;  %v2139_v38 = vmul.f32 1.442695, %v2111_v22  ;;  %v6493_v1 = vadd.f32 %v2074_v28, %v2012_v36 }
 0x31e   :  { %4023 = vpow2.f32 %v2125_v48  ;;  %v6495_v13 = vadd.f32 %v2074_v28, %v2016_v5  ;;  %v2102_v50 = vmin.f32 %v6488_v59, 20.0  ;;  %v2106_v47 = vmin.f32 %v6491_v17, 20.0 }
 0x31f   :  { %4025 = vpow2.f32 %v2115_v11  ;;  %v2101_v3 = vmin.f32 %v6493_v1, 20.0  ;;  %v6505_v23 = vadd.f32 %v2074_v28, %v2020_v12  ;;  %v6507_v18 = vadd.f32 %v2074_v28, %v2024_v41 }
 0x320   :  { %4027 = vpow2.f32 %v2123_v30  ;;  %v2105_v14 = vmin.f32 %v6495_v13, 20.0  ;;  %v2121_v53 = vmul.f32 1.442695, %v2102_v50  ;;  %v2129_v42 = vmul.f32 1.442695, %v2106_v47 }
 0x321   :  { %4029 = vpow2.f32 %v2133_v51  ;;  %v2119_v56 = vmul.f32 1.442695, %v2101_v3  ;;  %vm2180_vm7 = vcmp.gt.f32.partialorder %v6450_v19, 20.0  ;;  %vm2184_vm8 = vcmp.gt.f32.partialorder %v6452_v33, 20.0 }
 0x322   :  { %4031 = vpow2.f32 %v2141_v44  ;;  %v2127_v24 = vmul.f32 1.442695, %v2105_v14  ;;  %vm2179_vm9 = vcmp.gt.f32.partialorder %v6454_v9, 20.0  ;;  %vm2183_vm10 = vcmp.gt.f32.partialorder %v6456_v27, 20.0 }
 0x323   :  { %4033 = vpow2.f32 %v2131_v52  ;;  %vm2188_vm11 = vcmp.gt.f32.partialorder %v6458_v40, 20.0  ;;  %vm2192_vm12 = vcmp.gt.f32.partialorder %v6460_v10, 20.0  ;;  %vm2187_vm13 = vcmp.gt.f32.partialorder %v6465_v60, 20.0 }
 0x324   :  { %4035 = vpow2.f32 %v2139_v38  ;;  %vm2191_vm14 = vcmp.gt.f32.partialorder %v6471_v34, 20.0  ;;  %vm2182_vm15 = vcmp.gt.f32.partialorder %v6488_v59, 20.0  ;;  %vm2186_vm0 = vcmp.gt.f32.partialorder %v6491_v17, 20.0 }
 0x325   :  { %4037 = vpow2.f32 %v2121_v53  ;;  %vm2181_vm1 = vcmp.gt.f32.partialorder %v6493_v1, 20.0  ;;  %vm2185_vm2 = vcmp.gt.f32.partialorder %v6495_v13, 20.0  ;;  %vm2189_vm4 = vcmp.gt.f32.partialorder %v6505_v23, 20.0 }
 0x326   :  { %4039 = vpow2.f32 %v2129_v42  ;;  %vm2193_vm5 = vcmp.gt.f32.partialorder %v6507_v18, 20.0 }
 0x327   :  { %v4022_v58 = vpop.eup %4021  ;;  %4041 = vpow2.f32 %v2119_v56 }
 0x328   :  { %v4024_v45 = vpop.eup %4023  ;;  %v2148_v6 = vadd.f32 2.0, %v4022_v58  ;;  %4043 = vpow2.f32 %v2127_v24 }
 0x329   :  { %v4026_v8 = vpop.eup %4025  ;;  %v2152_v39 = vadd.f32 2.0, %v4024_v45 }
 0x32a   :  { %v4028_v35 = vpop.eup %4027  ;;  %v2164_v49 = vmul.f32 %v4022_v58, %v2148_v6  ;;  %v2147_v57 = vadd.f32 2.0, %v4026_v8 }
 0x32b   :  { %v4030_v54 = vpop.eup %4029  ;;  %v2168_v43 = vmul.f32 %v4024_v45, %v2152_v39  ;;  %v2151_v55 = vadd.f32 2.0, %v4028_v35 }
 0x32c   :  { %v4032_v7 = vpop.eup %4031  ;;  %v2212_v15 = vadd.f32 2.0, %v2164_v49  ;;  %v2163_v62 = vmul.f32 %v4026_v8, %v2147_v57  ;;  %v2156_v21 = vadd.f32 2.0, %v4030_v54  ;;  %v2109_v8 = vmin.f32 %v6505_v23, 20.0 }
 0x32d   :  { %v4034_v2 = vpop.eup %4033  ;;  %v2216_v48 = vadd.f32 2.0, %v2168_v43  ;;  %v2167_v0 = vmul.f32 %v4028_v35, %v2151_v55  ;;  %v2160_v16 = vadd.f32 2.0, %v4032_v7  ;;  %v2196_v39 = vmul.f32 %v2164_v49, %v6450_v19 }
 0x32e   :  { %v4036_v11 = vpop.eup %4035  ;;  %4045 = vrcp.f32 %v2212_v15  ;;  %v2211_v30 = vadd.f32 2.0, %v2163_v62  ;;  %v2172_v32 = vmul.f32 %v4030_v54, %v2156_v21  ;;  %v2155_v22 = vadd.f32 2.0, %v4034_v2 }
 0x32f   :  { %v4038_v28 = vpop.eup %4037  ;;  %4047 = vrcp.f32 %v2216_v48  ;;  %v2215_v51 = vadd.f32 2.0, %v2167_v0  ;;  %v2176_v25 = vmul.f32 %v4032_v7, %v2160_v16  ;;  %v2159_v38 = vadd.f32 2.0, %v4036_v11 }
 0x330   :  { %v4040_v36 = vpop.eup %4039  ;;  %4049 = vrcp.f32 %v2211_v30  ;;  %v2220_v44 = vadd.f32 2.0, %v2172_v32  ;;  %v6509_v47 = vmul.f32 %v4034_v2, %v2155_v22  ;;  %v2150_v3 = vadd.f32 2.0, %v4038_v28 }
 0x331   :  { %v4042_v5 = vpop.eup %4041  ;;  %4051 = vrcp.f32 %v2215_v51  ;;  %v2224_v52 = vadd.f32 2.0, %v2176_v25  ;;  %v2154_v14 = vadd.f32 2.0, %v4040_v36  ;;  %v6511_v53 = vmul.f32 %v4036_v11, %v2159_v38 }
 0x332   :  { %v4044_v50 = vpop.eup %4043  ;;  %4053 = vrcp.f32 %v2220_v44  ;;  %v2149_v42 = vadd.f32 2.0, %v4042_v5  ;;  %v2219_v56 = vadd.f32 2.0, %v6509_v47  ;;  %v6514_v24 = vmul.f32 %v4038_v28, %v2150_v3 }
 0x333   :  { %4055 = vrcp.f32 %v2224_v52  ;;  %v2153_v12 = vadd.f32 2.0, %v4044_v50  ;;  %v6516_v20 = vmul.f32 %v4040_v36, %v2154_v14  ;;  %v2223_v41 = vadd.f32 2.0, %v6511_v53 }
 0x334   :  { %v6520_v58 = vmul.f32 %v4042_v5, %v2149_v42  ;;  %4057 = vrcp.f32 %v2219_v56  ;;  %v2214_v6 = vadd.f32 2.0, %v6514_v24  ;;  %v2113_v57 = vmin.f32 %v6507_v18, 20.0 }
 0x335   :  { %v6522_v45 = vmul.f32 %v4044_v50, %v2153_v12  ;;  %4059 = vrcp.f32 %v2223_v41  ;;  %v2218_v35 = vadd.f32 2.0, %v6516_v20  ;;  %v2200_v55 = vmul.f32 %v2168_v43, %v6452_v33  ;;  %v3926_v41 = vld [vmem:[%s7092_s2 + $0x22c] ss:$16 sps:$4 sm:$0xff]  }
 0x336   :  { %4061 = vrcp.f32 %v2214_v6  ;;  %v2213_v7 = vadd.f32 2.0, %v6520_v58  ;;  %v2195_v48 = vmul.f32 %v2163_v62, %v6454_v9  ;;  %v2199_v11 = vmul.f32 %v2167_v0, %v6456_v27 }
 0x337   :  { %v2217_v15 = vadd.f32 2.0, %v6522_v45  ;;  %4063 = vrcp.f32 %v2218_v35  ;;  %v2135_v30 = vmul.f32 1.442695, %v2109_v8  ;;  %v2204_v36 = vmul.f32 %v2172_v32, %v6458_v40  ;;  %v3915_v32 = vld [vmem:[%s7092_s2 + $0x200] ss:$16 sps:$4 sm:$0xff]  }
 0x338   :  { %v4046_v54 = vpop.eup %4045  ;;  %4065 = vrcp.f32 %v2213_v7  ;;  %v2208_v5 = vmul.f32 %v2176_v25, %v6460_v10  ;;  %v2143_v0 = vmul.f32 1.442695, %v2113_v57  ;;  %v2203_v42 = vmul.f32 %v6509_v47, %v6465_v60  ;;  %v7333_v8 = vld [vmem:[#allocation63_spill] sm:$0xff] }
 0x339   :  { %v4048_v21 = vpop.eup %4047  ;;  %v2244_v2 = vmul.f32 %v4046_v54, %v2196_v39  ;;  %4067 = vrcp.f32 %v2217_v15  ;;  %v2207_v6 = vmul.f32 %v6511_v53, %v6471_v34  ;;  %v2198_v35 = vmul.f32 %v6514_v24, %v6488_v59  ;;  %v3921_v54 = vld [vmem:[%s7092_s2 + $0x220] ss:$16 sps:$4 sm:$0xff]   ;;  %v3924_v53 = vld [vmem:[%s7092_s2 + $0x228] ss:$16 sps:$4 sm:$0xff]  }
 0x33a   :  { %v4050_v49 = vpop.eup %4049  ;;  %v2248_v16 = vmul.f32 %v4048_v21, %v2200_v55  ;;  %4069 = vpow2.f32 %v2135_v30  ;;  %v2202_v7 = vmul.f32 %v6516_v20, %v6491_v17  ;;  %v7334_v15 = vld [vmem:[#allocation59_spill] sm:$0xff]  ;;  %v2197_v20 = vmul.f32 %v6520_v58, %v6493_v1 }
 0x33b   :  { %v4052_v28 = vpop.eup %4051  ;;  %v2260_v43 = vsel %vm2180_vm7, %v6450_v19, %v2244_v2  ;;  %v2243_v51 = vmul.f32 %v4050_v49, %v2195_v48  ;;  %4071 = vpow2.f32 %v2143_v0  ;;  %v2025_v24 = vmul.f32 %v6430_v4, %v7334_v15  ;;  %v3929_v2 = vld [vmem:[%s7092_s2 + $0x244] ss:$16 sps:$4 sm:$0xff]   ;;  %v3932_v48 = vld [vmem:[%s7092_s2 + $0x24c] ss:$16 sps:$4 sm:$0xff]  }
 0x33c   :  { %v4054_v44 = vpop.eup %4053  ;;  %v2264_v62 = vsel %vm2184_vm8, %v6452_v33, %v2248_v16  ;;  %v2247_v22 = vmul.f32 %v4052_v28, %v2199_v11  ;;  %v3918_v33 = vld [vmem:[%s7092_s2 + $0x208] ss:$16 sps:$4 sm:$0xff]  }
 0x33d   :  { %v4056_v52 = vpop.eup %4055  ;;  %v2276_v38 = vpack.c.bf16 %v2264_v62, %v2260_v43  ;;  %v2259_v19 = vsel %vm2179_vm9, %v6454_v9, %v2243_v51  ;;  %v2252_v50 = vmul.f32 %v4054_v44, %v2204_v36 }
 0x33e   :  { %v2263_v25 = vsel %vm2183_vm10, %v6456_v27, %v2247_v22  ;;  %v2256_v3 = vmul.f32 %v4056_v52, %v2208_v5  ;;  %v4058_v12 = vpop.eup %4057  ;;  %v3923_v27 = vld [vmem:[%s7092_s2 + $0x224] ss:$16 sps:$4 sm:$0xff]   ;;  %v6616_v5 = vadd.f32 %v6474_v37, %v2025_v24 }
 0x33f   :  { %3083 = vmatprep.mubr.bf16.mxu0 %v2276_v38  ;;  %3189 = vmatprep.mubr.bf16.mxu1 %v2276_v38  ;;  %v2275_v14 = vpack.c.bf16 %v2263_v25, %v2259_v19  ;;  %v2268_v9 = vsel %vm2188_vm11, %v6458_v40, %v2252_v50  ;;  %v2021_v40 = vmul.f32 %v6430_v4, %v7333_v8  ;;  %v4060_v39 = vpop.eup %4059  ;;  %v3944_v25 = vld [vmem:[%s7092_s2 + $0x28c] ss:$16 sps:$4 sm:$0xff]  }
 0x340   :  { %v2272_v56 = vsel %vm2192_vm12, %v6460_v10, %v2256_v3  ;;  %v2251_v10 = vmul.f32 %v4058_v12, %v2203_v42  ;;  %v4062_v57 = vpop.eup %4061  ;;  %v2255_v55 = vmul.f32 %v4060_v39, %v2207_v6  ;;  %v2201_v4 = vmul.f32 %v6522_v45, %v6495_v13  ;;  %v3927_v45 = vld [vmem:[%s7092_s2 + $0x240] ss:$16 sps:$4 sm:$0xff]   ;;  %v3950_v8 = vld [vmem:[%s7092_s2 + $0x2ac] ss:$16 sps:$4 sm:$0xff]  }
 0x341   :  { %3084 = vmatmul.mubr.bf16.vlgmr.msra.gmra.mrb[0].mxu0 %v2275_v14  ;;  %3190 = vmatmul.mubr.bf16.vlgmr.msra.gmra.mrb[0].mxu1 %v2275_v14  ;;  %v2280_v47 = vpack.c.bf16 %v2272_v56, %v2268_v9  ;;  %v4064_v21 = vpop.eup %4063  ;;  %v2246_v49 = vmul.f32 %v4062_v57, %v2198_v35  ;;  %v6602_v58 = vadd.f32 %v6474_v37, %v2021_v40  ;;  %v3933_v37 = vld [vmem:[%s7092_s2 + $0x260] ss:$16 sps:$4 sm:$0xff]   ;;  %v2114_v3 = vmin.f32 %v6616_v5, 20.0  ;;  %v3953_v35 = vld [vmem:[%s7092_s2 + $0x2c4] ss:$16 sps:$4 sm:$0xff]  }
 0x342   :  { %3105 = vmatpush1.bf16.msra.mxu0 %v3915_v32  ;;  %3211 = vmatpush1.bf16.msra.mxu1 %v3918_v33  ;;  %v4066_v16 = vpop.eup %4065  ;;  %v2267_v11 = vsel %vm2187_vm13, %v6465_v60, %v2251_v10  ;;  %v2271_v30 = vsel %vm2191_vm14, %v6471_v34, %v2255_v55  ;;  %v2250_v28 = vmul.f32 %v4064_v21, %v2202_v7  ;;  %v3930_v60 = vld [vmem:[%s7092_s2 + $0x248] ss:$16 sps:$4 sm:$0xff]   ;;  %v3939_v42 = vld [vmem:[%s7092_s2 + $0x280] ss:$16 sps:$4 sm:$0xff]   ;;  %v3956_v57 = vld [vmem:[%s7092_s2 + $0x2cc] ss:$16 sps:$4 sm:$0xff]  }
 0x343   :  { %3093 = vmatprep.mubr.bf16.mxu0 %v2280_v47  ;;  %3199 = vmatprep.mubr.bf16.mxu1 %v2280_v47  ;;  %v4068_v43 = vpop.eup %4067  ;;  %v2245_v51 = vmul.f32 %v4066_v16, %v2197_v20  ;;  %v2262_v34 = vsel %vm2182_vm15, %v6488_v59, %v2246_v49  ;;  %v2279_v62 = vpack.c.bf16 %v2271_v30, %v2267_v11  ;;  %v3935_v59 = vld [vmem:[%s7092_s2 + $0x264] ss:$16 sps:$4 sm:$0xff]   ;;  %v3936_v32 = vld [vmem:[%s7092_s2 + $0x268] ss:$16 sps:$4 sm:$0xff]   ;;  %v2110_v33 = vmin.f32 %v6602_v58, 20.0 }
 0x344   :  { %3106 = vmatprep.subr.bf16.mxu0 %v3923_v27  ;;  %3212 = vmatprep.subr.bf16.mxu1 %v3926_v41  ;;  %v2266_v36 = vsel %vm2186_vm0, %v6491_v17, %v2250_v28  ;;  %v2249_v44 = vmul.f32 %v4068_v43, %v2201_v4  ;;  %v4070_v0 = vpop.eup %4069  ;;  %v3938_v17 = vld [vmem:[%s7092_s2 + $0x26c] ss:$16 sps:$4 sm:$0xff]   ;;  %v3942_v27 = vld [vmem:[%s7092_s2 + $0x288] ss:$16 sps:$4 sm:$0xff]   ;;  %v3947_v41 = vld [vmem:[%s7092_s2 + $0x2a4] ss:$16 sps:$4 sm:$0xff]  }
 0x345   :  { %v2261_v22 = vsel %vm2181_vm1, %v6493_v1, %v2245_v51  ;;  %v2278_v38 = vpack.c.bf16 %v2266_v36, %v2262_v34  ;;  %v2157_v1 = vadd.f32 2.0, %v4070_v0  ;;  %v4072_v50 = vpop.eup %4071  ;;  %v2137_v6 = vmul.f32 1.442695, %v2110_v33  ;;  %v3945_v47 = vld [vmem:[%s7092_s2 + $0x2a0] ss:$16 sps:$4 sm:$0xff]  }
 0x346   :  { %3107 = vmatpush1.bf16.msra.mxu0 %v3921_v54  ;;  %3213 = vmatpush1.bf16.msra.mxu1 %v3924_v53  ;;  %v2265_v52 = vsel %vm2185_vm2, %v6495_v13, %v2249_v44  ;;  %v3941_v13 = vld [vmem:[%s7092_s2 + $0x284] ss:$16 sps:$4 sm:$0xff]   ;;  %v2161_v14 = vadd.f32 2.0, %v4072_v50  ;;  %v2145_v40 = vmul.f32 1.442695, %v2114_v3  ;;  %vm2190_vm7 = vcmp.gt.f32.partialorder %v6602_v58, 20.0 }
 0x347   :  { %3108 = vmatprep.subr.bf16.mxu0 %v3929_v2  ;;  %3214 = vmatprep.subr.bf16.mxu1 %v3932_v48  ;;  %v6625_v19 = vpack.c.bf16 %v2265_v52, %v2261_v22  ;;  %v2173_v9 = vmul.f32 %v4070_v0, %v2157_v1  ;;  %v3948_v10 = vld [vmem:[%s7092_s2 + $0x2a8] ss:$16 sps:$4 sm:$0xff]   ;;  %v3951_v54 = vld [vmem:[%s7092_s2 + $0x2c0] ss:$16 sps:$4 sm:$0xff]   ;;  %v3959_v55 = vld [vmem:[%s7092_s2 + $0x2e4] ss:$16 sps:$4 sm:$0xff]  }
 0x348   :  { %v2177_v12 = vmul.f32 %v4072_v50, %v2161_v14  ;;  %v3954_v53 = vld [vmem:[%s7092_s2 + $0x2c8] ss:$16 sps:$4 sm:$0xff]   ;;  %v3962_v7 = vld [vmem:[%s7092_s2 + $0x2ec] ss:$16 sps:$4 sm:$0xff]   ;;  %v3957_v21 = vld [vmem:[%s7092_s2 + $0x2e0] ss:$16 sps:$4 sm:$0xff]  }
 0x349   :  { %3094 = vmatmul.mubr.bf16.gmra.mrb[4].mxu0 %v2279_v62  ;;  %3200 = vmatmul.mubr.bf16.gmra.mrb[4].mxu1 %v2279_v62  ;;  %v2221_v56 = vadd.f32 2.0, %v2173_v9  ;;  %v2205_v15 = vmul.f32 %v2173_v9, %v6505_v23  ;;  %v3960_v2 = vld [vmem:[%s7092_s2 + $0x2e8] ss:$16 sps:$4 sm:$0xff]   ;;  %v3965_v4 = vld [vmem:[%s7092_s2 + $0x304] ss:$16 sps:$4 sm:$0xff]   ;;  %vm2194_vm8 = vcmp.gt.f32.partialorder %v6616_v5, 20.0 }
 0x34a   :  { %3109 = vmatpush1.bf16.msra.mxu0 %v3927_v45  ;;  %3215 = vmatpush1.bf16.msra.mxu1 %v3930_v60  ;;  %v2225_v39 = vadd.f32 2.0, %v2177_v12  ;;  %v2209_v48 = vmul.f32 %v2177_v12, %v6507_v18  ;;  %v3968_v16 = vld [vmem:[%s7092_s2 + $0x30c] ss:$16 sps:$4 sm:$0xff]   ;;  %v3963_v51 = vld [vmem:[%s7092_s2 + $0x300] ss:$16 sps:$4 sm:$0xff]  }
 0x34b   :  { %3136 = vmatprep.mubr.bf16.mxu0 %v2278_v38  ;;  %3242 = vmatprep.mubr.bf16.mxu1 %v2278_v38  ;;  %4073 = vrcp.f32 %v2221_v56  ;;  %v3966_v45 = vld [vmem:[%s7092_s2 + $0x308] ss:$16 sps:$4 sm:$0xff]   ;;  %v3974_v34 = vld [vmem:[%s7092_s2 + $0x32c] ss:$16 sps:$4 sm:$0xff]   ;;  %v3977_v0 = vld [vmem:[%s7092_s2 + $0x344] ss:$16 sps:$4 sm:$0xff]  }
 0x34c   :  { %3110 = vmatprep.subr.bf16.mxu0 %v3935_v59  ;;  %3216 = vmatprep.subr.bf16.mxu1 %v3938_v17  ;;  %4075 = vrcp.f32 %v2225_v39  ;;  %v3972_v22 = vld [vmem:[%s7092_s2 + $0x328] ss:$16 sps:$4 sm:$0xff]   ;;  %v3980_v59 = vld [vmem:[%s7092_s2 + $0x34c] ss:$16 sps:$4 sm:$0xff]   ;;  %v3975_v38 = vld [vmem:[%s7092_s2 + $0x340] ss:$16 sps:$4 sm:$0xff]  }
 0x34d   :  { %4077 = vpow2.f32 %v2137_v6  ;;  %v3978_v1 = vld [vmem:[%s7092_s2 + $0x348] ss:$16 sps:$4 sm:$0xff]   ;;  %v3983_v50 = vld [vmem:[%s7092_s2 + $0x364] ss:$16 sps:$4 sm:$0xff]   ;;  %v3992_v14 = vld [vmem:[%s7092_s2 + $0x38c] ss:$16 sps:$4 sm:$0xff]  }
 0x34e   :  { %3111 = vmatpush1.bf16.msra.mxu0 %v3933_v37  ;;  %3217 = vmatpush1.bf16.msra.mxu1 %v3936_v32  ;;  %4079 = vpow2.f32 %v2145_v40  ;;  %v3986_v37 = vld [vmem:[%s7092_s2 + $0x36c] ss:$16 sps:$4 sm:$0xff]   ;;  %v3989_v3 = vld [vmem:[%s7092_s2 + $0x384] ss:$16 sps:$4 sm:$0xff]   ;;  %v3987_v9 = vld [vmem:[%s7092_s2 + $0x380] ss:$16 sps:$4 sm:$0xff]  }
 0x34f   :  { %3112 = vmatprep.subr.bf16.mxu0 %v3941_v13  ;;  %3218 = vmatprep.subr.bf16.mxu1 %v3944_v25  ;;  %v3981_v13 = vld [vmem:[%s7092_s2 + $0x360] ss:$16 sps:$4 sm:$0xff]   ;;  %v3984_v25 = vld [vmem:[%s7092_s2 + $0x368] ss:$16 sps:$4 sm:$0xff]   ;;  %v3995_v12 = vld [vmem:[%s7092_s2 + $0x3a4] ss:$16 sps:$4 sm:$0xff]  }
 0x350   :  { %v3998_v56 = vld [vmem:[%s7092_s2 + $0x3ac] ss:$16 sps:$4 sm:$0xff]   ;;  %v4001_v6 = vld [vmem:[%s7092_s2 + $0x3c4] ss:$16 sps:$4 sm:$0xff]  }
 0x352   :  { %3113 = vmatpush1.bf16.msra.mxu0 %v3939_v42  ;;  %3219 = vmatpush1.bf16.msra.mxu1 %v3942_v27  ;;  %v3990_v42 = vld [vmem:[%s7092_s2 + $0x388] ss:$16 sps:$4 sm:$0xff]   ;;  %v3993_v27 = vld [vmem:[%s7092_s2 + $0x3a0] ss:$16 sps:$4 sm:$0xff]  }
 0x353   :  { %3114 = vmatprep.subr.bf16.mxu0 %v3947_v41  ;;  %3220 = vmatprep.subr.bf16.mxu1 %v3950_v8  ;;  %v3996_v41 = vld [vmem:[%s7092_s2 + $0x3a8] ss:$16 sps:$4 sm:$0xff]   ;;  %v4004_v8 = vld [vmem:[%s7092_s2 + $0x3cc] ss:$16 sps:$4 sm:$0xff]  }
 0x355   :  { %v4074_v24 = vpop.eup %4073 }
 0x356   :  { %3115 = vmatpush1.bf16.msra.mxu0 %v3945_v47  ;;  %3221 = vmatpush1.bf16.msra.mxu1 %v3948_v10  ;;  %v2253_v49 = vmul.f32 %v4074_v24, %v2205_v15  ;;  %v4076_v20 = vpop.eup %4075  ;;  %v3999_v47 = vld [vmem:[%s7092_s2 + $0x3c0] ss:$16 sps:$4 sm:$0xff]   ;;  %v4002_v10 = vld [vmem:[%s7092_s2 + $0x3c8] ss:$16 sps:$4 sm:$0xff]  }
 0x357   :  { %3116 = vmatprep.subr.bf16.mxu0 %v3953_v35  ;;  %3222 = vmatprep.subr.bf16.mxu1 %v3956_v57  ;;  %v4078_v11 = vpop.eup %4077  ;;  %v2257_v30 = vmul.f32 %v4076_v20, %v2209_v48  ;;  %v4007_v35 = vld [vmem:[%s7092_s2 + $0x3e4] ss:$16 sps:$4 sm:$0xff]   ;;  %v4010_v57 = vld [vmem:[%s7092_s2 + $0x3ec] ss:$16 sps:$4 sm:$0xff]   ;;  %v4005_v15 = vld [vmem:[%s7092_s2 + $0x3e0] ss:$16 sps:$4 sm:$0xff]  }
 0x358   :  { %v2269_v28 = vsel %vm2189_vm4, %v6505_v23, %v2253_v49  ;;  %v4080_v43 = vpop.eup %4079  ;;  %v3971_v23 = vld [vmem:[%s7092_s2 + $0x324] ss:$16 sps:$4 sm:$0xff]   ;;  %v2158_v36 = vadd.f32 2.0, %v4078_v11  ;;  %v4008_v24 = vld [vmem:[%s7092_s2 + $0x3e8] ss:$16 sps:$4 sm:$0xff]  }
 0x359   :  { %v2273_v60 = vsel %vm2193_vm5, %v6507_v18, %v2257_v30  ;;  %v2162_v62 = vadd.f32 2.0, %v4080_v43  ;;  %v3969_v18 = vld [vmem:[%s7092_s2 + $0x320] ss:$16 sps:$4 sm:$0xff]  }
 0x35a   :  { %3117 = vmatpush1.bf16.msra.mxu0 %v3951_v54  ;;  %3223 = vmatpush1.bf16.msra.mxu1 %v3954_v53  ;;  %v6707_v44 = vpack.c.bf16 %v2273_v60, %v2269_v28  ;;  %v2174_v17 = vmul.f32 %v4078_v11, %v2158_v36 }
 0x35b   :  { %3118 = vmatprep.subr.bf16.mxu0 %v3959_v55  ;;  %3224 = vmatprep.subr.bf16.mxu1 %v3962_v7  ;;  %v2178_v52 = vmul.f32 %v4080_v43, %v2162_v62 }
 0x35c   :  { %v2222_v32 = vadd.f32 2.0, %v2174_v17  ;;  %v2206_v54 = vmul.f32 %v2174_v17, %v6602_v58 }
 0x35d   :  { %v2226_v33 = vadd.f32 2.0, %v2178_v52  ;;  %v2210_v53 = vmul.f32 %v2178_v52, %v6616_v5 }
 0x35e   :  { %3119 = vmatpush1.bf16.msra.mxu0 %v3957_v21  ;;  %3225 = vmatpush1.bf16.msra.mxu1 %v3960_v2  ;;  %4081 = vrcp.f32 %v2222_v32 }
 0x35f   :  { %3120 = vmatprep.subr.bf16.mxu0 %v3965_v4  ;;  %3226 = vmatprep.subr.bf16.mxu1 %v3968_v16  ;;  %4083 = vrcp.f32 %v2226_v33 }
 0x362   :  { %3121 = vmatpush1.bf16.msra.mxu0 %v3963_v51  ;;  %3227 = vmatpush1.bf16.msra.mxu1 %v3966_v45 }
 0x363   :  { %3122 = vmatprep.subr.bf16.mxu0 %v3971_v23  ;;  %3228 = vmatprep.subr.bf16.mxu1 %v3974_v34 }
 0x366   :  { %3123 = vmatpush1.bf16.msra.mxu0 %v3969_v18  ;;  %3229 = vmatpush1.bf16.msra.mxu1 %v3972_v22 }
 0x367   :  { %3124 = vmatprep.subr.bf16.mxu0 %v3977_v0  ;;  %3230 = vmatprep.subr.bf16.mxu1 %v3980_v59 }
 0x368   :  { %v4082_v40 = vpop.eup %4081 }
 0x369   :  { %v4084_v39 = vpop.eup %4083  ;;  %v2254_v55 = vmul.f32 %v4082_v40, %v2206_v54 }
 0x36a   :  { %3125 = vmatpush1.bf16.msra.mxu0 %v3975_v38  ;;  %3231 = vmatpush1.bf16.msra.mxu1 %v3978_v1  ;;  %v2258_v7 = vmul.f32 %v4084_v39, %v2210_v53 }
 0x36b   :  { %3126 = vmatprep.subr.bf16.mxu0 %v3983_v50  ;;  %3232 = vmatprep.subr.bf16.mxu1 %v3986_v37  ;;  %v2270_v21 = vsel %vm2190_vm7, %v6602_v58, %v2254_v55 }
 0x36c   :  { %v2274_v2 = vsel %vm2194_vm8, %v6616_v5, %v2258_v7 }
 0x36d   :  { %v2282_v48 = vpack.c.bf16 %v2274_v2, %v2270_v21 }
 0x36e   :  { %3127 = vmatpush1.bf16.msra.mxu0 %v3981_v13  ;;  %3233 = vmatpush1.bf16.msra.mxu1 %v3984_v25 }
 0x36f   :  { %3128 = vmatprep.subr.bf16.mxu0 %v3989_v3  ;;  %3234 = vmatprep.subr.bf16.mxu1 %v3992_v14 }
 0x372   :  { %3129 = vmatpush1.bf16.msra.mxu0 %v3987_v9  ;;  %3235 = vmatpush1.bf16.msra.mxu1 %v3990_v42 }
 0x373   :  { %3130 = vmatprep.subr.bf16.mxu0 %v3995_v12  ;;  %3236 = vmatprep.subr.bf16.mxu1 %v3998_v56 }
 0x376   :  { %3131 = vmatpush1.bf16.msra.mxu0 %v3993_v27  ;;  %3237 = vmatpush1.bf16.msra.mxu1 %v3996_v41 }
 0x377   :  { %3132 = vmatprep.subr.bf16.mxu0 %v4001_v6  ;;  %3238 = vmatprep.subr.bf16.mxu1 %v4004_v8 }
 0x37a   :  { %3133 = vmatpush1.bf16.msra.mxu0 %v3999_v47  ;;  %3239 = vmatpush1.bf16.msra.mxu1 %v4002_v10 }
 0x37b   :  { %3134 = vmatprep.subr.bf16.mxu0 %v4007_v35  ;;  %3240 = vmatprep.subr.bf16.mxu1 %v4010_v57 }
 0x37e   :  { %3135 = vmatpush1.bf16.msra.mxu0 %v4005_v15  ;;  %3241 = vmatpush1.bf16.msra.mxu1 %v4008_v24 }
 0x381   :  { %3137 = vmatmul.mubr.bf16.vlgmr.msra.gmra.mrb[0].mxu0 %v6625_v19  ;;  %3243 = vmatmul.mubr.bf16.vlgmr.msra.gmra.mrb[0].mxu1 %v6625_v19 }
 0x382   :  { %3146 = vmatprep.mubr.bf16.mxu0 %v2282_v48  ;;  %3252 = vmatprep.mubr.bf16.mxu1 %v2282_v48 }
 0x389   :  { %3147 = vmatmul.mubr.bf16.gmra.mrb[4].mxu0 %v6707_v44  ;;  %3253 = vmatmul.mubr.bf16.gmra.mrb[4].mxu1 %v6707_v44 }
 0x454   :  { %v6797_v49 = vpop.f32.mrb[0].mxu0  ;;  %v6799_v20 = vpop.f32.mrb[0].mxu1 }
 0x455   :  { %v6801_v58 = vpop.f32.mrb[1].mxu0  ;;  %v6803_v5 = vpop.f32.mrb[1].mxu1  ;;  %v3323_v4 = vmul.f32 %v6797_v49, %v6797_v49  ;;  %v3325_v19 = vmul.f32 %v6799_v20, %v6799_v20 }
 0x456   :  { %v3324_v16 = vmul.f32 %v6801_v58, %v6801_v58  ;;  %v3326_v11 = vmul.f32 %v6803_v5, %v6803_v5  ;;  %v6813_v30 = vpop.f32.mrb[2].mxu0  ;;  %v6815_v28 = vpop.f32.mrb[2].mxu1 }
 0x457   :  { %v3263_v43 = vadd.f32 %v6813_v30, %v6797_v49  ;;  %v3327_v51 = vmul.f32 %v6813_v30, %v6813_v30  ;;  %v3277_v45 = vadd.f32 %v6815_v28, %v6799_v20  ;;  %v3329_v60 = vmul.f32 %v6815_v28, %v6815_v28  ;;  %v6825_v23 = vpop.f32.mrb[3].mxu0  ;;  %v6827_v34 = vpop.f32.mrb[3].mxu1 }
 0x458   :  { %v3270_v36 = vadd.f32 %v6825_v23, %v6801_v58  ;;  %v3328_v44 = vmul.f32 %v6825_v23, %v6825_v23  ;;  %v3284_v62 = vadd.f32 %v6827_v34, %v6803_v5  ;;  %v3330_v18 = vmul.f32 %v6827_v34, %v6827_v34 }
 0x459   :  { %v3264_v22 = vrot.slane %v3263_v43, 4  ;;  %v3339_v0 = vadd.f32 %v3327_v51, %v3323_v4  ;;  %v3278_v59 = vrot.slane %v3277_v45, 4  ;;  %v3353_v17 = vadd.f32 %v3329_v60, %v3325_v19 }
 0x45a   :  { %v3271_v52 = vrot.slane %v3270_v36, 4  ;;  %v3346_v38 = vadd.f32 %v3328_v44, %v3324_v16  ;;  %v3285_v1 = vrot.slane %v3284_v62, 4  ;;  %v3360_v50 = vadd.f32 %v3330_v18, %v3326_v11 }
 0x45b   :  { %v3265_v37 = vadd.f32 %v3264_v22, %v3263_v43  ;;  %v3340_v32 = vrot.slane %v3339_v0, 4  ;;  %v3279_v33 = vadd.f32 %v3278_v59, %v3277_v45  ;;  %v3354_v13 = vrot.slane %v3353_v17, 4 }
 0x45c   :  { %v3272_v25 = vadd.f32 %v3271_v52, %v3270_v36  ;;  %v3347_v3 = vrot.slane %v3346_v38, 4  ;;  %v3286_v14 = vadd.f32 %v3285_v1, %v3284_v62  ;;  %v3361_v9 = vrot.slane %v3360_v50, 4  ;;  %v6837_v42 = vpop.f32.mrb[4].mxu0  ;;  %v6839_v12 = vpop.f32.mrb[4].mxu1 }
 0x45d   :  { %v3266_v56 = vrot.slane %v3265_v37, 2  ;;  %v3341_v27 = vadd.f32 %v3340_v32, %v3339_v0  ;;  %v3280_v41 = vrot.slane %v3279_v33, 2  ;;  %v3355_v6 = vadd.f32 %v3354_v13, %v3353_v17  ;;  %v6841_v8 = vpop.f32.mrb[5].mxu0  ;;  %v6843_v40 = vpop.f32.mrb[5].mxu1 }
 0x45e   :  { %v3273_v39 = vrot.slane %v3272_v25, 2  ;;  %v3348_v47 = vadd.f32 %v3347_v3, %v3346_v38  ;;  %v3287_v10 = vrot.slane %v3286_v14, 2  ;;  %v3362_v35 = vadd.f32 %v3361_v9, %v3360_v50  ;;  %v6845_v57 = vpop.f32.mrb[6].mxu0  ;;  %v6847_v54 = vpop.f32.mrb[6].mxu1 }
 0x45f   :  { %7335 = vst [vmem:[#allocation25_spill] sm:$0xff] %v6847_v54  ;;  %v6849_v53 = vadd.f32 %v3266_v56, %v3265_v37  ;;  %v3342_v55 = vrot.slane %v3341_v27, 2  ;;  %v6851_v7 = vadd.f32 %v3280_v41, %v3279_v33  ;;  %v3356_v15 = vrot.slane %v3355_v6, 2  ;;  %v6853_v24 = vpop.f32.mrb[7].mxu0  ;;  %v6855_v21 = vpop.f32.mrb[7].mxu1 }
 0x460   :  { %7336 = vst [vmem:[#allocation47_spill] sm:$0xff] %v6855_v21  ;;  %v6857_v2 = vadd.f32 %v3273_v39, %v3272_v25  ;;  %v3349_v48 = vrot.slane %v3348_v47, 2  ;;  %v6859_v4 = vadd.f32 %v3287_v10, %v3286_v14  ;;  %v3363_v19 = vrot.slane %v3362_v35, 2 }
 0x461   :  { %v3268_v16 = vrot.slane %v6849_v53, 1  ;;  %v6862_v11 = vadd.f32 %v3342_v55, %v3341_v27  ;;  %v3282_v43 = vrot.slane %v6851_v7, 1  ;;  %v6865_v51 = vadd.f32 %v3356_v15, %v3355_v6 }
 0x462   :  { %v3275_v45 = vrot.slane %v6857_v2, 1  ;;  %v6868_v60 = vadd.f32 %v3349_v48, %v3348_v47  ;;  %v6871_v44 = vadd.f32 %v3363_v19, %v3362_v35  ;;  %v3331_v62 = vmul.f32 %v6837_v42, %v6837_v42 }
 0x463   :  { %v3333_v18 = vmul.f32 %v6839_v12, %v6839_v12  ;;  %v3332_v22 = vmul.f32 %v6841_v8, %v6841_v8  ;;  %v3334_v0 = vmul.f32 %v6843_v40, %v6843_v40  ;;  %v3291_v59 = vadd.f32 %v6845_v57, %v6837_v42 }
 0x464   :  { %v3335_v17 = vmul.f32 %v6845_v57, %v6845_v57  ;;  %v3305_v52 = vadd.f32 %v6847_v54, %v6839_v12  ;;  %v3337_v38 = vmul.f32 %v6847_v54, %v6847_v54  ;;  %v3298_v1 = vadd.f32 %v6853_v24, %v6841_v8 }
 0x465   :  { %v3336_v50 = vmul.f32 %v6853_v24, %v6853_v24  ;;  %v3312_v37 = vadd.f32 %v6855_v21, %v6843_v40  ;;  %v3338_v32 = vmul.f32 %v6855_v21, %v6855_v21  ;;  %v3292_v33 = vrot.slane %v3291_v59, 4 }
 0x466   :  { %v3367_v13 = vadd.f32 %v3335_v17, %v3331_v62  ;;  %v3306_v25 = vrot.slane %v3305_v52, 4  ;;  %v3381_v3 = vadd.f32 %v3337_v38, %v3333_v18  ;;  %v3299_v14 = vrot.slane %v3298_v1, 4 }
 0x467   :  { %v3374_v9 = vadd.f32 %v3336_v50, %v3332_v22  ;;  %v3313_v56 = vrot.slane %v3312_v37, 4  ;;  %v3388_v27 = vadd.f32 %v3338_v32, %v3334_v0  ;;  %v3293_v41 = vadd.f32 %v3292_v33, %v3291_v59 }
 0x468   :  { %v3368_v6 = vrot.slane %v3367_v13, 4  ;;  %v3307_v39 = vadd.f32 %v3306_v25, %v3305_v52  ;;  %v3382_v47 = vrot.slane %v3381_v3, 4  ;;  %v3300_v10 = vadd.f32 %v3299_v14, %v3298_v1 }
 0x469   :  { %v3375_v35 = vrot.slane %v3374_v9, 4  ;;  %v3314_v55 = vadd.f32 %v3313_v56, %v3312_v37  ;;  %v3389_v15 = vrot.slane %v3388_v27, 4  ;;  %v3294_v48 = vrot.slane %v3293_v41, 2 }
 0x46a   :  { %v3369_v19 = vadd.f32 %v3368_v6, %v3367_v13  ;;  %v3308_v36 = vrot.slane %v3307_v39, 2  ;;  %v3383_v21 = vadd.f32 %v3382_v47, %v3381_v3  ;;  %v3301_v54 = vrot.slane %v3300_v10, 2 }
 0x46b   :  { %v3376_v62 = vadd.f32 %v3375_v35, %v3374_v9  ;;  %v3315_v17 = vrot.slane %v3314_v55, 2  ;;  %v3390_v18 = vadd.f32 %v3389_v15, %v3388_v27  ;;  %v3295_v38 = vadd.f32 %v3294_v48, %v3293_v41 }
 0x46c   :  { %v3370_v22 = vrot.slane %v3369_v19, 2  ;;  %v3309_v50 = vadd.f32 %v3308_v36, %v3307_v39  ;;  %v3384_v0 = vrot.slane %v3383_v21, 2  ;;  %v3302_v59 = vadd.f32 %v3301_v54, %v3300_v10 }
 0x46d   :  { %v3377_v32 = vrot.slane %v3376_v62, 2  ;;  %v3316_v52 = vadd.f32 %v3315_v17, %v3314_v55  ;;  %v3391_v33 = vrot.slane %v3390_v18, 2  ;;  %v3296_v1 = vrot.slane %v3295_v38, 1 }
 0x46e   :  { %v3371_v25 = vadd.f32 %v3370_v22, %v3369_v19  ;;  %v3310_v37 = vrot.slane %v3309_v50, 1  ;;  %v3385_v14 = vadd.f32 %v3384_v0, %v3383_v21  ;;  %v3303_v56 = vrot.slane %v3302_v59, 1 }
 0x46f   :  { %v3378_v13 = vadd.f32 %v3377_v32, %v3376_v62  ;;  %v3317_v6 = vrot.slane %v3316_v52, 1  ;;  %v3392_v3 = vadd.f32 %v3391_v33, %v3390_v18  ;;  %v3269_v9 = vadd.f32 %v3268_v16, %v6849_v53 }
 0x470   :  { %v3297_v47 = vadd.f32 %v3296_v1, %v3295_v38  ;;  %v3276_v27 = vadd.f32 %v3275_v45, %v6857_v2  ;;  %v3283_v36 = vadd.f32 %v3282_v43, %v6851_v7  ;;  %v3304_v41 = vadd.f32 %v3303_v56, %v3302_v59 }
 0x471   :  { %v3379_v54 = vrot.slane %v3378_v13, 1  ;;  %v3318_v39 = vadd.f32 %v3317_v6, %v3316_v52  ;;  %v3393_v10 = vrot.slane %v3392_v3, 1  ;;  %v3311_v55 = vadd.f32 %v3310_v37, %v3309_v50 }
 0x472   :  { %v3319_v35 = vadd.f32 %v3297_v47, %v3269_v9  ;;  %v7337_v21 = vrot.slane %v6859_v4, 1  ;;  %v3344_v48 = vrot.slane %v6862_v11, 1  ;;  %v3320_v19 = vadd.f32 %v3304_v41, %v3276_v27 }
 0x473   :  { %v3372_v62 = vrot.slane %v3371_v25, 1  ;;  %v3351_v53 = vrot.slane %v6868_v60, 1  ;;  %v3380_v16 = vadd.f32 %v3379_v54, %v3378_v13  ;;  %v3321_v7 = vadd.f32 %v3311_v55, %v3283_v36 }
 0x474   :  { %v3290_v15 = vadd.f32 %v7337_v21, %v6859_v4  ;;  %3399 = vrot.lane.b32.xlu0 %v3319_v35, %s4151_s5  ;;  %v3345_v43 = vadd.f32 %v3344_v48, %v6862_v11  ;;  %v3358_v45 = vrot.slane %v6865_v51, 1  ;;  %3401 = vrot.lane.b32.xlu1 %v3320_v19, %s4151_s5  ;;  %v3386_v18 = vrot.slane %v3385_v14, 1 }
 0x475   :  { %v3373_v17 = vadd.f32 %v3372_v62, %v3371_v25  ;;  %v3352_v4 = vadd.f32 %v3351_v53, %v6868_v60  ;;  %v3365_v38 = vrot.slane %v6871_v44, 1  ;;  %v3394_v50 = vadd.f32 %v3393_v10, %v3392_v3 }
 0x476   :  { %v3322_v2 = vadd.f32 %v3318_v39, %v3290_v15  ;;  %v3359_v22 = vadd.f32 %v3358_v45, %v6865_v51  ;;  %v3387_v32 = vadd.f32 %v3386_v18, %v3385_v14 }
 0x477   :  { %v3395_v0 = vadd.f32 %v3373_v17, %v3345_v43  ;;  %v3396_v59 = vadd.f32 %v3380_v16, %v3352_v4  ;;  %v3366_v52 = vadd.f32 %v3365_v38, %v6871_v44 }
 0x478   :  { %3403 = vrot.lane.b32.xlu0 %v3321_v7, %s4151_s5  ;;  %3405 = vrot.lane.b32.xlu1 %v3322_v2, %s4151_s5  ;;  %v3397_v11 = vadd.f32 %v3387_v32, %v3359_v22 }
 0x479   :  { %v3398_v33 = vadd.f32 %v3394_v50, %v3366_v52 }
 0x47c   :  { %3437 = vrot.lane.b32.xlu0 %v3395_v0, %s4151_s5  ;;  %3439 = vrot.lane.b32.xlu1 %v3396_v59, %s4151_s5 }
 0x480   :  { %3441 = vrot.lane.b32.xlu0 %v3397_v11, %s4151_s5  ;;  %3443 = vrot.lane.b32.xlu1 %v3398_v33, %s4151_s5 }
 0x4e6   :  { %v3400_v51 = vpop.permute.xlu0 %3399  ;;  %v3402_v60 = vpop.permute.xlu1 %3401 }
 0x4e7   :  { %v3409_v1 = vsel %vm176_vm3, %v3400_v51, %v3402_v60 }
 0x4e8   :  { %v3412_v44 = vadd.f32 %v3409_v1, %v3320_v19 }
 0x4ea   :  { %v3404_v25 = vpop.permute.xlu0 %3403  ;;  %3417 = vrot.lane.b32.xlu1 %v3412_v44, %s4153_s19  ;;  %v3406_v37 = vpop.permute.xlu1 %3405 }
 0x4eb   :  { %v3407_v14 = vsel %vm176_vm3, %v3404_v25, %v3406_v37  ;;  %v3410_v56 = vsel %vm176_vm3, %v3406_v37, %v3400_v51  ;;  %v3408_v3 = vsel %vm176_vm3, %v3402_v60, %v3404_v25 }
 0x4ec   :  { %v3411_v13 = vadd.f32 %v3410_v56, %v3319_v35  ;;  %v3414_v6 = vadd.f32 %v3407_v14, %v3322_v2  ;;  %v3413_v36 = vadd.f32 %v3408_v3, %v3321_v7 }
 0x4ee   :  { %v3438_v9 = vpop.permute.xlu0 %3437  ;;  %3415 = vrot.lane.b32.xlu0 %v3411_v13, %s4153_s19  ;;  %3421 = vrot.lane.b32.xlu1 %v3414_v6, %s4153_s19  ;;  %v3440_v47 = vpop.permute.xlu1 %3439 }
 0x4ef   :  { %v3447_v27 = vsel %vm176_vm3, %v3438_v9, %v3440_v47 }
 0x4f0   :  { %v3450_v41 = vadd.f32 %v3447_v27, %v3396_v59 }
 0x4f2   :  { %v3442_v54 = vpop.permute.xlu0 %3441  ;;  %3419 = vrot.lane.b32.xlu0 %v3413_v36, %s4153_s19  ;;  %3455 = vrot.lane.b32.xlu1 %v3450_v41, %s4153_s19  ;;  %v3444_v39 = vpop.permute.xlu1 %3443 }
 0x4f3   :  { %v3445_v10 = vsel %vm176_vm3, %v3442_v54, %v3444_v39  ;;  %v3448_v35 = vsel %vm176_vm3, %v3444_v39, %v3438_v9  ;;  %v3446_v15 = vsel %vm176_vm3, %v3440_v47, %v3442_v54 }
 0x4f4   :  { %v3449_v55 = vadd.f32 %v3448_v35, %v3395_v0  ;;  %v3452_v21 = vadd.f32 %v3445_v10, %v3398_v33  ;;  %v3451_v48 = vadd.f32 %v3446_v15, %v3397_v11 }
 0x4f6   :  { %3453 = vrot.lane.b32.xlu0 %v3449_v55, %s4153_s19  ;;  %3459 = vrot.lane.b32.xlu1 %v3452_v21, %s4153_s19 }
 0x4fa   :  { %3457 = vrot.lane.b32.xlu0 %v3451_v48, %s4153_s19 }
 0x55c   :  { %v3418_v19 = vpop.permute.xlu1 %3417 }
 0x560   :  { %v3416_v62 = vpop.permute.xlu0 %3415  ;;  %v3422_v53 = vpop.permute.xlu1 %3421 }
 0x561   :  { %v3425_v16 = vsel %vm193_vm6, %v3416_v62, %v3418_v19  ;;  %v3426_v7 = vsel %vm193_vm6, %v3422_v53, %v3416_v62 }
 0x562   :  { %v3428_v45 = vadd.f32 %v3425_v16, %v3412_v44  ;;  %v3427_v17 = vadd.f32 %v3426_v7, %v3411_v13 }
 0x564   :  { %v3420_v2 = vpop.permute.xlu0 %3419  ;;  %v3456_v43 = vpop.permute.xlu1 %3455  ;;  %v3432_v11 = vadd.f32 %v3428_v45, %v3427_v17 }
 0x565   :  { %v3423_v4 = vsel %vm193_vm6, %v3420_v2, %v3422_v53  ;;  %v3424_v18 = vsel %vm193_vm6, %v3418_v19, %v3420_v2 }
 0x566   :  { %v3429_v38 = vadd.f32 %v3424_v18, %v3413_v36  ;;  %v3430_v22 = vadd.f32 %v3423_v4, %v3414_v6 }
 0x568   :  { %v3431_v50 = vadd.f32 %v3430_v22, %v3427_v17  ;;  %v3433_v0 = vadd.f32 %v3429_v38, %v3428_v45  ;;  %v3434_v59 = vadd.f32 %v3430_v22, %v3429_v38  ;;  %v3454_v32 = vpop.permute.xlu0 %3453  ;;  %v3460_v52 = vpop.permute.xlu1 %3459  ;;  %v3796_v45 = vld [vmem:[%s7091_s1 + $0x26] ss:$8 sm:$0xf] }
 0x569   :  { %v3463_v33 = vsel %vm193_vm6, %v3454_v32, %v3456_v43  ;;  %v3464_v51 = vsel %vm193_vm6, %v3460_v52, %v3454_v32 }
 0x56a   :  { %v3435_v60 = vadd.f32 %v3433_v0, %v3431_v50  ;;  %v3436_v1 = vadd.f32 %v3434_v59, %v3432_v11  ;;  %v3466_v44 = vadd.f32 %v3463_v33, %v3450_v41  ;;  %v3465_v25 = vadd.f32 %v3464_v51, %v3449_v55 }
 0x56c   :  { %v3458_v37 = vpop.permute.xlu0 %3457  ;;  %v3475_v3 = vmul.f32 0.001953125, %v3435_v60  ;;  %v3476_v9 = vmul.f32 0.001953125, %v3436_v1  ;;  %v3470_v47 = vadd.f32 %v3466_v44, %v3465_v25 }
 0x56d   :  { %v3461_v14 = vsel %vm193_vm6, %v3458_v37, %v3460_v52  ;;  %v3462_v56 = vsel %vm193_vm6, %v3456_v43, %v3458_v37 }
 0x56e   :  { %v3467_v13 = vadd.f32 %v3462_v56, %v3451_v48  ;;  %v3468_v6 = vadd.f32 %v3461_v14, %v3452_v21  ;;  %v3479_v55 = vmul.f32 %v3475_v3, %v3475_v3  ;;  %v3480_v15 = vmul.f32 %v3476_v9, %v3476_v9 }
 0x570   :  { %v3469_v27 = vadd.f32 %v3468_v6, %v3465_v25  ;;  %v3471_v36 = vadd.f32 %v3467_v13, %v3466_v44  ;;  %v3472_v54 = vadd.f32 %v3468_v6, %v3467_v13 }
 0x572   :  { %v3473_v39 = vadd.f32 %v3471_v36, %v3469_v27  ;;  %v3474_v10 = vadd.f32 %v3472_v54, %v3470_v47  ;;  %v4137_v36 = vld [vmem:[%s7090_s0 + $0x18] sm:$0xff] }
 0x574   :  { %v3477_v35 = vmul.f32 0.001953125, %v3473_v39  ;;  %v3478_v41 = vmul.f32 0.001953125, %v3474_v10  ;;  %v4138_v39 = vld [vmem:[%s7090_s0 + $0x20] sm:$0xff]  ;;  %v4139_v10 = vld [vmem:[%s7090_s0 + $0x28] sm:$0xff] }
 0x576   :  { %v3481_v19 = vsub.f32 %v3477_v35, %v3479_v55  ;;  %v3482_v62 = vsub.f32 %v3478_v41, %v3480_v15  ;;  %v4140_v41 = vld [vmem:[%s7090_s0 + $0x30] sm:$0xff]  ;;  %v4141_v15 = vld [vmem:[%s7090_s0 + $0x38] sm:$0xff] }
 0x578   :  { %v3485_v53 = vadd.f32 1e-05, %v3481_v19  ;;  %v3486_v16 = vadd.f32 1e-05, %v3482_v62 }
 0x57a   :  { %4085 = vrsqrt.f32 %v3485_v53  ;;  %v4142_v53 = vld [vmem:[%s7090_s0 + $0x40] sm:$0xff] }
 0x57b   :  { %4087 = vrsqrt.f32 %v3486_v16 }
 0x584   :  { %v4086_v46 = vpop.eup %4085 }
 0x585   :  { %v4088_v21 = vpop.eup %4087 }
 0x586   :  { %v3491_v48 = vcombine.low %v4086_v46, %v4088_v21  ;;  %v4143_v46 = vld [vmem:[%s7090_s0 + $0x48] sm:$0xff] }
 0x588   :  { %v3498_v7 = vrot.slane %v3491_v48, %v7320_v29  ;;  %v4144_v48 = vld [vmem:[%s7090_s0 + $0x50] sm:$0xff] }
 0x58a   :  { %v3499_v2 = vcombine.low %v3498_v7, %v3498_v7 }
 0x58c   :  { %v3506_v43 = vrot.slane %v3499_v2, %v7320_v29  ;;  %v4145_v2 = vld [vmem:[%s7090_s0 + $0x58] sm:$0xff] }
 0x58e   :  { %v3508_v17 = vmul.f32 %v3796_v45, %v3506_v43 }
 0x590   :  { %v3513_v4 = vrot.slane %v3508_v17, %v7295_v26  ;;  %v3517_v18 = vrot.slane %v3508_v17, %v4967_v31  ;;  %v3521_v38 = vrot.slane %v3508_v17, %v7252_v63  ;;  %v3525_v22 = vrot.slane %v3508_v17, %v7296_v61 }
 0x592   :  { %v3564_v50 = vmul.f32 %v3513_v4, %v3475_v3  ;;  %v3565_v0 = vmul.f32 %v3517_v18, %v3476_v9  ;;  %v3566_v59 = vmul.f32 %v3521_v38, %v3475_v3  ;;  %v3567_v32 = vmul.f32 %v3525_v22, %v3476_v9 }
 0x593   :  { %v3530_v33 = vmul.f32 %v3513_v4, %v6797_v49  ;;  %v3531_v51 = vmul.f32 %v3517_v18, %v6801_v58  ;;  %v3532_v60 = vmul.f32 %v3521_v38, %v6799_v20  ;;  %v3533_v25 = vmul.f32 %v3525_v22, %v6803_v5  ;;  %v3797_v20 = vld [vmem:[%s7091_s1 + $0x27] ss:$8 sm:$0xf] }
 0x594   :  { %v3572_v52 = vcombine.low %v3564_v50, %v3565_v0  ;;  %v3573_v11 = vcombine.low %v3566_v59, %v3567_v32  ;;  %v3534_v37 = vmul.f32 %v3513_v4, %v6813_v30  ;;  %v3535_v14 = vmul.f32 %v3517_v18, %v6825_v23  ;;  %v4147_v50 = vld [vmem:[%s7090_s0 + $0x68] sm:$0xff] }
 0x595   :  { %v3536_v56 = vmul.f32 %v3521_v38, %v6815_v28  ;;  %v3537_v13 = vmul.f32 %v3525_v22, %v6827_v34  ;;  %v3538_v49 = vmul.f32 %v3513_v4, %v6837_v42  ;;  %v3539_v58 = vmul.f32 %v3517_v18, %v6841_v8  ;;  %v7338_v28 = vld [vmem:[#allocation25_spill] sm:$0xff]  ;;  %v7339_v34 = vld [vmem:[#allocation47_spill] sm:$0xff] }
 0x596   :  { %v3580_v1 = vrot.slane %v3572_v52, %v7320_v29  ;;  %v3587_v44 = vrot.slane %v3573_v11, %v7320_v29  ;;  %v3540_v3 = vmul.f32 %v3521_v38, %v6839_v12  ;;  %v3541_v5 = vmul.f32 %v3525_v22, %v6843_v40  ;;  %v4134_v42 = vld [vmem:[%s7090_s0] sm:$0xff]  ;;  %v4135_v12 = vld [vmem:[%s7090_s0 + $0x8] sm:$0xff] }
 0x597   :  { %v3542_v30 = vmul.f32 %v3513_v4, %v6845_v57  ;;  %v3543_v23 = vmul.f32 %v3517_v18, %v6853_v24  ;;  %v3544_v9 = vmul.f32 %v3521_v38, %v7338_v28  ;;  %v3545_v47 = vmul.f32 %v3525_v22, %v7339_v34  ;;  %v4136_v57 = vld [vmem:[%s7090_s0 + $0x10] sm:$0xff]  ;;  %v4146_v38 = vld [vmem:[%s7090_s0 + $0x60] sm:$0xff] }
 0x598   :  { %v3588_v6 = vcombine.low %v3580_v1, %v3587_v44  ;;  %v3546_v8 = vadd.f32 %v4134_v42, %v3530_v33  ;;  %v3547_v40 = vadd.f32 %v4135_v12, %v3531_v51  ;;  %v3548_v24 = vadd.f32 %v4136_v57, %v3532_v60 }
 0x599   :  { %v3549_v54 = vadd.f32 %v4137_v36, %v3533_v25  ;;  %v3551_v35 = vadd.f32 %v4139_v10, %v3535_v14  ;;  %v3552_v55 = vadd.f32 %v4140_v41, %v3536_v56  ;;  %v3553_v19 = vadd.f32 %v4141_v15, %v3537_v13 }
 0x59a   :  { %v3595_v27 = vrot.slane %v3588_v6, %v7320_v29  ;;  %v3550_v29 = vadd.f32 %v4138_v39, %v3534_v37  ;;  %v3554_v16 = vadd.f32 %v4142_v53, %v3538_v49  ;;  %v3555_v21 = vadd.f32 %v4143_v46, %v3539_v58 }
 0x59b   :  { %v3556_v7 = vadd.f32 %v4144_v48, %v3540_v3  ;;  %v3557_v43 = vadd.f32 %v4145_v2, %v3541_v5  ;;  %v3558_v22 = vadd.f32 %v4146_v38, %v3542_v30  ;;  %v3559_v0 = vadd.f32 %v4147_v50, %v3543_v23 }
 0x59c   :  { %v3597_v62 = vsub.f32 %v3797_v20, %v3595_v27 }
 0x59e   :  { %v3602_v45 = vrot.slane %v3597_v62, %v7295_v26  ;;  %v3606_v17 = vrot.slane %v3597_v62, %v4967_v31  ;;  %v3610_v4 = vrot.slane %v3597_v62, %v7252_v63  ;;  %v3614_v18 = vrot.slane %v3597_v62, %v7296_v61  ;;  %v4148_v26 = vld [vmem:[%s7090_s0 + $0x70] sm:$0xff]  ;;  %v4149_v31 = vld [vmem:[%s7090_s0 + $0x78] sm:$0xff] }
 0x59f   :  { %v3560_v59 = vadd.f32 %v4148_v26, %v3544_v9  ;;  %v3561_v63 = vadd.f32 %v4149_v31, %v3545_v47 }
 0x5a0   :  { %v3619_v61 = vadd.f32 %v3602_v45, %v3546_v8  ;;  %v3620_v32 = vadd.f32 %v3606_v17, %v3547_v40  ;;  %v3621_v52 = vadd.f32 %v3610_v4, %v3548_v24  ;;  %v3622_v11 = vadd.f32 %v3614_v18, %v3549_v54 }
 0x5a1   :  { %v3623_v33 = vadd.f32 %v3602_v45, %v3550_v29  ;;  %v3624_v51 = vadd.f32 %v3606_v17, %v3551_v35  ;;  %v3625_v60 = vadd.f32 %v3610_v4, %v3552_v55  ;;  %v3626_v1 = vadd.f32 %v3614_v18, %v3553_v19 }
 0x5a2   :  { %v3627_v44 = vadd.f32 %v3602_v45, %v3554_v16  ;;  %v3628_v25 = vadd.f32 %v3606_v17, %v3555_v21  ;;  %v3629_v37 = vadd.f32 %v3610_v4, %v3556_v7  ;;  %v3630_v14 = vadd.f32 %v3614_v18, %v3557_v43  ;;  %3635 = vst [vmem:[%s7093_s3] sm:$0xff] %v3619_v61 }
 0x5a3   :  { %3636 = vst [vmem:[%s7093_s3 + $0x8] sm:$0xff] %v3620_v32  ;;  %3637 = vst [vmem:[%s7093_s3 + $0x10] sm:$0xff] %v3621_v52  ;;  %v3631_v56 = vadd.f32 %v3602_v45, %v3558_v22  ;;  %v3632_v13 = vadd.f32 %v3606_v17, %v3559_v0  ;;  %v3633_v49 = vadd.f32 %v3610_v4, %v3560_v59 }
 0x5a4   :  { %3638 = vst [vmem:[%s7093_s3 + $0x18] sm:$0xff] %v3622_v11  ;;  %v3634_v58 = vadd.f32 %v3614_v18, %v3561_v63  ;;  %3639 = vst [vmem:[%s7093_s3 + $0x20] sm:$0xff] %v3623_v33 }
 0x5a5   :  { %3640 = vst [vmem:[%s7093_s3 + $0x28] sm:$0xff] %v3624_v51  ;;  %3641 = vst [vmem:[%s7093_s3 + $0x30] sm:$0xff] %v3625_v60 }
 0x5a6   :  { %3642 = vst [vmem:[%s7093_s3 + $0x38] sm:$0xff] %v3626_v1  ;;  %3643 = vst [vmem:[%s7093_s3 + $0x40] sm:$0xff] %v3627_v44 }
 0x5a7   :  { %3644 = vst [vmem:[%s7093_s3 + $0x48] sm:$0xff] %v3628_v25  ;;  %3645 = vst [vmem:[%s7093_s3 + $0x50] sm:$0xff] %v3629_v37 }
 0x5a8   :  { %3646 = vst [vmem:[%s7093_s3 + $0x58] sm:$0xff] %v3630_v14  ;;  %3647 = vst [vmem:[%s7093_s3 + $0x60] sm:$0xff] %v3631_v56 }
 0x5a9   :  { %3648 = vst [vmem:[%s7093_s3 + $0x68] sm:$0xff] %v3632_v13  ;;  %3649 = vst [vmem:[%s7093_s3 + $0x70] sm:$0xff] %v3633_v49 }
 0x5aa   :  { %3650 = vst [vmem:[%s7093_s3 + $0x78] sm:$0xff] %v3634_v58 }

</bundles_post_ra>
